<compile_context>
chip_gen: v6e
topology: v6e:2x2x1
jax: 0.10.0
libtpu: 0.0.40
codegen_flags: <defaults>
</compile_context>

<pallas_src>
import jax
import jax.numpy as jnp
import numpy as np
from jax.experimental import pallas as pl
from jax.experimental.pallas import tpu as pltpu

# ----------------------------- module configuration (defaults of MyEncoder) -----------------
FEATURE_DIM = 2            # data_feature['feature_dim']
OUTPUT_DIM = 2             # data_feature['output_dim']
INPUT_WINDOW = 8           # config['input_window']
LAYERS = 3                 # enc_layers
KERNEL_SIZE = 7
CONV_CHANNELS = 32         # enc_conv_channels
RESIDUAL_CHANNELS = 32     # enc_residual_channels
SKIP_CHANNELS = 64         # enc_skip_channels
LAPE_DIM = 8
KERNEL_SET = (2, 3, 6, 7)  # DilatedInception kernel set

RECEPTIVE_FIELD = LAYERS * (KERNEL_SIZE - 1) + OUTPUT_DIM          # = 20
T_PAD = max(INPUT_WINDOW, RECEPTIVE_FIELD)                         # left zero-pad target = 20
_SKIP_KS = tuple(RECEPTIVE_FIELD - (1 + j * (KERNEL_SIZE - 1)) + 1 for j in range(1, LAYERS + 1))
T_LAST = RECEPTIVE_FIELD - LAYERS * (KERNEL_SIZE - 1)              # final temporal width = 2


def _round_up(x, m):
    return ((x + m - 1) // m) * m


def _cdiv(a, b):
    return -(-a // b)


def _layer_dims():
    """Per-layer (t_in, t_out, gate_lane_offset) with the gate offset 128-aligned."""
    dims = []
    t_in = T_PAD
    for _ in range(LAYERS):
        t_out = t_in - (KERNEL_SIZE - 1)
        g_off = _round_up(t_out * RESIDUAL_CHANNELS, 128)
        dims.append((t_in, t_out, g_off))
        t_in = t_out
    return dims


# ----------------------------- VMEM / tiling heuristics --------------------------------------
_ACT_BYTES_PER_ROW = 24 * 1024      # conservative peak of live f32 intermediates per row


def _vmem_capacity_bytes():
    try:
        cap = getattr(pltpu.get_tpu_info(), "vmem_capacity_bytes", None)
        if cap:
            return int(cap)
    except Exception:
        pass
    return 64 * 1024 * 1024         # assume the smallest generation (v7x) if the query fails


def _vmem_estimate(tile_bn, weight_bytes):
    # double-buffered in/out tiles + double-buffered resident weights + live intermediates
    io = 2 * tile_bn * (T_PAD * FEATURE_DIM * 2 + T_LAST * SKIP_CHANNELS * 4)
    return 2 * weight_bytes + io + tile_bn * _ACT_BYTES_PER_ROW


# ----------------------------- Pallas kernel ------------------------------------------------
def _encoder_kernel(x_ref, *refs):
    """refs = (Win, bin, [Wfg_i, bfg_i, Wsr_i, bsr_i]*LAYERS, Wke, bke, out_ref)."""
    out_ref = refs[-1]
    w = refs[:-1]
    C = RESIDUAL_CHANNELS
    f32 = jnp.float32

    def mm(a, w_ref):                      # bf16 operands, f32 accumulation on the MXU
        return jnp.dot(a.astype(jnp.bfloat16), w_ref[...], preferred_element_type=f32)

    x0 = x_ref[...]                        # (tile_bn, T_PAD*F)  bf16
    # fused [start_conv | skip0]: one wide matmul, skip stored once (64 lanes) at the end
    y = jnp.dot(x0, w[0][...], preferred_element_type=f32) + w[1][...]
    x = y[:, :T_PAD * C]                   # (tile_bn, 640) f32, lane-aligned
    skip = y[:, T_PAD * C:]                # (tile_bn, 64)  f32 skip accumulator

    for i, (t_in, t_out, g_off) in enumerate(_layer_dims()):
        wfg, bfg, wsr, bsr = w[2 + 4 * i: 6 + 4 * i]
        # DilatedInception filter+gate fused as ONE block-banded 7-tap im2col matmul.
        # g_off stays 128-aligned: the few zero pad columns cost no extra MXU blocks on
        # v6e/v7x, whereas an unaligned 448-wide gate slice would force a cross-lane relayout.
        y = mm(x, wfg) + bfg[...]                                   # (tile_bn, 2*g_off)
        filt = y[:, :t_out * C]
        gate = y[:, g_off:g_off + t_out * C]
        z = jnp.tanh(filt) * jax.nn.sigmoid(gate)                   # (tile_bn, t_out*C) f32
        # fused [residual 1x1 | skip_conv] matmul (single 64-lane skip block)
        y2 = mm(z, wsr) + bsr[...]                                  # (tile_bn, t_out*C + S)
        skip = skip + y2[:, t_out * C:]
        # residual connection on the last t_out steps of the layer input (kept f32)
        x = y2[:, :t_out * C] + x[:, (t_in - t_out) * C:]
        del t_in

    # skipE (block-diag over the T_LAST steps) + time-broadcast skip + ReLU -> 128 lanes
    out = mm(x, w[-2]) + w[-1][...] + jnp.concatenate([skip, skip], axis=-1)
    out_ref[...] = jnp.maximum(out, 0.0)


# ----------------------------- wrapper -------------------------------------------------------
def my_encoder_forward(source, lap_mx, big_params, *, tile_bn=None):
    """MyEncoder.forward(source, lap_mx) -> (B, SKIP_CHANNELS, N, T_LAST), PyTorch NCHW order."""
    del lap_mx  # unused by MyEncoder.forward (only forward_with_spatial uses it)
    B, T_in, N, F = source.shape
    assert T_in == INPUT_WINDOW and F == FEATURE_DIM
    bn = B * N

    weight_bytes = int(sum(int(np.prod(w.shape)) * w.dtype.itemsize for w in big_params))
    vmem_cap = _vmem_capacity_bytes()
    tile_cap = 1024 if vmem_cap >= 96 * 1024 * 1024 else 512       # v5e/v6e vs v7x row cap
    budget = min(int(0.75 * vmem_cap), 48 * 1024 * 1024)

    if tile_bn is None:
        # at least 2 grid steps so both v7x TensorCores get work (no-op on 1-TC chips),
        # otherwise the biggest tile that fits the per-generation VMEM budget.
        n = max(2, _cdiv(bn, tile_cap))
        tile_bn = _round_up(_cdiv(bn, n), 16)
        while tile_bn > 16 and (tile_bn > tile_cap or _vmem_estimate(tile_bn, weight_bytes) > budget):
            n += 1
            tile_bn = _round_up(_cdiv(bn, n), 16)
        steps = _cdiv(bn, tile_bn)
        if steps > 1 and steps % 2 == 1:        # best-effort even grid for v7x megacore
            tile_bn = _round_up(_cdiv(bn, steps + 1), 16)
    tile_bn = max(16, _round_up(tile_bn, 16))   # bf16 input tile => 16-sublane multiple
    bn_pad = _round_up(bn, tile_bn)

    # node-major lane-dense slab: x0[b*N+n, t*F + c], left zero time-pad to T_PAD
    x = jnp.transpose(source, (0, 2, 1, 3)).astype(jnp.float32)        # (B, N, T, F)
    x = jnp.pad(x, ((0, 0), (0, 0), (T_PAD - T_in, 0), (0, 0)))        # (B, N, T_PAD, F)
    x0 = x.reshape(bn, T_PAD * F)
    if bn_pad > bn:
        x0 = jnp.pad(x0, ((0, bn_pad - bn), (0, 0)))
    x0 = x0.astype(jnp.bfloat16)

    grid = (bn_pad // tile_bn,)
    w_specs = [pl.BlockSpec(wb.shape, lambda i: (0, 0)) for wb in big_params]
    # TODO(synk): once verified in the MLIR, mark the invariant weights with
    # pipeline_mode=pl.Buffered(1) to drop their second VMEM buffer (~2.7 MiB of headroom).

    # vmem limit derived from the real footprint instead of the full physical VMEM (v7x = 64 MiB)
    vmem_limit = int(max(32 * 1024 * 1024,
                         min(budget, _vmem_estimate(tile_bn, weight_bytes) + 12 * 1024 * 1024)))

    macs_per_row = sum(int(w.shape[0]) * int(w.shape[1]) for w in big_params if w.shape[0] > 1)
    transc_per_row = 2 * sum(t_out * RESIDUAL_CHANNELS for _, t_out, _ in _layer_dims())
    cost = pl.CostEstimate(
        flops=2 * macs_per_row * bn_pad,
        transcendentals=transc_per_row * bn_pad,
        bytes_accessed=bn_pad * (T_PAD * F * 2 + T_LAST * SKIP_CHANNELS * 4) + weight_bytes)

    out2 = pl.pallas_call(
        _encoder_kernel,
        out_shape=jax.ShapeDtypeStruct((bn_pad, T_LAST * SKIP_CHANNELS), jnp.float32),
        grid=grid,
        in_specs=[pl.BlockSpec((tile_bn, T_PAD * F), lambda i: (i, 0))] + w_specs,
        out_specs=pl.BlockSpec((tile_bn, T_LAST * SKIP_CHANNELS), lambda i: (i, 0)),
        compiler_params=pltpu.CompilerParams(
            dimension_semantics=("parallel",),
            vmem_limit_bytes=vmem_limit),
        cost_estimate=cost,
    )(x0, *big_params)

    out = out2[:bn].reshape(B, N, T_LAST, SKIP_CHANNELS)
    return jnp.transpose(out, (0, 3, 1, 2))                            # (B, S, N, T_LAST)


# ----------------------------- host-side weight packing --------------------------------------
def prepare_weights(params):
    """Fold every conv into block-banded/diagonal matrices (bf16 weights, f32 biases).

    Output column layouts (the single 64-lane skip block sits at the END so the wide
    activation slice stays 128-lane aligned):
      Win : [ start_conv (T_PAD*C) | skip0 (S) ]
      Wfg : [ filter (t_out*C) | pad to g_off | gate (t_out*C) | pad to 2*g_off ]
      Wsr : [ residual 1x1 (t_out*C) | skip_conv (S) ]
      Wke : [ skipE block-diag over T_LAST steps ]  -> T_LAST*S = 128 lanes
    """
    (ws, bs, wk0, bk0, wf, bf, wg, bg, wr, br, wsks, bsk, wke, bke) = params
    C, S, F, K = RESIDUAL_CHANNELS, SKIP_CHANNELS, FEATURE_DIM, KERNEL_SIZE
    f32 = np.float32
    to_np = lambda a: np.asarray(a, f32)

    # fused [start_conv | skip0]
    ws_n = to_np(ws)
    Win = np.zeros((T_PAD * F, T_PAD * C + S), f32)
    for t in range(T_PAD):
        Win[t * F:(t + 1) * F, t * C:(t + 1) * C] = ws_n
    Win[:, T_PAD * C:] = to_np(wk0).reshape(T_PAD * F, S)
    bin_ = np.zeros((1, T_PAD * C + S), f32)
    bin_[:, :T_PAD * C] = np.tile(to_np(bs), (1, T_PAD))
    bin_[:, T_PAD * C:] = to_np(bk0)
    weights = [Win, bin_]

    for i, (t_in, t_out, g_off) in enumerate(_layer_dims()):
        wf_n, wg_n = to_np(wf[i]), to_np(wg[i])          # packed 7-tap (K, C, C)
        Wfg = np.zeros((t_in * C, 2 * g_off), f32)
        bfg = np.zeros((1, 2 * g_off), f32)
        for t in range(t_out):
            for k in range(K):
                r0 = (t + k) * C
                Wfg[r0:r0 + C, t * C:(t + 1) * C] += wf_n[k]
                Wfg[r0:r0 + C, g_off + t * C: g_off + (t + 1) * C] += wg_n[k]
        bfg[:, :t_out * C] = np.tile(to_np(bf[i]), (1, t_out))
        bfg[:, g_off:g_off + t_out * C] = np.tile(to_np(bg[i]), (1, t_out))

        wr_n = to_np(wr[i])
        Wsr = np.zeros((t_out * C, t_out * C + S), f32)
        bsr = np.zeros((1, t_out * C + S), f32)
        for t in range(t_out):
            Wsr[t * C:(t + 1) * C, t * C:(t + 1) * C] = wr_n
        Wsr[:, t_out * C:] = to_np(wsks[i]).reshape(t_out * C, S)
        bsr[:, :t_out * C] = np.tile(to_np(br[i]), (1, t_out))
        bsr[:, t_out * C:] = to_np(bsk[i])
        weights += [Wfg, bfg, Wsr, bsr]

    Wke = np.zeros((T_LAST * C, T_LAST * S), f32)
    wke_n = to_np(wke)
    for t in range(T_LAST):
        Wke[t * C:(t + 1) * C, t * S:(t + 1) * S] = wke_n
    bke_big = np.tile(to_np(bke), (1, T_LAST))
    weights += [Wke, bke_big]

    packed = []
    for a in weights:
        if a.shape[0] == 1:                              # biases stay f32
            packed.append(jnp.asarray(a, jnp.float32))
        else:                                            # matmul weights -> bf16
            packed.append(jnp.asarray(a, jnp.bfloat16))
    return tuple(packed)


# ----------------------------- deterministic synthetic parameters ----------------------------
def init_params(key):
    def rnd(k, shape, scale=0.1):
        return scale * jax.random.normal(k, shape, jnp.float32)

    keys = iter(jax.random.split(key, 64))
    C, S, F = RESIDUAL_CHANNELS, SKIP_CHANNELS, FEATURE_DIM

    ws = rnd(next(keys), (F, C))                         # start_conv 1x1
    bs = rnd(next(keys), (1, C))
    wk0 = rnd(next(keys), (T_PAD, F, S))                 # skip0 (kernel width = receptive field)
    bk0 = rnd(next(keys), (1, S))

    # DilatedInception -> packed 7-tap conv: branch with kernel `kern` fills taps [7-kern, 7)
    # of its cout/4 output-channel block; remaining taps stay zero (== right-aligned crop).
    def inception(k):
        cb = CONV_CHANNELS // len(KERNEL_SET)
        w = np.zeros((KERNEL_SIZE, C, CONV_CHANNELS), np.float32)
        b = np.zeros((1, CONV_CHANNELS), np.float32)
        bks = jax.random.split(k, 2 * len(KERNEL_SET))
        for bi, kern in enumerate(KERNEL_SET):
            w[KERNEL_SIZE - kern:, :, bi * cb:(bi + 1) * cb] = np.asarray(rnd(bks[2 * bi], (kern, C, cb)))
            b[0, bi * cb:(bi + 1) * cb] = np.asarray(rnd(bks[2 * bi + 1], (cb,)))
        return jnp.asarray(w), jnp.asarray(b)

    wf, bf, wg, bg, wr, br, wsks, bsk = [], [], [], [], [], [], [], []
    for i in range(LAYERS):
        w, b = inception(next(keys)); wf.append(w); bf.append(b)
        w, b = inception(next(keys)); wg.append(w); bg.append(b)
        wr.append(rnd(next(keys), (CONV_CHANNELS, C)))                  # residual 1x1
        br.append(rnd(next(keys), (1, C)))
        wsks.append(rnd(next(keys), (_SKIP_KS[i], CONV_CHANNELS, S)))   # skip conv (full width)
        bsk.append(rnd(next(keys), (1, S)))

    wke = rnd(next(keys), (C, S))                        # skipE 1x1
    bke = rnd(next(keys), (1, S))

    return (ws, bs, wk0, bk0,
            jnp.stack(wf), jnp.stack(bf), jnp.stack(wg), jnp.stack(bg),
            jnp.stack(wr), jnp.stack(br),
            wsks, jnp.stack(bsk), wke, bke)


# ----------------------------- pure-JAX f32 reference (per-tap, mirrors PyTorch graph) -------
def reference_forward(source, params):
    (ws, bs, wk0, bk0, wf, bf, wg, bg, wr, br, wsks, bsk, wke, bke) = params
    B, T_in, N, F = source.shape
    x = jnp.transpose(source, (0, 2, 1, 3)).astype(jnp.float32)        # (B, N, T, F)
    x = jnp.pad(x, ((0, 0), (0, 0), (T_PAD - T_in, 0), (0, 0)))

    def conv_t(inp, w, b):                               # w: (K, Cin, Cout), "valid" conv
        Kw = w.shape[0]
        To = inp.shape[2] - Kw + 1
        out = b
        for k in range(Kw):
            out = out + jnp.einsum('bntc,cd->bntd', inp[:, :, k:k + To, :], w[k])
        return out

    xs = conv_t(x, ws[None], bs)                         # start_conv
    skip = conv_t(x, wk0, bk0)                           # skip0 -> width 1
    for i in range(LAYERS):
        residual = xs
        z = jnp.tanh(conv_t(xs, wf[i], bf[i])) * jax.nn.sigmoid(conv_t(xs, wg[i], bg[i]))
        skip = skip + conv_t(z, wsks[i], bsk[i])
        xs = conv_t(z, wr[i][None], br[i]) + residual[:, :, -z.shape[2]:, :]
    out = jnp.maximum(conv_t(xs, wke[None], bke) + skip, 0.0)          # (B, N, T_LAST, S)
    return jnp.transpose(out, (0, 3, 1, 2))                            # (B, S, N, T_LAST)


if __name__ == "__main__":
    key = jax.random.PRNGKey(0)
    k_par, k_src, k_lap = jax.random.split(key, 3)
    B, N = 2, 16

    params = init_params(k_par)
    big_params = prepare_weights(params)
    source = jax.random.normal(k_src, (B, INPUT_WINDOW, N, FEATURE_DIM), jnp.float32)
    lap_mx = jax.random.normal(k_lap, (N, LAPE_DIM), jnp.float32)      # unused by forward()

    fwd = jax.jit(my_encoder_forward, static_argnames=("tile_bn",))
    out = jax.block_until_ready(fwd(source, lap_mx, big_params))       # heuristic -> 2 tiles of 16
    assert out.shape == (B, SKIP_CHANNELS, N, T_LAST), out.shape

    ref = jax.block_until_ready(reference_forward(source, params))
    np.testing.assert_allclose(np.asarray(out), np.asarray(ref), rtol=2e-2, atol=2e-2)
    print("KERNEL_OK")
</pallas_src>

<mosaic_0001>
module attributes {stable_mosaic.version = 11 : i64} {
  func.func @_encoder_kernel(%arg0: i32, %arg1: memref<16x40xbf16, #tpu.memory_space<vmem>>, %arg2: memref<40x704xbf16, #tpu.memory_space<vmem>>, %arg3: memref<1x704xf32, #tpu.memory_space<vmem>>, %arg4: memref<640x1024xbf16, #tpu.memory_space<vmem>>, %arg5: memref<1x1024xf32, #tpu.memory_space<vmem>>, %arg6: memref<448x512xbf16, #tpu.memory_space<vmem>>, %arg7: memref<1x512xf32, #tpu.memory_space<vmem>>, %arg8: memref<448x512xbf16, #tpu.memory_space<vmem>>, %arg9: memref<1x512xf32, #tpu.memory_space<vmem>>, %arg10: memref<256x320xbf16, #tpu.memory_space<vmem>>, %arg11: memref<1x320xf32, #tpu.memory_space<vmem>>, %arg12: memref<256x256xbf16, #tpu.memory_space<vmem>>, %arg13: memref<1x256xf32, #tpu.memory_space<vmem>>, %arg14: memref<64x128xbf16, #tpu.memory_space<vmem>>, %arg15: memref<1x128xf32, #tpu.memory_space<vmem>>, %arg16: memref<64x128xbf16, #tpu.memory_space<vmem>>, %arg17: memref<1x128xf32, #tpu.memory_space<vmem>>, %arg18: memref<16x128xf32, #tpu.memory_space<vmem>>) attributes {dimension_semantics = [#tpu.dimension_semantics<parallel>], iteration_bounds = array<i64: 2>, scalar_prefetch = 0 : i64, scratch_operands = 0 : i64, tpu.core_type = #tpu.core_type<tc>, window_params = [{transform_indices = @transform_0, window_bounds = array<i64: 16, 40>}, {pipeline_mode = #tpu.pipeline_mode<synchronous>, transform_indices = @transform_1, window_bounds = array<i64: 40, 704>}, {pipeline_mode = #tpu.pipeline_mode<synchronous>, transform_indices = @transform_2, window_bounds = array<i64: 1, 704>}, {pipeline_mode = #tpu.pipeline_mode<synchronous>, transform_indices = @transform_3, window_bounds = array<i64: 640, 1024>}, {pipeline_mode = #tpu.pipeline_mode<synchronous>, transform_indices = @transform_4, window_bounds = array<i64: 1, 1024>}, {pipeline_mode = #tpu.pipeline_mode<synchronous>, transform_indices = @transform_5, window_bounds = array<i64: 448, 512>}, {pipeline_mode = #tpu.pipeline_mode<synchronous>, transform_indices = @transform_6, window_bounds = array<i64: 1, 512>}, {pipeline_mode = #tpu.pipeline_mode<synchronous>, transform_indices = @transform_7, window_bounds = array<i64: 448, 512>}, {pipeline_mode = #tpu.pipeline_mode<synchronous>, transform_indices = @transform_8, window_bounds = array<i64: 1, 512>}, {pipeline_mode = #tpu.pipeline_mode<synchronous>, transform_indices = @transform_9, window_bounds = array<i64: 256, 320>}, {pipeline_mode = #tpu.pipeline_mode<synchronous>, transform_indices = @transform_10, window_bounds = array<i64: 1, 320>}, {pipeline_mode = #tpu.pipeline_mode<synchronous>, transform_indices = @transform_11, window_bounds = array<i64: 256, 256>}, {pipeline_mode = #tpu.pipeline_mode<synchronous>, transform_indices = @transform_12, window_bounds = array<i64: 1, 256>}, {pipeline_mode = #tpu.pipeline_mode<synchronous>, transform_indices = @transform_13, window_bounds = array<i64: 64, 128>}, {pipeline_mode = #tpu.pipeline_mode<synchronous>, transform_indices = @transform_14, window_bounds = array<i64: 1, 128>}, {pipeline_mode = #tpu.pipeline_mode<synchronous>, transform_indices = @transform_15, window_bounds = array<i64: 64, 128>}, {pipeline_mode = #tpu.pipeline_mode<synchronous>, transform_indices = @transform_16, window_bounds = array<i64: 1, 128>}, {transform_indices = @transform_17, window_bounds = array<i64: 16, 128>}]} {
    %c0 = arith.constant 0 : index
    %c0_0 = arith.constant 0 : index
    %0 = vector.load %arg1[%c0, %c0_0] : memref<16x40xbf16, #tpu.memory_space<vmem>>, vector<16x40xbf16>
    %c0_1 = arith.constant 0 : index
    %c0_2 = arith.constant 0 : index
    %1 = vector.load %arg2[%c0_1, %c0_2] : memref<40x704xbf16, #tpu.memory_space<vmem>>, vector<40x704xbf16>
    %cst = arith.constant dense<0.000000e+00> : vector<16x704xf32>
    %2 = tpu.matmul %0, %1, %cst {dimension_numbers = #tpu.dot_dimension_numbers<[1], [0], [0], [1], [0, 0, 1, 1], [], []>} : vector<16x40xbf16>, vector<40x704xbf16>, vector<16x704xf32> -> vector<16x704xf32>
    %c0_3 = arith.constant 0 : index
    %c0_4 = arith.constant 0 : index
    %3 = vector.load %arg3[%c0_3, %c0_4] : memref<1x704xf32, #tpu.memory_space<vmem>>, vector<1x704xf32>
    %4 = vector.broadcast %3 : vector<1x704xf32> to vector<16x704xf32>
    %5 = arith.addf %2, %4 : vector<16x704xf32>
    %6 = vector.extract_strided_slice %5 {offsets = [0, 0], sizes = [16, 640], strides = [1, 1]} : vector<16x704xf32> to vector<16x640xf32>
    %7 = vector.extract_strided_slice %5 {offsets = [0, 640], sizes = [16, 64], strides = [1, 1]} : vector<16x704xf32> to vector<16x64xf32>
    %8 = arith.truncf %6 : vector<16x640xf32> to vector<16x640xbf16>
    %c0_5 = arith.constant 0 : index
    %c0_6 = arith.constant 0 : index
    %9 = vector.load %arg4[%c0_5, %c0_6] : memref<640x1024xbf16, #tpu.memory_space<vmem>>, vector<640x1024xbf16>
    %cst_7 = arith.constant dense<0.000000e+00> : vector<16x1024xf32>
    %10 = tpu.matmul %8, %9, %cst_7 {dimension_numbers = #tpu.dot_dimension_numbers<[1], [0], [0], [1], [0, 0, 1, 1], [], []>} : vector<16x640xbf16>, vector<640x1024xbf16>, vector<16x1024xf32> -> vector<16x1024xf32>
    %c0_8 = arith.constant 0 : index
    %c0_9 = arith.constant 0 : index
    %11 = vector.load %arg5[%c0_8, %c0_9] : memref<1x1024xf32, #tpu.memory_space<vmem>>, vector<1x1024xf32>
    %12 = vector.broadcast %11 : vector<1x1024xf32> to vector<16x1024xf32>
    %13 = arith.addf %10, %12 : vector<16x1024xf32>
    %14 = vector.extract_strided_slice %13 {offsets = [0, 0], sizes = [16, 448], strides = [1, 1]} : vector<16x1024xf32> to vector<16x448xf32>
    %15 = vector.extract_strided_slice %13 {offsets = [0, 512], sizes = [16, 448], strides = [1, 1]} : vector<16x1024xf32> to vector<16x448xf32>
    %16 = math.tanh %14 : vector<16x448xf32>
    %17 = arith.negf %15 : vector<16x448xf32>
    %18 = math.exp %17 : vector<16x448xf32>
    %cst_10 = arith.constant 1.000000e+00 : f32
    %19 = vector.broadcast %cst_10 : f32 to vector<16x448xf32>
    %20 = arith.addf %19, %18 : vector<16x448xf32>
    %21 = arith.divf %19, %20 : vector<16x448xf32>
    %22 = arith.mulf %16, %21 : vector<16x448xf32>
    %23 = arith.truncf %22 : vector<16x448xf32> to vector<16x448xbf16>
    %c0_11 = arith.constant 0 : index
    %c0_12 = arith.constant 0 : index
    %24 = vector.load %arg6[%c0_11, %c0_12] : memref<448x512xbf16, #tpu.memory_space<vmem>>, vector<448x512xbf16>
    %cst_13 = arith.constant dense<0.000000e+00> : vector<16x512xf32>
    %25 = tpu.matmul %23, %24, %cst_13 {dimension_numbers = #tpu.dot_dimension_numbers<[1], [0], [0], [1], [0, 0, 1, 1], [], []>} : vector<16x448xbf16>, vector<448x512xbf16>, vector<16x512xf32> -> vector<16x512xf32>
    %c0_14 = arith.constant 0 : index
    %c0_15 = arith.constant 0 : index
    %26 = vector.load %arg7[%c0_14, %c0_15] : memref<1x512xf32, #tpu.memory_space<vmem>>, vector<1x512xf32>
    %27 = vector.broadcast %26 : vector<1x512xf32> to vector<16x512xf32>
    %28 = arith.addf %25, %27 : vector<16x512xf32>
    %29 = vector.extract_strided_slice %28 {offsets = [0, 448], sizes = [16, 64], strides = [1, 1]} : vector<16x512xf32> to vector<16x64xf32>
    %30 = arith.addf %7, %29 : vector<16x64xf32>
    %31 = vector.extract_strided_slice %28 {offsets = [0, 0], sizes = [16, 448], strides = [1, 1]} : vector<16x512xf32> to vector<16x448xf32>
    %32 = vector.extract_strided_slice %6 {offsets = [0, 192], sizes = [16, 448], strides = [1, 1]} : vector<16x640xf32> to vector<16x448xf32>
    %33 = arith.addf %31, %32 : vector<16x448xf32>
    %34 = arith.truncf %33 : vector<16x448xf32> to vector<16x448xbf16>
    %c0_16 = arith.constant 0 : index
    %c0_17 = arith.constant 0 : index
    %35 = vector.load %arg8[%c0_16, %c0_17] : memref<448x512xbf16, #tpu.memory_space<vmem>>, vector<448x512xbf16>
    %cst_18 = arith.constant dense<0.000000e+00> : vector<16x512xf32>
    %36 = tpu.matmul %34, %35, %cst_18 {dimension_numbers = #tpu.dot_dimension_numbers<[1], [0], [0], [1], [0, 0, 1, 1], [], []>} : vector<16x448xbf16>, vector<448x512xbf16>, vector<16x512xf32> -> vector<16x512xf32>
    %c0_19 = arith.constant 0 : index
    %c0_20 = arith.constant 0 : index
    %37 = vector.load %arg9[%c0_19, %c0_20] : memref<1x512xf32, #tpu.memory_space<vmem>>, vector<1x512xf32>
    %38 = vector.broadcast %37 : vector<1x512xf32> to vector<16x512xf32>
    %39 = arith.addf %36, %38 : vector<16x512xf32>
    %40 = vector.extract_strided_slice %39 {offsets = [0, 0], sizes = [16, 256], strides = [1, 1]} : vector<16x512xf32> to vector<16x256xf32>
    %41 = vector.extract_strided_slice %39 {offsets = [0, 256], sizes = [16, 256], strides = [1, 1]} : vector<16x512xf32> to vector<16x256xf32>
    %42 = math.tanh %40 : vector<16x256xf32>
    %43 = arith.negf %41 : vector<16x256xf32>
    %44 = math.exp %43 : vector<16x256xf32>
    %cst_21 = arith.constant 1.000000e+00 : f32
    %45 = vector.broadcast %cst_21 : f32 to vector<16x256xf32>
    %46 = arith.addf %45, %44 : vector<16x256xf32>
    %47 = arith.divf %45, %46 : vector<16x256xf32>
    %48 = arith.mulf %42, %47 : vector<16x256xf32>
    %49 = arith.truncf %48 : vector<16x256xf32> to vector<16x256xbf16>
    %c0_22 = arith.constant 0 : index
    %c0_23 = arith.constant 0 : index
    %50 = vector.load %arg10[%c0_22, %c0_23] : memref<256x320xbf16, #tpu.memory_space<vmem>>, vector<256x320xbf16>
    %cst_24 = arith.constant dense<0.000000e+00> : vector<16x320xf32>
    %51 = tpu.matmul %49, %50, %cst_24 {dimension_numbers = #tpu.dot_dimension_numbers<[1], [0], [0], [1], [0, 0, 1, 1], [], []>} : vector<16x256xbf16>, vector<256x320xbf16>, vector<16x320xf32> -> vector<16x320xf32>
    %c0_25 = arith.constant 0 : index
    %c0_26 = arith.constant 0 : index
    %52 = vector.load %arg11[%c0_25, %c0_26] : memref<1x320xf32, #tpu.memory_space<vmem>>, vector<1x320xf32>
    %53 = vector.broadcast %52 : vector<1x320xf32> to vector<16x320xf32>
    %54 = arith.addf %51, %53 : vector<16x320xf32>
    %55 = vector.extract_strided_slice %54 {offsets = [0, 256], sizes = [16, 64], strides = [1, 1]} : vector<16x320xf32> to vector<16x64xf32>
    %56 = arith.addf %30, %55 : vector<16x64xf32>
    %57 = vector.extract_strided_slice %54 {offsets = [0, 0], sizes = [16, 256], strides = [1, 1]} : vector<16x320xf32> to vector<16x256xf32>
    %58 = vector.extract_strided_slice %33 {offsets = [0, 192], sizes = [16, 256], strides = [1, 1]} : vector<16x448xf32> to vector<16x256xf32>
    %59 = arith.addf %57, %58 : vector<16x256xf32>
    %60 = arith.truncf %59 : vector<16x256xf32> to vector<16x256xbf16>
    %c0_27 = arith.constant 0 : index
    %c0_28 = arith.constant 0 : index
    %61 = vector.load %arg12[%c0_27, %c0_28] : memref<256x256xbf16, #tpu.memory_space<vmem>>, vector<256x256xbf16>
    %cst_29 = arith.constant dense<0.000000e+00> : vector<16x256xf32>
    %62 = tpu.matmul %60, %61, %cst_29 {dimension_numbers = #tpu.dot_dimension_numbers<[1], [0], [0], [1], [0, 0, 1, 1], [], []>} : vector<16x256xbf16>, vector<256x256xbf16>, vector<16x256xf32> -> vector<16x256xf32>
    %c0_30 = arith.constant 0 : index
    %c0_31 = arith.constant 0 : index
    %63 = vector.load %arg13[%c0_30, %c0_31] : memref<1x256xf32, #tpu.memory_space<vmem>>, vector<1x256xf32>
    %64 = vector.broadcast %63 : vector<1x256xf32> to vector<16x256xf32>
    %65 = arith.addf %62, %64 : vector<16x256xf32>
    %66 = vector.extract_strided_slice %65 {offsets = [0, 0], sizes = [16, 64], strides = [1, 1]} : vector<16x256xf32> to vector<16x64xf32>
    %67 = vector.extract_strided_slice %65 {offsets = [0, 128], sizes = [16, 64], strides = [1, 1]} : vector<16x256xf32> to vector<16x64xf32>
    %68 = math.tanh %66 : vector<16x64xf32>
    %69 = arith.negf %67 : vector<16x64xf32>
    %70 = math.exp %69 : vector<16x64xf32>
    %cst_32 = arith.constant 1.000000e+00 : f32
    %71 = vector.broadcast %cst_32 : f32 to vector<16x64xf32>
    %72 = arith.addf %71, %70 : vector<16x64xf32>
    %73 = arith.divf %71, %72 : vector<16x64xf32>
    %74 = arith.mulf %68, %73 : vector<16x64xf32>
    %75 = arith.truncf %74 : vector<16x64xf32> to vector<16x64xbf16>
    %c0_33 = arith.constant 0 : index
    %c0_34 = arith.constant 0 : index
    %76 = vector.load %arg14[%c0_33, %c0_34] : memref<64x128xbf16, #tpu.memory_space<vmem>>, vector<64x128xbf16>
    %cst_35 = arith.constant dense<0.000000e+00> : vector<16x128xf32>
    %77 = tpu.matmul %75, %76, %cst_35 {dimension_numbers = #tpu.dot_dimension_numbers<[1], [0], [0], [1], [0, 0, 1, 1], [], []>} : vector<16x64xbf16>, vector<64x128xbf16>, vector<16x128xf32> -> vector<16x128xf32>
    %c0_36 = arith.constant 0 : index
    %c0_37 = arith.constant 0 : index
    %78 = vector.load %arg15[%c0_36, %c0_37] : memref<1x128xf32, #tpu.memory_space<vmem>>, vector<1x128xf32>
    %79 = vector.broadcast %78 : vector<1x128xf32> to vector<16x128xf32>
    %80 = arith.addf %77, %79 : vector<16x128xf32>
    %81 = vector.extract_strided_slice %80 {offsets = [0, 64], sizes = [16, 64], strides = [1, 1]} : vector<16x128xf32> to vector<16x64xf32>
    %82 = arith.addf %56, %81 : vector<16x64xf32>
    %83 = vector.extract_strided_slice %80 {offsets = [0, 0], sizes = [16, 64], strides = [1, 1]} : vector<16x128xf32> to vector<16x64xf32>
    %84 = vector.extract_strided_slice %59 {offsets = [0, 192], sizes = [16, 64], strides = [1, 1]} : vector<16x256xf32> to vector<16x64xf32>
    %85 = arith.addf %83, %84 : vector<16x64xf32>
    %86 = arith.truncf %85 : vector<16x64xf32> to vector<16x64xbf16>
    %c0_38 = arith.constant 0 : index
    %c0_39 = arith.constant 0 : index
    %87 = vector.load %arg16[%c0_38, %c0_39] : memref<64x128xbf16, #tpu.memory_space<vmem>>, vector<64x128xbf16>
    %cst_40 = arith.constant dense<0.000000e+00> : vector<16x128xf32>
    %88 = tpu.matmul %86, %87, %cst_40 {dimension_numbers = #tpu.dot_dimension_numbers<[1], [0], [0], [1], [0, 0, 1, 1], [], []>} : vector<16x64xbf16>, vector<64x128xbf16>, vector<16x128xf32> -> vector<16x128xf32>
    %c0_41 = arith.constant 0 : index
    %c0_42 = arith.constant 0 : index
    %89 = vector.load %arg17[%c0_41, %c0_42] : memref<1x128xf32, #tpu.memory_space<vmem>>, vector<1x128xf32>
    %90 = vector.broadcast %89 : vector<1x128xf32> to vector<16x128xf32>
    %91 = arith.addf %88, %90 : vector<16x128xf32>
    %92 = tpu.concatenate %82, %82 in 1 : vector<16x64xf32>, vector<16x64xf32> -> vector<16x128xf32>
    %93 = arith.addf %91, %92 : vector<16x128xf32>
    %cst_43 = arith.constant 0.000000e+00 : f32
    %94 = vector.broadcast %cst_43 : f32 to vector<16x128xf32>
    %95 = arith.maximumf %93, %94 : vector<16x128xf32>
    %c0_44 = arith.constant 0 : index
    %c0_45 = arith.constant 0 : index
    %96 = vector.load %arg18[%c0_44, %c0_45] : memref<16x128xf32, #tpu.memory_space<vmem>>, vector<16x128xf32>
    tpu.vector_store %arg18[%c0_44, %c0_45], %95 {strides = array<i32>} : memref<16x128xf32, #tpu.memory_space<vmem>>, vector<16x128xf32>,
    return
  }
  func.func @transform_0(%arg0: i32) -> (i32, i32) {
    %c0_i32 = arith.constant 0 : i32
    %c0_i32_0 = arith.constant 0 : i32
    return %arg0, %c0_i32 : i32, i32
  }
  func.func @transform_1(%arg0: i32) -> (i32, i32) {
    %c0_i32 = arith.constant 0 : i32
    %c0_i32_0 = arith.constant 0 : i32
    %c0_i32_1 = arith.constant 0 : i32
    return %c0_i32, %c0_i32_0 : i32, i32
  }
  func.func @transform_2(%arg0: i32) -> (i32, i32) {
    %c0_i32 = arith.constant 0 : i32
    %c0_i32_0 = arith.constant 0 : i32
    %c0_i32_1 = arith.constant 0 : i32
    return %c0_i32, %c0_i32_0 : i32, i32
  }
  func.func @transform_3(%arg0: i32) -> (i32, i32) {
    %c0_i32 = arith.constant 0 : i32
    %c0_i32_0 = arith.constant 0 : i32
    %c0_i32_1 = arith.constant 0 : i32
    return %c0_i32, %c0_i32_0 : i32, i32
  }
  func.func @transform_4(%arg0: i32) -> (i32, i32) {
    %c0_i32 = arith.constant 0 : i32
    %c0_i32_0 = arith.constant 0 : i32
    %c0_i32_1 = arith.constant 0 : i32
    return %c0_i32, %c0_i32_0 : i32, i32
  }
  func.func @transform_5(%arg0: i32) -> (i32, i32) {
    %c0_i32 = arith.constant 0 : i32
    %c0_i32_0 = arith.constant 0 : i32
    %c0_i32_1 = arith.constant 0 : i32
    return %c0_i32, %c0_i32_0 : i32, i32
  }
  func.func @transform_6(%arg0: i32) -> (i32, i32) {
    %c0_i32 = arith.constant 0 : i32
    %c0_i32_0 = arith.constant 0 : i32
    %c0_i32_1 = arith.constant 0 : i32
    return %c0_i32, %c0_i32_0 : i32, i32
  }
  func.func @transform_7(%arg0: i32) -> (i32, i32) {
    %c0_i32 = arith.constant 0 : i32
    %c0_i32_0 = arith.constant 0 : i32
    %c0_i32_1 = arith.constant 0 : i32
    return %c0_i32, %c0_i32_0 : i32, i32
  }
  func.func @transform_8(%arg0: i32) -> (i32, i32) {
    %c0_i32 = arith.constant 0 : i32
    %c0_i32_0 = arith.constant 0 : i32
    %c0_i32_1 = arith.constant 0 : i32
    return %c0_i32, %c0_i32_0 : i32, i32
  }
  func.func @transform_9(%arg0: i32) -> (i32, i32) {
    %c0_i32 = arith.constant 0 : i32
    %c0_i32_0 = arith.constant 0 : i32
    %c0_i32_1 = arith.constant 0 : i32
    return %c0_i32, %c0_i32_0 : i32, i32
  }
  func.func @transform_10(%arg0: i32) -> (i32, i32) {
    %c0_i32 = arith.constant 0 : i32
    %c0_i32_0 = arith.constant 0 : i32
    %c0_i32_1 = arith.constant 0 : i32
    return %c0_i32, %c0_i32_0 : i32, i32
  }
  func.func @transform_11(%arg0: i32) -> (i32, i32) {
    %c0_i32 = arith.constant 0 : i32
    %c0_i32_0 = arith.constant 0 : i32
    %c0_i32_1 = arith.constant 0 : i32
    return %c0_i32, %c0_i32_0 : i32, i32
  }
  func.func @transform_12(%arg0: i32) -> (i32, i32) {
    %c0_i32 = arith.constant 0 : i32
    %c0_i32_0 = arith.constant 0 : i32
    %c0_i32_1 = arith.constant 0 : i32
    return %c0_i32, %c0_i32_0 : i32, i32
  }
  func.func @transform_13(%arg0: i32) -> (i32, i32) {
    %c0_i32 = arith.constant 0 : i32
    %c0_i32_0 = arith.constant 0 : i32
    %c0_i32_1 = arith.constant 0 : i32
    return %c0_i32, %c0_i32_0 : i32, i32
  }
  func.func @transform_14(%arg0: i32) -> (i32, i32) {
    %c0_i32 = arith.constant 0 : i32
    %c0_i32_0 = arith.constant 0 : i32
    %c0_i32_1 = arith.constant 0 : i32
    return %c0_i32, %c0_i32_0 : i32, i32
  }
  func.func @transform_15(%arg0: i32) -> (i32, i32) {
    %c0_i32 = arith.constant 0 : i32
    %c0_i32_0 = arith.constant 0 : i32
    %c0_i32_1 = arith.constant 0 : i32
    return %c0_i32, %c0_i32_0 : i32, i32
  }
  func.func @transform_16(%arg0: i32) -> (i32, i32) {
    %c0_i32 = arith.constant 0 : i32
    %c0_i32_0 = arith.constant 0 : i32
    %c0_i32_1 = arith.constant 0 : i32
    return %c0_i32, %c0_i32_0 : i32, i32
  }
  func.func @transform_17(%arg0: i32) -> (i32, i32) {
    %c0_i32 = arith.constant 0 : i32
    %c0_i32_0 = arith.constant 0 : i32
    return %arg0, %c0_i32 : i32, i32
  }
}

</mosaic_0001>

<bundles_post_ra>
// kernel: my_encoder_forward.1
= control target key start
LH: loop header
LB: loop body
LE: loop exit
PB: predicated region body
PF: predicated region fallthrough
CT: control target
= control target key end

     0   :  { %s9249_s0 = inlined_call_operand.vmem [shape: bf16[32,40], index: 0, kind: input, shape index: {}]   ;;  %s9250_s1 = inlined_call_operand.hbm [shape: bf16[40,704], index: 1, kind: input, shape index: {}]   ;;  %s9251_s2 = inlined_call_operand.hbm [shape: f32[1,704], index: 2, kind: input, shape index: {}]   ;;  %s9252_s3 = inlined_call_operand.hbm [shape: bf16[640,1024], index: 3, kind: input, shape index: {}]   ;;  %s9253_s4 = inlined_call_operand.hbm [shape: f32[1,1024], index: 4, kind: input, shape index: {}]   ;;  %s9254_s5 = inlined_call_operand.hbm [shape: bf16[448,512], index: 5, kind: input, shape index: {}]   ;;  %s9255_s6 = inlined_call_operand.hbm [shape: f32[1,512], index: 6, kind: input, shape index: {}]   ;;  %s9256_s7 = inlined_call_operand.hbm [shape: bf16[448,512], index: 7, kind: input, shape index: {}]   ;;  %s9257_s8 = inlined_call_operand.hbm [shape: f32[1,512], index: 8, kind: input, shape index: {}]   ;;  %s9258_s9 = inlined_call_operand.vmem [shape: bf16[256,320], index: 9, kind: input, shape index: {}]   ;;  %s9259_s10 = inlined_call_operand.hbm [shape: f32[1,320], index: 10, kind: input, shape index: {}]   ;;  %s9260_s11 = inlined_call_operand.hbm [shape: bf16[256,256], index: 11, kind: input, shape index: {}]   ;;  %s9261_s12 = inlined_call_operand.hbm [shape: f32[1,256], index: 12, kind: input, shape index: {}]   ;;  %s9262_s13 = inlined_call_operand.hbm [shape: bf16[64,128], index: 13, kind: input, shape index: {}]   ;;  %s9263_s14 = inlined_call_operand.hbm [shape: f32[1,128], index: 14, kind: input, shape index: {}]   ;;  %s9264_s15 = inlined_call_operand.hbm [shape: bf16[64,128], index: 15, kind: input, shape index: {}]   ;;  %s9265_s16 = inlined_call_operand.hbm [shape: f32[1,128], index: 16, kind: input, shape index: {}]   ;;  %s9266_s17 = inlined_call_operand.vmem [shape: f32[32,128], index: 17, kind: output, shape index: {}]  }
   0x1   :  { %9271 = sst [smem:[#allocation33_spill]] %s9249_s0 }
   0x2   :  { %9272 = sst [smem:[#allocation34_spill]] %s9250_s1 }
   0x3   :  { %9273 = sst [smem:[#allocation35_spill]] %s9251_s2 }
   0x4   :  { %22 = vsyncpa [#allocation3], 0 }
   0x5   :  { %23 = vsyncpa [#allocation5], 0 }
   0x6   :  { %24 = vsyncpa [#allocation8], 0 }
   0x7   :  { %25 = vsyncpa [#allocation11], 0 }
   0x8   :  { %26 = vsyncpa [#allocation14], 0 }
   0x9   :  { %27 = vsyncpa [#allocation17], 0 }
   0xa   :  { %28 = vsyncpa [#allocation20], 0 }
   0xb   :  { %29 = vsyncpa [#allocation23], 0  ;;  %s8607_s24 = smov 0  }
   0xc LB: > { %s8488_s25 = smov [#allocation4]   ;;  %s9270_s27 = sadd.s32 4294967295, %s8486_s24   ;;  %s8486_s24 = sphi %s8607_s24, %s35_s24  }
   0xd   : > { %s454_s26 = sshll.u32 %s8488_s25, 4  ;;  %p6545_p0 = scmp.ge.s32.totalorder %s8486_s24, 1  ;;  %s455_s26 = int_to_ptr.vmem [resolvable:$true] %s454_s26 }
   0xe   : > { %p428_p1 = scmp.lt.s32.totalorder %s8486_s24, 3  ;;  %p8617_p2 = scmp.eq.s32.totalorder %s9270_s27, 0 }
   0xf   : > { %s8489_s0 = smov [#allocation7]   ;;  %s8490_s18 = smov [#allocation10]  }
  0x10   : > { %s9274_s28 = scalar_select %p8617_p2, 1, 0 }
  0x11   : > { %p8621_p3 = pnand %p6545_p0, %p428_p1  ;;  %s478_s30 = sshll.u32 %s8489_s0, 4  ;;  %s479_s30 = int_to_ptr.vmem [resolvable:$true] %s478_s30 }
  0x12   : > { %s502_s19 = sshll.u32 %s8490_s18, 4  ;;  %s8491_s20 = smov [#allocation13]   ;;  %s8633_s19 = int_to_ptr.vmem [resolvable:$true] %s502_s19 }
  0x13   : > { %s9275_s29 = scalar_select %p8621_p3, 1, 0 }
  0x14   : > { %p7379_p4 = pneg %p8621_p3  ;;  %s526_s21 = sshll.u32 %s8491_s20, 4  ;;  %s8635_s21 = int_to_ptr.vmem [resolvable:$true] %s526_s21 }
  0x15   : > { %s8069_s23 = scalar_lea.vmem %s455_s26, 96  ;;  %p8077_p10 = scmp.lt.s32.totalorder %s455_s26, %s455_s26 }
  0x16   : > { %p8629_p5 = pnand %p8617_p2, %p7379_p4  ;;  %p8070_p7 = scmp.ne.s32.totalorder %s455_s26, %s8069_s23 }
  0x17   : > { %p8078_p11 = scmp.lt.s32.totalorder %s8069_s23, %s8069_s23 }
  0x18   : > { %p8639_p6 = pneg %p8629_p5 }
  0x19   : > { %p8079_p12 = por %p8078_p11, %p8077_p10 }
  0x1a   : > { %p8072_p8 = pnand %p8070_p7, %p8639_p6 }
  0x1c   : > { %p8073_p9 = pneg %p8072_p8 }
  0x1e   : > { %p8080_p13 = pnand %p8079_p12, %p8073_p9 }
  0x20   : > { %8083 = shalt.err (!%p8080_p13)
}
  0x21   : > { %s9278_s2 = sld [smem:[#allocation35_spill]]  ;;  %s8095_s18 = scalar_lea.vmem %s479_s30, 128 }
  0x22   : > { %p8096_p0 = scmp.ne.s32.totalorder %s479_s30, %s8095_s18  ;;  %p8103_p2 = scmp.lt.s32.totalorder %s479_s30, %s479_s30 }
  0x23   : > { %p8104_p7 = scmp.lt.s32.totalorder %s8095_s18, %s8095_s18 }
  0x24   : > { %p8098_p1 = pnand %p8096_p0, %p8639_p6 }
  0x25   : > { %p8105_p8 = por %p8104_p7, %p8103_p2 }
  0x26   : > { %p8099_p4 = pneg %p8098_p1 }
  0x27   : > { %7385 = dma.hbm_to_vmem [thread:$0]  (!%p8629_p5), %s9278_s2, 96, %s455_s26, [#allocation5]  }
  0x28   : > { %p8106_p3 = pnand %p8105_p8, %p8099_p4 }
  0x2a   : > { %8109 = shalt.err (!%p8106_p3)
}
  0x2b   : > { %7391 = dma.hbm_to_vmem [thread:$0]  (!%p8629_p5), %s9253_s4, 128, %s479_s30, [#allocation8]  }
  0x2c   : > { %s8121_s26 = scalar_lea.vmem %s8633_s19, 64  ;;  %p8129_p12 = scmp.lt.s32.totalorder %s8633_s19, %s8633_s19 }
  0x2d   : > { %p8122_p9 = scmp.ne.s32.totalorder %s8633_s19, %s8121_s26  ;;  %p8130_p2 = scmp.lt.s32.totalorder %s8121_s26, %s8121_s26 }
  0x2f   : > { %p8124_p10 = pnand %p8122_p9, %p8639_p6  ;;  %p8131_p13 = por %p8130_p2, %p8129_p12 }
  0x31   : > { %p8125_p11 = pneg %p8124_p10 }
  0x33   : > { %p8132_p3 = pnand %p8131_p13, %p8125_p11 }
  0x35   : > { %8135 = shalt.err (!%p8132_p3)
}
  0x36   : > { %7397 = dma.hbm_to_vmem [thread:$0]  (!%p8629_p5), %s9255_s6, 64, %s8633_s19, [#allocation11]  }
  0x37   : > { %s8147_s30 = scalar_lea.vmem %s8635_s21, 64  ;;  %p8155_p7 = scmp.lt.s32.totalorder %s8635_s21, %s8635_s21 }
  0x38   : > { %p8148_p0 = scmp.ne.s32.totalorder %s8635_s21, %s8147_s30  ;;  %p8156_p8 = scmp.lt.s32.totalorder %s8147_s30, %s8147_s30 }
  0x3a   : > { %p8150_p1 = pnand %p8148_p0, %p8639_p6  ;;  %p8157_p9 = por %p8156_p8, %p8155_p7 }
  0x3c   : > { %p8151_p4 = pneg %p8150_p1 }
  0x3e   : > { %p8158_p10 = pnand %p8157_p9, %p8151_p4 }
  0x40   : > { %8161 = shalt.err (!%p8158_p10)
}
  0x41   : > { %7403 = dma.hbm_to_vmem [thread:$0]  (!%p8629_p5), %s9257_s8, 64, %s8635_s21, [#allocation14]  }
  0x42   : > { %s8492_s19 = smov [#allocation16]  }
  0x43   : > { %s550_s23 = sshll.u32 %s8492_s19, 4  ;;  %s551_s23 = int_to_ptr.vmem [resolvable:$true] %s550_s23 }
  0x44   : > { %s8173_s26 = scalar_lea.vmem %s551_s23, 4096  ;;  %p8181_p13 = scmp.lt.s32.totalorder %s551_s23, %s551_s23 }
  0x45   : > { %p8174_p11 = scmp.ne.s32.totalorder %s551_s23, %s8173_s26  ;;  %p8182_p3 = scmp.lt.s32.totalorder %s8173_s26, %s8173_s26 }
  0x47   : > { %p8176_p12 = pnand %p8174_p11, %p8639_p6  ;;  %p8183_p0 = por %p8182_p3, %p8181_p13 }
  0x49   : > { %p8177_p2 = pneg %p8176_p12 }
  0x4b   : > { %p8184_p1 = pnand %p8183_p0, %p8177_p2 }
  0x4d   : > { %8187 = shalt.err (!%p8184_p1)
}
  0x4e   : > { %s8493_s25 = smov 128   ;;  %s8494_s0 = smov 8  }
  0x4f   : > { %7409 = dma.hbm_to_vmem [thread:$0]  (!%p8629_p5), %s9260_s11, 4096, %s551_s23, [#allocation17], %s8493_s25, %s8493_s25, %s8494_s0  }
  0x50   : > { %s8495_s18 = smov [#allocation19]  }
  0x51   : > { %s574_s20 = sshll.u32 %s8495_s18, 4  ;;  %s575_s20 = int_to_ptr.vmem [resolvable:$true] %s574_s20 }
  0x52   : > { %s8199_s19 = scalar_lea.vmem %s575_s20, 512  ;;  %p8207_p9 = scmp.lt.s32.totalorder %s575_s20, %s575_s20 }
  0x53   : > { %p8200_p4 = scmp.ne.s32.totalorder %s575_s20, %s8199_s19  ;;  %p8208_p10 = scmp.lt.s32.totalorder %s8199_s19, %s8199_s19 }
  0x55   : > { %p8202_p7 = pnand %p8200_p4, %p8639_p6  ;;  %p8209_p11 = por %p8208_p10, %p8207_p9 }
  0x57   : > { %p8203_p8 = pneg %p8202_p7 }
  0x59   : > { %p8210_p12 = pnand %p8209_p11, %p8203_p8 }
  0x5b   : > { %8213 = shalt.err (!%p8210_p12)
}
  0x5c   : > { %s8496_s26 = smov 64   ;;  %s8497_s27 = smov 4  }
  0x5d   : > { %7415 = dma.hbm_to_vmem [thread:$0]  (!%p8629_p5), %s9262_s13, 512, %s575_s20, [#allocation20], %s8496_s26, %s8496_s26, %s8497_s27  }
  0x5e   : > { %s8498_s25 = smov [#allocation22]   ;;  %s8499_s21 = smov [#allocation2]  }
  0x5f   : > { %s598_s0 = sshll.u32 %s8498_s25, 4  ;;  %s440_s18 = sshll.u32 %s8499_s21, 4  ;;  %s599_s0 = int_to_ptr.vmem [resolvable:$true] %s598_s0  ;;  %s441_s18 = int_to_ptr.vmem [resolvable:$true] %s440_s18 }
  0x60   : > { %s8225_s2 = scalar_lea.vmem %s599_s0, 512  ;;  %p8233_p0 = scmp.lt.s32.totalorder %s599_s0, %s599_s0 }
  0x61   : > { %p8226_p2 = scmp.ne.s32.totalorder %s599_s0, %s8225_s2  ;;  %p8234_p1 = scmp.lt.s32.totalorder %s8225_s2, %s8225_s2 }
  0x63   : > { %p8228_p13 = pnand %p8226_p2, %p8639_p6  ;;  %p8235_p4 = por %p8234_p1, %p8233_p0 }
  0x65   : > { %p8229_p3 = pneg %p8228_p13 }
  0x67   : > { %p8236_p7 = pnand %p8235_p4, %p8229_p3 }
  0x69   : > { %8239 = shalt.err (!%p8236_p7)
}
  0x6a   : > { %7421 = dma.hbm_to_vmem [thread:$0]  (!%p8629_p5), %s9264_s15, 512, %s599_s0, [#allocation23], %s8496_s26, %s8496_s26, %s8497_s27  }
  0x6b   : > { %s8251_s20 = scalar_lea.vmem %s441_s18, 1920  ;;  %p8259_p11 = scmp.lt.s32.totalorder %s441_s18, %s441_s18 }
  0x6c   : > { %p8252_p8 = scmp.ne.s32.totalorder %s441_s18, %s8251_s20  ;;  %p8260_p12 = scmp.lt.s32.totalorder %s8251_s20, %s8251_s20 }
  0x6e   : > { %p8254_p9 = pnand %p8252_p8, %p8639_p6  ;;  %p8261_p2 = por %p8260_p12, %p8259_p11 }
  0x70   : > { %p8255_p10 = pneg %p8254_p9 }
  0x72   : > { %p8262_p13 = pnand %p8261_p2, %p8255_p10 }
  0x74   : > { %8265 = shalt.err (!%p8262_p13)
}
  0x75   : > { %s8500_s2 = smov 384   ;;  %s8501_s23 = smov 24  }
  0x76   : > { %s9279_s19 = sld [smem:[#allocation34_spill]]  ;;  %s8502_s27 = smov [#allocation6]  }
  0x77   : > { %s464_s26 = sshll.u32 %s8502_s27, 4  ;;  %s465_s26 = int_to_ptr.vmem [resolvable:$true] %s464_s26 }
  0x78   : > { %s8277_s0 = scalar_lea.vmem %s465_s26, 40960  ;;  %p8285_p4 = scmp.lt.s32.totalorder %s465_s26, %s465_s26 }
  0x79   : > { %p8278_p3 = scmp.ne.s32.totalorder %s465_s26, %s8277_s0  ;;  %p8286_p7 = scmp.lt.s32.totalorder %s8277_s0, %s8277_s0 }
  0x7b   : > { %p8280_p0 = pnand %p8278_p3, %p8639_p6  ;;  %p8287_p8 = por %p8286_p7, %p8285_p4 }
  0x7c   : > { %7382 = dma.hbm_to_vmem [thread:$0]  (!%p8629_p5), %s9279_s19, 1920, %s441_s18, [#allocation3], %s8500_s2, %s8500_s2, %s8501_s23  }
  0x7d   : > { %p8281_p1 = pneg %p8280_p0 }
  0x7f   : > { %p8288_p9 = pnand %p8287_p8, %p8281_p1 }
  0x81   : > { %8291 = shalt.err (!%p8288_p9)
}
  0x82   : > { %s8503_s30 = smov 512   ;;  %s8504_s20 = smov 32  }
  0x83   : > { %7388 = dma.hbm_to_vmem [thread:$0]  (!%p8629_p5), %s9252_s3, 40960, %s465_s26, [#allocation5], %s8503_s30, %s8503_s30, %s8504_s20  }
  0x84   : > { %s8505_s2 = smov [#allocation9]  }
  0x85   : > { %s488_s23 = sshll.u32 %s8505_s2, 4  ;;  %s489_s23 = int_to_ptr.vmem [resolvable:$true] %s488_s23 }
  0x86   : > { %s8303_s21 = scalar_lea.vmem %s489_s23, 14336  ;;  %p8311_p2 = scmp.lt.s32.totalorder %s489_s23, %s489_s23 }
  0x87   : > { %p8304_p10 = scmp.ne.s32.totalorder %s489_s23, %s8303_s21  ;;  %p8312_p13 = scmp.lt.s32.totalorder %s8303_s21, %s8303_s21 }
  0x89   : > { %p8306_p11 = pnand %p8304_p10, %p8639_p6  ;;  %p8313_p3 = por %p8312_p13, %p8311_p2 }
  0x8b   : > { %p8307_p12 = pneg %p8306_p11 }
  0x8d   : > { %p8314_p0 = pnand %p8313_p3, %p8307_p12 }
  0x8f   : > { %8317 = shalt.err (!%p8314_p0)
}
  0x90   : > { %s8506_s19 = smov 256   ;;  %s8507_s27 = smov 16  }
  0x91   : > { %7394 = dma.hbm_to_vmem [thread:$0]  (!%p8629_p5), %s9254_s5, 14336, %s489_s23, [#allocation8], %s8506_s19, %s8506_s19, %s8507_s27  }
  0x92   : > { %s8508_s30 = smov [#allocation12]   ;;  %s8509_s25 = smov [#allocation15]  }
  0x93   : > { %s512_s20 = sshll.u32 %s8508_s30, 4  ;;  %s540_s18 = sshll.u32 %s8509_s25, 4  ;;  %s513_s20 = int_to_ptr.vmem [resolvable:$true] %s512_s20  ;;  %s541_s18 = int_to_ptr.vmem [resolvable:$true] %s540_s18 }
  0x94   : > { %s8329_s2 = scalar_lea.vmem %s513_s20, 14336  ;;  %p8337_p8 = scmp.lt.s32.totalorder %s513_s20, %s513_s20 }
  0x95   : > { %p8330_p1 = scmp.ne.s32.totalorder %s513_s20, %s8329_s2  ;;  %p8338_p9 = scmp.lt.s32.totalorder %s8329_s2, %s8329_s2 }
  0x97   : > { %p8332_p4 = pnand %p8330_p1, %p8639_p6  ;;  %p8339_p10 = por %p8338_p9, %p8337_p8 }
  0x99   : > { %p8333_p7 = pneg %p8332_p4 }
  0x9b   : > { %p8340_p11 = pnand %p8339_p10, %p8333_p7 }
  0x9d   : > { %8343 = shalt.err (!%p8340_p11)
}
  0x9e   : > { %7400 = dma.hbm_to_vmem [thread:$0]  (!%p8629_p5), %s9256_s7, 14336, %s513_s20, [#allocation11], %s8506_s19, %s8506_s19, %s8507_s27  }
  0x9f   : > { %s8355_s23 = scalar_lea.vmem %s541_s18, 48  ;;  %s8362_s26 = scalar_lea.vmem %s541_s18, 64 }
  0xa0   : > { %p8356_p12 = scmp.ne.s32.totalorder %s541_s18, %s8355_s23  ;;  %p8363_p3 = scmp.lt.s32.totalorder %s541_s18, %s541_s18 }
  0xa1   : > { %p8364_p0 = scmp.lt.s32.totalorder %s8362_s26, %s8355_s23 }
  0xa2   : > { %p8358_p2 = pnand %p8356_p12, %p8639_p6 }
  0xa3   : > { %p8365_p1 = por %p8364_p0, %p8363_p3 }
  0xa4   : > { %p8359_p13 = pneg %p8358_p2 }
  0xa6   : > { %p8366_p4 = pnand %p8365_p1, %p8359_p13 }
  0xa8   : > { %8369 = shalt.err (!%p8366_p4)
}
  0xa9   : > { %7406 = dma.hbm_to_vmem [thread:$0]  (!%p8629_p5), %s9259_s10, 48, %s541_s18, [#allocation14]  }
  0xaa   : > { %s8510_s19 = smov [#allocation18]   ;;  %s8511_s20 = smov [#allocation21]  }
  0xab   : > { %s564_s27 = sshll.u32 %s8510_s19, 4  ;;  %s588_s2 = sshll.u32 %s8511_s20, 4  ;;  %s565_s27 = int_to_ptr.vmem [resolvable:$true] %s564_s27  ;;  %s589_s2 = int_to_ptr.vmem [resolvable:$true] %s588_s2 }
  0xac   : > { %s8381_s21 = scalar_lea.vmem %s565_s27, 32  ;;  %p8389_p10 = scmp.lt.s32.totalorder %s565_s27, %s565_s27 }
  0xad   : > { %p8382_p7 = scmp.ne.s32.totalorder %s565_s27, %s8381_s21  ;;  %p8390_p11 = scmp.lt.s32.totalorder %s8381_s21, %s8381_s21 }
  0xaf   : > { %p8384_p8 = pnand %p8382_p7, %p8639_p6  ;;  %p8391_p12 = por %p8390_p11, %p8389_p10 }
  0xb1   : > { %p8385_p9 = pneg %p8384_p8 }
  0xb3   : > { %p8392_p2 = pnand %p8391_p12, %p8385_p9 }
  0xb5   : > { %8395 = shalt.err (!%p8392_p2)
}
  0xb6   : > { %7412 = dma.hbm_to_vmem [thread:$0]  (!%p8629_p5), %s9261_s12, 32, %s565_s27, [#allocation17]  }
  0xb7   : > { %s8407_s18 = scalar_lea.vmem %s589_s2, 16  ;;  %s8414_s26 = scalar_lea.vmem %s589_s2, 32 }
  0xb8   : > { %p8408_p13 = scmp.ne.s32.totalorder %s589_s2, %s8407_s18  ;;  %p8415_p1 = scmp.lt.s32.totalorder %s589_s2, %s589_s2 }
  0xb9   : > { %p8416_p4 = scmp.lt.s32.totalorder %s8414_s26, %s8407_s18 }
  0xba   : > { %p8410_p3 = pnand %p8408_p13, %p8639_p6 }
  0xbb   : > { %p8417_p7 = por %p8416_p4, %p8415_p1 }
  0xbc   : > { %p8411_p0 = pneg %p8410_p3 }
  0xbe   : > { %p8418_p8 = pnand %p8417_p7, %p8411_p0 }
  0xc0   : > { %8421 = shalt.err (!%p8418_p8)
}
  0xc1   : > { %7418 = dma.hbm_to_vmem [thread:$0]  (!%p8629_p5), %s9263_s14, 16, %s589_s2, [#allocation20]  }
  0xc2   : > { %s8512_s19 = smov [#allocation24]  }
  0xc3   : > { %s612_s27 = sshll.u32 %s8512_s19, 4  ;;  %s613_s27 = int_to_ptr.vmem [resolvable:$true] %s612_s27 }
  0xc4   : > { %s8433_s20 = scalar_lea.vmem %s613_s27, 16  ;;  %s8440_s21 = scalar_lea.vmem %s613_s27, 32 }
  0xc5   : > { %p8434_p9 = scmp.ne.s32.totalorder %s613_s27, %s8433_s20  ;;  %p8441_p12 = scmp.lt.s32.totalorder %s613_s27, %s613_s27 }
  0xc6   : > { %p8442_p2 = scmp.lt.s32.totalorder %s8440_s21, %s8433_s20 }
  0xc7   : > { %p8436_p10 = pnand %p8434_p9, %p8639_p6 }
  0xc8   : > { %p8443_p13 = por %p8442_p2, %p8441_p12 }
  0xc9   : > { %p8437_p11 = pneg %p8436_p10 }
  0xcb   : > { %p8444_p3 = pnand %p8443_p13, %p8437_p11 }
  0xcd   : > { %8447 = shalt.err (!%p8444_p3)
}
  0xce   : > { %7424 = dma.hbm_to_vmem [thread:$0]  (!%p8629_p5), %s9265_s16, 16, %s613_s27, [#allocation23]  }
  0xcf   : > { %p9280_p0 = scmp.ne.s32.totalorder %s9275_s29, 0 }
  0xd0   : > { %p9281_p1 = scmp.ne.s32.totalorder (!%p9280_p0), %s9274_s28, 0 }
  0xd1   : > { %634 = sbr.rel (%p9280_p0) target bundleno = 2400 (0x960), region = 88 }
  0xd6   : > { %8453 = dma.done.wait (%p9281_p1), [#allocation3], 1920  }
  0xd7   : > { %8455 = vsyncadd (%p9281_p1), [#allocation3], 4294965376 }
  0xd8   : > { %8457 = dma.done.wait (%p9281_p1), [#allocation5], 41056  }
  0xd9   : > { %8459 = vsyncadd (%p9281_p1), [#allocation5], 4294926240 }
  0xda   : > { %8461 = dma.done.wait (%p9281_p1), [#allocation8], 14464  }
  0xdb   : > { %8463 = vsyncadd (%p9281_p1), [#allocation8], 4294952832 }
  0xdc   : > { %8465 = dma.done.wait (%p9281_p1), [#allocation11], 14400  }
  0xdd   : > { %8467 = vsyncadd (%p9281_p1), [#allocation11], 4294952896 }
  0xde   : > { %8469 = dma.done.wait (%p9281_p1), [#allocation14], 112  }
  0xdf   : > { %8471 = vsyncadd (%p9281_p1), [#allocation14], 4294967184 }
  0xe0   : > { %8473 = dma.done.wait (%p9281_p1), [#allocation17], 4128  }
  0xe1   : > { %8475 = vsyncadd (%p9281_p1), [#allocation17], 4294963168 }
  0xe2   : > { %8477 = dma.done.wait (%p9281_p1), [#allocation20], 528  }
  0xe3   : > { %8479 = vsyncadd (%p9281_p1), [#allocation20], 4294966768 }
  0xe4   : > { %8481 = dma.done.wait (%p9281_p1), [#allocation23], 528  }
  0xe5   : > { %8483 = vsyncadd (%p9281_p1), [#allocation23], 4294966768  ;;  %s9282_s29 = sadd.s32 4294967295, %s8486_s24   ;;  %v8513_v0 = vmov 0   ;;  %v769_v1 = vld [vmem:[#allocation2 + $0x60] sm:$0xff]  ;;  %vm888_vm0 = vcmask 1043456  }
  0xe6   : > { %s6578_s1 = sshll.u32 %s9282_s29, 1  ;;  %939 = vmatprep.mubr.bf16.mxu0 %v8513_v0  ;;  %982 = vmatprep.mubr.bf16.mxu1 %v8513_v0  ;;  %v770_v2 = vld [vmem:[#allocation2 + $0x68] sm:$0xff]  ;;  %v6596_v3 = vcombine.high %v769_v1, %v769_v1  ;;  %v6595_v5 = vcombine.low %v769_v1, %v769_v1  ;;  %v7498_v8 = vld [vmem:[#allocation2 + $0x3c] ss:$24 sps:$4 sm:$0xff]   ;;  %v7501_v12 = vld [vmem:[#allocation2 + $0x38] ss:$24 sps:$4 sm:$0xff]  }
  0xe7   : > { %p743_p5 = scmp.lt.s32.totalorder %s6578_s1, 3  ;;  %v6598_v4 = vcombine.high %v770_v2, %v770_v2  ;;  %v6597_v6 = vcombine.low %v770_v2, %v770_v2  ;;  %v7496_v7 = vld [vmem:[#allocation2 + $0x34] ss:$24 sps:$4 sm:$0xff]   ;;  %v7500_v11 = vld [vmem:[#allocation2 + $0x30] ss:$24 sps:$4 sm:$0xff]   ;;  %s9283_s18 = sld [smem:[#allocation33_spill]] }
  0xe8   : > { %6601 = vmatprep.subr.msk.bf16.mxu0 %vm888_vm0, %v6596_v3  ;;  %v890_v9 = vsel %vm888_vm0, %v6595_v5, 0  ;;  %v7502_v13 = vld [vmem:[#allocation2 + $0x4] ss:$24 sps:$4 sm:$0xff]   ;;  %v771_v15 = vld [vmem:[#allocation2 + $0x70] sm:$0xff]  ;;  %v7506_v16 = vld [vmem:[#allocation2] ss:$24 sps:$4 sm:$0xff]  }
  0xe9   : > { %s9285_s1 = smov (!%p743_p5, %s6578_s1), 3  ;;  %6603 = vmatprep.subr.msk.bf16.mxu1 %vm888_vm0, %v6598_v4  ;;  %v896_v10 = vsel %vm888_vm0, %v6597_v6, 0  ;;  %918 = vmatpush1.bf16.msra.mxu0 %v890_v9  ;;  %v7504_v14 = vld [vmem:[#allocation2 + $0xc] ss:$24 sps:$4 sm:$0xff]   ;;  %v7507_v17 = vld [vmem:[#allocation2 + $0x8] ss:$24 sps:$4 sm:$0xff]   ;;  %v6600_v18 = vcombine.high %v771_v15, %v771_v15  ;;  %v6599_v19 = vcombine.low %v771_v15, %v771_v15 }
  0xea   : > { %s6579_s28 = sshll.u32 %s9285_s1, 2  ;;  %961 = vmatpush1.bf16.msra.mxu1 %v896_v10  ;;  %919 = vmatprep.subr.bf16.mxu0 %v7496_v7  ;;  %v1097_v20 = vld [vmem:[#allocation6 + $0x1c0] sm:$0xff]  ;;  %vm884_vm1 = vcmask 326656   ;;  %v7516_v33 = vld [vmem:[#allocation2 + $0x14] ss:$24 sps:$4 sm:$0xff]   ;;  %s8514_s30 = smov 64  }
  0xeb   : > { %962 = vmatprep.subr.bf16.mxu1 %v7498_v8  ;;  %v1101_v21 = vld [vmem:[#allocation6 + $0x1e0] sm:$0xff]  ;;  %v902_v26 = vsel %vm888_vm0, %v6599_v19, 0  ;;  %v7514_v40 = vld [vmem:[#allocation2 + $0x10] ss:$24 sps:$4 sm:$0xff]   ;;  %vm4281_vm2 = vcmask 523264   ;;  %vm8516_vm3 = vmmov 0  }
  0xec   : > { %v6664_v23 = vcombine.high %v1097_v20, %v1101_v21  ;;  %v1089_v24 = vld [vmem:[#allocation6 + $0x180] sm:$0xff]  ;;  %v6663_v28 = vcombine.low %v1097_v20, %v1101_v21  ;;  %s6581_s0 = sshll.u32 %s9285_s1, 3 }
  0xed   : > { %s746_s26 = scalar_lea.vmem %s9283_s18, %s6579_s28  ;;  %920 = vmatpush1.bf16.msra.mxu0 %v7500_v11  ;;  %v1093_v25 = vld [vmem:[#allocation6 + $0x1a0] sm:$0xff]  ;;  %s752_s28 = scalar_lea.vmem %s9266_s17, %s6581_s0 }
  0xee   : > { %963 = vmatpush1.bf16.msra.mxu1 %v7501_v12  ;;  %921 = vmatprep.subr.bf16.mxu0 %v7502_v13  ;;  %v7508_v22 = vld [vmem:[%s746_s26] sm:$0xff]   ;;  %v6656_v29 = vcombine.high %v1089_v24, %v1093_v25  ;;  %v6655_v34 = vcombine.low %v1089_v24, %v1093_v25 }
  0xef   : > { %964 = vmatprep.subr.bf16.mxu1 %v7504_v14  ;;  %v7513_v27 = vld [vmem:[#allocation2 + $0x44] ss:$24 sps:$4 sm:$0xff]   ;;  %v7511_v32 = vld [vmem:[#allocation2 + $0x40] ss:$24 sps:$4 sm:$0xff]  }
  0xf0   : > { %v1081_v30 = vld [vmem:[#allocation6 + $0x140] sm:$0xff] }
  0xf1   : > { %922 = vmatpush1.bf16.msra.mxu0 %v7506_v16  ;;  %v1085_v31 = vld [vmem:[#allocation6 + $0x160] sm:$0xff] }
  0xf2   : > { %965 = vmatpush1.bf16.msra.mxu1 %v7507_v17  ;;  %6605 = vmatprep.subr.msk.bf16.mxu0 %vm888_vm0, %v6600_v18  ;;  %v1225_v35 = vld [vmem:[#allocation6 + $0x5c0] sm:$0xff]  ;;  %v6648_v37 = vcombine.high %v1081_v30, %v1085_v31  ;;  %v6647_v42 = vcombine.low %v1081_v30, %v1085_v31 }
  0xf3   : > { %3003 = vmatprep.subr.bf16.mxu1 %v6664_v23  ;;  %v1229_v36 = vld [vmem:[#allocation6 + $0x5e0] sm:$0xff] }
  0xf4   : > { %6602 = vmatmul.mubr.msk.bf16.vlgmr.msra.gmra.mxu0 %vm884_vm1, %v7508_v22  ;;  %v1073_v38 = vld [vmem:[#allocation6 + $0x100] sm:$0xff]  ;;  %v6792_v41 = vcombine.high %v1225_v35, %v1229_v36  ;;  %v6791_v48 = vcombine.low %v1225_v35, %v1229_v36 }
  0xf5   : > { %6604 = vmatmul.mubr.msk.bf16.vlgmr.msra.gmra.mxu1 %vm884_vm1, %v7508_v22  ;;  %1004 = vmatpush1.bf16.msra.mxu0 %v902_v26  ;;  %v1077_v39 = vld [vmem:[#allocation6 + $0x120] sm:$0xff] }
  0xf6   : > { %1025 = vmatprep.mubr.bf16.mxu0 %v8513_v0  ;;  %1005 = vmatprep.subr.bf16.mxu0 %v7513_v27  ;;  %v1217_v43 = vld [vmem:[#allocation6 + $0x580] sm:$0xff]  ;;  %v6640_v45 = vcombine.high %v1073_v38, %v1077_v39  ;;  %v6639_v50 = vcombine.low %v1073_v38, %v1077_v39 }
  0xf7   : > { %3004 = vmatpush1.bf16.msra.mxu1 %v6663_v28  ;;  %v1221_v44 = vld [vmem:[#allocation6 + $0x5a0] sm:$0xff] }
  0xf8   : > { %3005 = vmatprep.subr.bf16.mxu1 %v6656_v29  ;;  %v1065_v46 = vld [vmem:[#allocation6 + $0xc0] sm:$0xff]  ;;  %v6784_v49 = vcombine.high %v1217_v43, %v1221_v44  ;;  %v6783_v56 = vcombine.low %v1217_v43, %v1221_v44 }
  0xf9   : > { %1006 = vmatpush1.bf16.msra.mxu0 %v7511_v32  ;;  %v1069_v47 = vld [vmem:[#allocation6 + $0xe0] sm:$0xff] }
  0xfa   : > { %1007 = vmatprep.subr.bf16.mxu0 %v7516_v33  ;;  %v1209_v51 = vld [vmem:[#allocation6 + $0x540] sm:$0xff]  ;;  %v6632_v53 = vcombine.high %v1065_v46, %v1069_v47  ;;  %v6631_v60 = vcombine.low %v1065_v46, %v1069_v47 }
  0xfb   : > { %3006 = vmatpush1.bf16.msra.mxu1 %v6655_v34  ;;  %v1213_v52 = vld [vmem:[#allocation6 + $0x560] sm:$0xff] }
  0xfc   : > { %3007 = vmatprep.subr.bf16.mxu1 %v6648_v37  ;;  %v1057_v54 = vld [vmem:[#allocation6 + $0x80] sm:$0xff]  ;;  %v6776_v59 = vcombine.high %v1209_v51, %v1213_v52  ;;  %v6775_v1 = vcombine.low %v1209_v51, %v1213_v52 }
  0xfd   : > { %1008 = vmatpush1.bf16.msra.mxu0 %v7514_v40  ;;  %v1061_v55 = vld [vmem:[#allocation6 + $0xa0] sm:$0xff] }
  0xfe   : > { %3046 = vmatprep.subr.bf16.mxu0 %v6792_v41  ;;  %v1201_v57 = vld [vmem:[#allocation6 + $0x500] sm:$0xff]  ;;  %v6624_v63 = vcombine.high %v1057_v54, %v1061_v55  ;;  %v6623_v5 = vcombine.low %v1057_v54, %v1061_v55 }
  0xff   : > { %3008 = vmatpush1.bf16.msra.mxu1 %v6647_v42  ;;  %v1205_v58 = vld [vmem:[#allocation6 + $0x520] sm:$0xff] }
 0x100   : > { %3009 = vmatprep.subr.bf16.mxu1 %v6640_v45  ;;  %6606 = vmatmul.mubr.msk.bf16.vlgmr.msra.gmra.mxu0 %vm884_vm1, %v7508_v22  ;;  %v1049_v61 = vld [vmem:[#allocation6 + $0x40] sm:$0xff]  ;;  %v6768_v4 = vcombine.high %v1201_v57, %v1205_v58  ;;  %v6767_v9 = vcombine.low %v1201_v57, %v1205_v58 }
 0x101   : > { %3047 = vmatpush1.bf16.msra.mxu0 %v6791_v48  ;;  %v1053_v62 = vld [vmem:[#allocation6 + $0x60] sm:$0xff] }
 0x102   : > { %3048 = vmatprep.subr.bf16.mxu0 %v6784_v49  ;;  %v1193_v2 = vld [vmem:[#allocation6 + $0x4c0] sm:$0xff]  ;;  %v6616_v8 = vcombine.high %v1049_v61, %v1053_v62  ;;  %v6615_v13 = vcombine.low %v1049_v61, %v1053_v62 }
 0x103   : > { %3010 = vmatpush1.bf16.msra.mxu1 %v6639_v50  ;;  %v1197_v3 = vld [vmem:[#allocation6 + $0x4e0] sm:$0xff] }
 0x104   : > { %3011 = vmatprep.subr.bf16.mxu1 %v6632_v53  ;;  %v1041_v6 = vld [vmem:[#allocation6] sm:$0xff]  ;;  %v6760_v12 = vcombine.high %v1193_v2, %v1197_v3  ;;  %v6759_v17 = vcombine.low %v1193_v2, %v1197_v3 }
 0x105   : > { %3049 = vmatpush1.bf16.msra.mxu0 %v6783_v56  ;;  %v1045_v7 = vld [vmem:[#allocation6 + $0x20] sm:$0xff] }
 0x106   : > { %3050 = vmatprep.subr.bf16.mxu0 %v6776_v59  ;;  %v1185_v10 = vld [vmem:[#allocation6 + $0x480] sm:$0xff]  ;;  %v6608_v16 = vcombine.high %v1041_v6, %v1045_v7  ;;  %v6607_v21 = vcombine.low %v1041_v6, %v1045_v7 }
 0x107   : > { %3012 = vmatpush1.bf16.msra.mxu1 %v6631_v60  ;;  %v1189_v11 = vld [vmem:[#allocation6 + $0x4a0] sm:$0xff] }
 0x108   : > { %3013 = vmatprep.subr.bf16.mxu1 %v6624_v63  ;;  %v1161_v14 = vld [vmem:[#allocation6 + $0x3c0] sm:$0xff]  ;;  %v6752_v20 = vcombine.high %v1185_v10, %v1189_v11  ;;  %v6751_v25 = vcombine.low %v1185_v10, %v1189_v11 }
 0x109   : > { %3051 = vmatpush1.bf16.msra.mxu0 %v6775_v1  ;;  %v1165_v15 = vld [vmem:[#allocation6 + $0x3e0] sm:$0xff] }
 0x10a   : > { %3052 = vmatprep.subr.bf16.mxu0 %v6768_v4  ;;  %v1177_v18 = vld [vmem:[#allocation6 + $0x440] sm:$0xff]  ;;  %v6728_v24 = vcombine.high %v1161_v14, %v1165_v15  ;;  %v6727_v29 = vcombine.low %v1161_v14, %v1165_v15 }
 0x10b   : > { %3014 = vmatpush1.bf16.msra.mxu1 %v6623_v5  ;;  %v1181_v19 = vld [vmem:[#allocation6 + $0x460] sm:$0xff] }
 0x10c   : > { %3015 = vmatprep.subr.bf16.mxu1 %v6616_v8  ;;  %v1153_v22 = vld [vmem:[#allocation6 + $0x380] sm:$0xff]  ;;  %v6744_v28 = vcombine.high %v1177_v18, %v1181_v19  ;;  %v6743_v33 = vcombine.low %v1177_v18, %v1181_v19 }
 0x10d   : > { %3053 = vmatpush1.bf16.msra.mxu0 %v6767_v9  ;;  %v1157_v23 = vld [vmem:[#allocation6 + $0x3a0] sm:$0xff] }
 0x10e   : > { %3054 = vmatprep.subr.bf16.mxu0 %v6760_v12  ;;  %v1169_v26 = vld [vmem:[#allocation6 + $0x400] sm:$0xff]  ;;  %v6720_v32 = vcombine.high %v1153_v22, %v1157_v23  ;;  %v6719_v37 = vcombine.low %v1153_v22, %v1157_v23 }
 0x10f   : > { %3016 = vmatpush1.bf16.msra.mxu1 %v6615_v13  ;;  %v1173_v27 = vld [vmem:[#allocation6 + $0x420] sm:$0xff] }
 0x110   : > { %3017 = vmatprep.subr.bf16.mxu1 %v6608_v16  ;;  %v1145_v30 = vld [vmem:[#allocation6 + $0x340] sm:$0xff]  ;;  %v6736_v36 = vcombine.high %v1169_v26, %v1173_v27  ;;  %v6735_v41 = vcombine.low %v1169_v26, %v1173_v27 }
 0x111   : > { %3055 = vmatpush1.bf16.msra.mxu0 %v6759_v17  ;;  %v1149_v31 = vld [vmem:[#allocation6 + $0x360] sm:$0xff] }
 0x112   : > { %3056 = vmatprep.subr.bf16.mxu0 %v6752_v20  ;;  %v1289_v34 = vld [vmem:[#allocation6 + $0x7c0] sm:$0xff]  ;;  %v6712_v40 = vcombine.high %v1145_v30, %v1149_v31  ;;  %v6711_v45 = vcombine.low %v1145_v30, %v1149_v31  ;;  %v1098_v30 = vld [vmem:[#allocation6 + $0x1c8] sm:$0xff] }
 0x113   : > { %3018 = vmatpush1.bf16.msra.mxu1 %v6607_v21  ;;  %v1293_v35 = vld [vmem:[#allocation6 + $0x7e0] sm:$0xff] }
 0x114   : > { %3019 = vmatprep.subr.bf16.mxu1 %v6728_v24  ;;  %v1137_v38 = vld [vmem:[#allocation6 + $0x300] sm:$0xff]  ;;  %v6856_v44 = vcombine.high %v1289_v34, %v1293_v35  ;;  %v6855_v49 = vcombine.low %v1289_v34, %v1293_v35 }
 0x115   : > { %3057 = vmatpush1.bf16.msra.mxu0 %v6751_v25  ;;  %v1141_v39 = vld [vmem:[#allocation6 + $0x320] sm:$0xff] }
 0x116   : > { %3058 = vmatprep.subr.bf16.mxu0 %v6744_v28  ;;  %v1281_v42 = vld [vmem:[#allocation6 + $0x780] sm:$0xff]  ;;  %v6704_v48 = vcombine.high %v1137_v38, %v1141_v39  ;;  %v6703_v53 = vcombine.low %v1137_v38, %v1141_v39  ;;  %v772_v39 = vld [vmem:[#allocation4] sm:$0x3f] }
 0x117   : > { %3020 = vmatpush2.bf16.msra.mxu1 %v6727_v29  ;;  %v1285_v43 = vld [vmem:[#allocation6 + $0x7a0] sm:$0xff] }
 0x118   : > { %3021 = vmatprep.subr.bf16.mxu1 %v6720_v32  ;;  %v1129_v46 = vld [vmem:[#allocation6 + $0x2c0] sm:$0xff]  ;;  %v6848_v52 = vcombine.high %v1281_v42, %v1285_v43  ;;  %v6847_v57 = vcombine.low %v1281_v42, %v1285_v43  ;;  %v1102_v32 = vld [vmem:[#allocation6 + $0x1e8] sm:$0xff] }
 0x119   : > { %3059 = vmatpush1.bf16.msra.mxu0 %v6743_v33  ;;  %v1133_v47 = vld [vmem:[#allocation6 + $0x2e0] sm:$0xff]  ;;  %v6665_v34 = vcombine.low %v1098_v30, %v1102_v32  ;;  %v6666_v35 = vcombine.high %v1098_v30, %v1102_v32 }
 0x11a   : > { %3060 = vmatprep.subr.bf16.mxu0 %v6736_v36  ;;  %v1273_v50 = vld [vmem:[#allocation6 + $0x740] sm:$0xff]  ;;  %v6696_v56 = vcombine.high %v1129_v46, %v1133_v47  ;;  %v6695_v61 = vcombine.low %v1129_v46, %v1133_v47  ;;  %v774_v36 = vlaneseq }
 0x11b   : > { %3022 = vmatpush2.bf16.msra.mxu1 %v6719_v37  ;;  %v1277_v51 = vld [vmem:[#allocation6 + $0x760] sm:$0xff] }
 0x11c   : > { %3023 = vmatprep.subr.bf16.mxu1 %v6712_v40  ;;  %v1121_v54 = vld [vmem:[#allocation6 + $0x280] sm:$0xff]  ;;  %v6840_v60 = vcombine.high %v1273_v50, %v1277_v51  ;;  %v6839_v63 = vcombine.low %v1273_v50, %v1277_v51  ;;  %v8816_v37 = vshrl.u32 %v774_v36, 7 }
 0x11d   : > { %3061 = vmatpush1.bf16.msra.mxu0 %v6735_v41  ;;  %v1125_v55 = vld [vmem:[#allocation6 + $0x2a0] sm:$0xff] }
 0x11e   : > { %3062 = vmatprep.subr.bf16.mxu0 %v6856_v44  ;;  %v1265_v58 = vld [vmem:[#allocation6 + $0x700] sm:$0xff]  ;;  %v6688_v62 = vcombine.high %v1121_v54, %v1125_v55  ;;  %v6687_v4 = vcombine.low %v1121_v54, %v1125_v55  ;;  %v8819_v38 = vsub.s32 3, %v8816_v37  ;;  %v8822_v40 = vsub.s32 1, %v8816_v37 }
 0x11f   : > { %3024 = vmatpush2.bf16.msra.mxu1 %v6711_v45  ;;  %v1269_v59 = vld [vmem:[#allocation6 + $0x720] sm:$0xff]  ;;  %v8826_v42 = vsub.s32 0, %v8816_v37  ;;  %v8829_v44 = vsub.s32 2, %v8816_v37  ;;  %v792_v54 = vsub.s32 4, %v8816_v37 }
 0x120   : > { %3025 = vmatprep.subr.bf16.mxu1 %v6704_v48  ;;  %v1257_v1 = vld [vmem:[#allocation6 + $0x6c0] sm:$0xff]  ;;  %v6832_v3 = vcombine.high %v1265_v58, %v1269_v59  ;;  %v6831_v5 = vcombine.low %v1265_v58, %v1269_v59  ;;  %v789_v41 = vrot.slane %v772_v39, %v8819_v38  ;;  %v781_v48 = vrot.slane %v772_v39, %v8822_v40 }
 0x121   : > { %3063 = vmatpush2.bf16.msra.mxu0 %v6855_v49  ;;  %v1261_v2 = vld [vmem:[#allocation6 + $0x6e0] sm:$0xff]  ;;  %v777_v50 = vrot.slane %v772_v39, %v8826_v42  ;;  %v785_v51 = vrot.slane %v772_v39, %v8829_v44 }
 0x122   : > { %3064 = vmatprep.subr.bf16.mxu0 %v6848_v52  ;;  %v1249_v6 = vld [vmem:[#allocation6 + $0x680] sm:$0xff]  ;;  %v6824_v8 = vcombine.high %v1257_v1, %v1261_v2  ;;  %v6823_v9 = vcombine.low %v1257_v1, %v1261_v2 }
 0x123   : > { %3026 = vmatpush2.bf16.msra.mxu1 %v6703_v53  ;;  %v1253_v7 = vld [vmem:[#allocation6 + $0x6a0] sm:$0xff] }
 0x124   : > { %3027 = vmatprep.subr.bf16.mxu1 %v6696_v56  ;;  %v6816_v10 = vcombine.high %v1249_v6, %v1253_v7  ;;  %v6815_v11 = vcombine.low %v1249_v6, %v1253_v7  ;;  %v1113_v12 = vld [vmem:[#allocation6 + $0x240] sm:$0xff]  ;;  %v793_v7 = vrot.slane %v772_v39, %v792_v54 }
 0x125   : > { %3065 = vmatpush2.bf16.msra.mxu0 %v6847_v57  ;;  %v1117_v13 = vld [vmem:[#allocation6 + $0x260] sm:$0xff] }
 0x126   : > { %3066 = vmatprep.subr.bf16.mxu0 %v6840_v60  ;;  %v1241_v14 = vld [vmem:[#allocation6 + $0x640] sm:$0xff]  ;;  %v6680_v15 = vcombine.high %v1113_v12, %v1117_v13  ;;  %v6679_v17 = vcombine.low %v1113_v12, %v1117_v13  ;;  %v1086_v13 = vld [vmem:[#allocation6 + $0x168] sm:$0xff] }
 0x127   : > { %3028 = vmatpush2.bf16.msra.mxu1 %v6695_v61  ;;  %v1245_v16 = vld [vmem:[#allocation6 + $0x660] sm:$0xff] }
 0x128   : > { %3029 = vmatprep.subr.bf16.mxu1 %v6688_v62  ;;  %v6807_v18 = vcombine.low %v1241_v14, %v1245_v16  ;;  %v6808_v19 = vcombine.high %v1241_v14, %v1245_v16  ;;  %v1105_v20 = vld [vmem:[#allocation6 + $0x200] sm:$0xff]  ;;  %v1090_v62 = vld [vmem:[#allocation6 + $0x188] sm:$0xff] }
 0x129   : > { %3067 = vmatpush2.bf16.msra.mxu0 %v6839_v63  ;;  %v1109_v21 = vld [vmem:[#allocation6 + $0x220] sm:$0xff]  ;;  %v1094_v63 = vld [vmem:[#allocation6 + $0x1a8] sm:$0xff] }
 0x12a   : > { %3068 = vmatprep.subr.bf16.mxu0 %v6832_v3  ;;  %v1233_v22 = vld [vmem:[#allocation6 + $0x600] sm:$0xff]  ;;  %v6672_v23 = vcombine.high %v1105_v20, %v1109_v21  ;;  %v6671_v25 = vcombine.low %v1105_v20, %v1109_v21 }
 0x12b   : > { %3030 = vmatpush2.bf16.msra.mxu1 %v6687_v4  ;;  %v1237_v24 = vld [vmem:[#allocation6 + $0x620] sm:$0xff] }
 0x12c   : > { %3031 = vmatprep.subr.bf16.mxu1 %v6680_v15  ;;  %v6799_v26 = vcombine.low %v1233_v22, %v1237_v24  ;;  %v6800_v27 = vcombine.high %v1233_v22, %v1237_v24  ;;  %v8812_v28 = vld [vmem:[#allocation6 + $0x9c0] sm:$0xff]  ;;  %v1078_v24 = vld [vmem:[#allocation6 + $0x128] sm:$0xff] }
 0x12d   : > { %3069 = vmatpush2.bf16.msra.mxu0 %v6831_v5  ;;  %v1357_v29 = vld [vmem:[#allocation6 + $0x9e0] sm:$0xff] }
 0x12e   : > { %3070 = vmatprep.subr.bf16.mxu0 %v6824_v8  ;;  %v6920_v31 = vcombine.high %v8812_v28, %v1357_v29  ;;  %v6919_v33 = vcombine.low %v8812_v28, %v1357_v29  ;;  %v1345_v3 = vld [vmem:[#allocation6 + $0x980] sm:$0xff] }
 0x12f   : > { %3032 = vmatpush2.bf16.msra.mxu1 %v6679_v17  ;;  %v1349_v4 = vld [vmem:[#allocation6 + $0x9a0] sm:$0xff] }
 0x130   : > { %3033 = vmatprep.subr.bf16.mxu1 %v6672_v23  ;;  %v6912_v12 = vcombine.high %v1345_v3, %v1349_v4  ;;  %v1337_v14 = vld [vmem:[#allocation6 + $0x940] sm:$0xff]  ;;  %v1074_v23 = vld [vmem:[#allocation6 + $0x108] sm:$0xff] }
 0x131   : > { %3071 = vmatpush2.bf16.msra.mxu0 %v6823_v9  ;;  %v1341_v15 = vld [vmem:[#allocation6 + $0x960] sm:$0xff]  ;;  %v6641_v39 = vcombine.low %v1074_v23, %v1078_v24 }
 0x132   : > { %3072 = vmatprep.subr.bf16.mxu0 %v6816_v10  ;;  %v6658_v10 = vcombine.high %v1090_v62, %v1094_v63  ;;  %v6904_v22 = vcombine.high %v1337_v14, %v1341_v15  ;;  %v6903_v30 = vcombine.low %v1337_v14, %v1341_v15  ;;  %v1325_v36 = vld [vmem:[#allocation6 + $0x8e0] sm:$0xff]  ;;  %v1226_v14 = vld [vmem:[#allocation6 + $0x5c8] sm:$0xff] }
 0x133   : > { %3034 = vmatpush2.bf16.msra.mxu1 %v6671_v25  ;;  %v1329_v25 = vld [vmem:[#allocation6 + $0x900] sm:$0xff]  ;;  %v1230_v15 = vld [vmem:[#allocation6 + $0x5e8] sm:$0xff] }
 0x134   : > { %3089 = vmatprep.subr.bf16.mxu1 %v6920_v31  ;;  %v6642_v31 = vcombine.high %v1074_v23, %v1078_v24  ;;  %v1158_v23 = vld [vmem:[#allocation6 + $0x3a8] sm:$0xff] }
 0x135   : > { %3073 = vmatpush2.bf16.msra.mxu0 %v6815_v11  ;;  %v1082_v11 = vld [vmem:[#allocation6 + $0x148] sm:$0xff] }
 0x136   : > { %3074 = vmatprep.subr.bf16.mxu0 %v6808_v19  ;;  %v6911_v19 = vcombine.low %v1345_v3, %v1349_v4  ;;  %v6650_v21 = vcombine.high %v1082_v11, %v1086_v13  ;;  %v6649_v29 = vcombine.low %v1082_v11, %v1086_v13  ;;  %v1042_v3 = vld [vmem:[#allocation6 + $0x8] sm:$0xff] }
 0x137   : > { %v1046_v4 = vld [vmem:[#allocation6 + $0x28] sm:$0xff] }
 0x138   : > { %v6610_v11 = vcombine.high %v1042_v3, %v1046_v4  ;;  %v1166_v13 = vld [vmem:[#allocation6 + $0x3e8] sm:$0xff] }
 0x139   : > { %3075 = vmatpush2.bf16.msra.mxu0 %v6807_v18  ;;  %v6657_v18 = vcombine.low %v1090_v62, %v1094_v63  ;;  %v1218_v24 = vld [vmem:[#allocation6 + $0x588] sm:$0xff] }
 0x13a   : > { %3076 = vmatprep.subr.bf16.mxu0 %v6800_v27 }
 0x13d   : > { %3077 = vmatpush2.bf16.msra.mxu0 %v6799_v26  ;;  %v1333_v26 = vld [vmem:[#allocation6 + $0x920] sm:$0xff] }
 0x13e   : > { %3132 = vmatprep.subr.bf16.mxu0 %v6666_v35  ;;  %v6896_v32 = vcombine.high %v1329_v25, %v1333_v26  ;;  %v1321_v35 = vld [vmem:[#allocation6 + $0x8c0] sm:$0xff] }
 0x1b4   : > { %v941_v43 = vpop.f32.mrf.mxu0 }
 0x1b5   : > { %v984_v45 = vpop.f32.mrf.mxu1  ;;  %v942_v1 = vadd.f32 %v941_v43, %v777_v50 }
 0x1b6   : > { %v943_v46 = vpop.f32.mrf.mxu0  ;;  %v985_v2 = vadd.f32 %v984_v45, %v785_v51  ;;  %v6888_v45 = vcombine.high %v1321_v35, %v1325_v36 }
 0x1b7   : > { %v986_v47 = vpop.f32.mrf.mxu1  ;;  %v8838_v59 = vadd.f32 %v943_v46, %v781_v48  ;;  %v1313_v46 = vld [vmem:[#allocation6 + $0x880] sm:$0xff] }
 0x1b8   : > { %v987_v49 = vadd.f32 %v986_v47, %v789_v41  ;;  %v945_v52 = vpop.f32.mrf.mxu0  ;;  %v1317_v47 = vld [vmem:[#allocation6 + $0x8a0] sm:$0xff] }
 0x1b9   : > { %v988_v53 = vpop.f32.mrf.mxu1  ;;  %v946_v55 = vadd.f32 %v945_v52, %v777_v50  ;;  %v6880_v52 = vcombine.high %v1313_v46, %v1317_v47 }
 0x1ba   : > { %4479 = vrot.lane.b32.xlu0 %v987_v49, %s8514_s30  ;;  %v8836_v56 = vadd.f32 %v988_v53, %v785_v51  ;;  %v947_v57 = vpop.f32.mrf.mxu0  ;;  %v6887_v51 = vcombine.low %v1321_v35, %v1325_v36  ;;  %v1214_v35 = vld [vmem:[#allocation6 + $0x568] sm:$0xff] }
 0x1bb   : > { %v990_v58 = vpop.f32.mrf.mxu1  ;;  %v8840_v60 = vadd.f32 %v947_v57, %v781_v48  ;;  %v8851_v8 = vpack.c.bf16 %v946_v55, %v942_v1  ;;  %v1058_v48 = vld [vmem:[#allocation6 + $0x88] sm:$0xff]  ;;  %v1305_v55 = vld [vmem:[#allocation6 + $0x840] sm:$0xff] }
 0x1bc   : > { %v991_v61 = vadd.f32 %v990_v58, %v789_v41  ;;  %v8854_v9 = vpack.c.bf16 %v8836_v56, %v985_v2  ;;  %v6895_v41 = vcombine.low %v1329_v25, %v1333_v26  ;;  %v1309_v57 = vld [vmem:[#allocation6 + $0x860] sm:$0xff]  ;;  %v1054_v58 = vld [vmem:[#allocation6 + $0x68] sm:$0xff] }
 0x1bd   : > { %v8844_v5 = vpack.c.bf16 %v8840_v60, %v8838_v59  ;;  %v6872_v62 = vcombine.high %v1305_v55, %v1309_v57  ;;  %v1297_v1 = vld [vmem:[#allocation6 + $0x800] sm:$0xff]  ;;  %v1222_v25 = vld [vmem:[#allocation6 + $0x5a8] sm:$0xff] }
 0x1be   : > { %v8846_v6 = vpack.c.bf16 %v991_v61, %v987_v49  ;;  %4487 = vrot.lane.b32.xlu1 %v991_v61, %s8514_s30  ;;  %v1062_v49 = vld [vmem:[#allocation6 + $0xa8] sm:$0xff] }
 0x1bf   : > { %3035 = vmatprep.mubr.bf16.mxu1 %v8844_v5  ;;  %v6626_v53 = vcombine.high %v1058_v48, %v1062_v49  ;;  %v6625_v61 = vcombine.low %v1058_v48, %v1062_v49 }
 0x1c0   : > { %3078 = vmatprep.mubr.bf16.mxu0 %v8846_v6  ;;  %v1027_v16 = vpop.f32.mrf.mxu0  ;;  %3036 = vmatmul.mubr.bf16.vlgmr.msra.gmra.mxu1 %v8851_v8 }
 0x1c1   : > { %3079 = vmatmul.mubr.bf16.vlgmr.msra.gmra.mxu0 %v8854_v9  ;;  %v8860_v17 = vadd.f32 %v1027_v16, %v793_v7  ;;  %3090 = vmatpush1.bf16.msra.mxu1 %v6919_v33  ;;  %v1066_v33 = vld [vmem:[#allocation6 + $0xc8] sm:$0xff] }
 0x1c2   : > { %3133 = vmatpush1.bf16.msra.mxu0 %v6665_v34  ;;  %3164 = vmatprep.mubr.bf16.mxu0 %v8844_v5  ;;  %v8863_v20 = vpop.f32.mrf.mxu0  ;;  %v1070_v34 = vld [vmem:[#allocation6 + $0xe8] sm:$0xff] }
 0x1c3   : > { %3134 = vmatprep.subr.bf16.mxu0 %v6658_v10  ;;  %4481 = vrot.lane.b32.xlu0 %v8860_v17, %s8514_s30  ;;  %v6634_v43 = vcombine.high %v1066_v33, %v1070_v34  ;;  %v6633_v50 = vcombine.low %v1066_v33, %v1070_v34  ;;  %v1150_v33 = vld [vmem:[#allocation6 + $0x368] sm:$0xff] }
 0x1c4   : > { %3091 = vmatprep.subr.bf16.mxu1 %v6912_v12  ;;  %v1031_v27 = vpop.f32.mrf.mxu0  ;;  %3121 = vmatprep.mubr.bf16.mxu1 %v8513_v0  ;;  %v1162_v12 = vld [vmem:[#allocation6 + $0x3c8] sm:$0xff] }
 0x1c5   : > { %v8868_v28 = vadd.f32 %v1031_v27, %v793_v7  ;;  %3092 = vmatpush1.bf16.msra.mxu1 %v6911_v19  ;;  %v6871_v7 = vcombine.low %v1305_v55, %v1309_v57  ;;  %v6730_v19 = vcombine.high %v1162_v12, %v1166_v13  ;;  %v6729_v26 = vcombine.low %v1162_v12, %v1166_v13  ;;  %v1210_v34 = vld [vmem:[#allocation6 + $0x548] sm:$0xff] }
 0x1c6   : > { %3135 = vmatpush1.bf16.msra.mxu0 %v6657_v18  ;;  %3093 = vmatprep.subr.bf16.mxu1 %v6904_v22  ;;  %v6609_v18 = vcombine.low %v1042_v3, %v1046_v4  ;;  %v1154_v22 = vld [vmem:[#allocation6 + $0x388] sm:$0xff]  ;;  %v6793_v27 = vcombine.low %v1226_v14, %v1230_v15  ;;  %v6777_v48 = vcombine.low %v1210_v34, %v1214_v35 }
 0x1c7   : > { %3136 = vmatprep.subr.bf16.mxu0 %v6650_v21  ;;  %4489 = vrot.lane.b32.xlu1 %v8868_v28, %s8514_s30  ;;  %v6794_v21 = vcombine.high %v1226_v14, %v1230_v15  ;;  %v6721_v36 = vcombine.low %v1154_v22, %v1158_v23  ;;  %v1198_v55 = vld [vmem:[#allocation6 + $0x4e8] sm:$0xff] }
 0x1c8   : > { %4477 = vrot.lane.b32.xlu0 %v985_v2, %s8514_s30  ;;  %v1301_v2 = vld [vmem:[#allocation6 + $0x820] sm:$0xff]  ;;  %v1182_v12 = vld [vmem:[#allocation6 + $0x468] sm:$0xff] }
 0x1c9   : > { %3094 = vmatpush1.bf16.msra.mxu1 %v6903_v30  ;;  %v6863_v16 = vcombine.low %v1297_v1, %v1301_v2  ;;  %v6722_v30 = vcombine.high %v1154_v22, %v1158_v23  ;;  %v1174_v22 = vld [vmem:[#allocation6 + $0x428] sm:$0xff] }
 0x1ca   : > { %3137 = vmatpush1.bf16.msra.mxu0 %v6649_v29  ;;  %3095 = vmatprep.subr.bf16.mxu1 %v6896_v32  ;;  %v8881_v29 = vpack.c.bf16 %v8868_v28, %v8860_v17  ;;  %v6786_v32 = vcombine.high %v1218_v24, %v1222_v25  ;;  %v6778_v17 = vcombine.high %v1210_v34, %v1214_v35  ;;  %v1138_v28 = vld [vmem:[#allocation6 + $0x308] sm:$0xff] }
 0x1cb   : > { %3138 = vmatprep.subr.bf16.mxu0 %v6642_v31  ;;  %4485 = vrot.lane.b32.xlu1 %v8836_v56, %s8514_s30  ;;  %v1050_v56 = vld [vmem:[#allocation6 + $0x48] sm:$0xff] }
 0x1cc   : > { %4475 = vrot.lane.b32.xlu0 %v8838_v59, %s8514_s30  ;;  %v6879_v59 = vcombine.low %v1313_v46, %v1317_v47  ;;  %v6618_v63 = vcombine.high %v1050_v56, %v1054_v58  ;;  %v6617_v10 = vcombine.low %v1050_v56, %v1054_v58  ;;  %v1146_v31 = vld [vmem:[#allocation6 + $0x348] sm:$0xff] }
 0x1cd   : > { %3096 = vmatpush1.bf16.msra.mxu1 %v6895_v41  ;;  %v6714_v41 = vcombine.high %v1146_v31, %v1150_v33  ;;  %v1206_v46 = vld [vmem:[#allocation6 + $0x528] sm:$0xff]  ;;  %v6713_v47 = vcombine.low %v1146_v31, %v1150_v33 }
 0x1ce   : > { %3139 = vmatpush1.bf16.msra.mxu0 %v6641_v39  ;;  %3097 = vmatprep.subr.bf16.mxu1 %v6888_v45  ;;  %v6785_v39 = vcombine.low %v1218_v24, %v1222_v25  ;;  %v1202_v45 = vld [vmem:[#allocation6 + $0x508] sm:$0xff] }
 0x1cf   : > { %3140 = vmatprep.subr.bf16.mxu0 %v6634_v43  ;;  %4483 = vrot.lane.b32.xlu1 %v8840_v60, %s8514_s30  ;;  %v6864_v60 = vcombine.high %v1297_v1, %v1301_v2  ;;  %v1142_v43 = vld [vmem:[#allocation6 + $0x328] sm:$0xff]  ;;  %v6769_v56 = vcombine.low %v1202_v45, %v1206_v46 }
 0x1d0   : > { %v6706_v49 = vcombine.high %v1138_v28, %v1142_v43  ;;  %v6705_v57 = vcombine.low %v1138_v28, %v1142_v43  ;;  %v1190_v1 = vld [vmem:[#allocation6 + $0x4a8] sm:$0xff] }
 0x1d1   : > { %3098 = vmatpush1.bf16.msra.mxu1 %v6887_v51  ;;  %v1130_v51 = vld [vmem:[#allocation6 + $0x2c8] sm:$0xff] }
 0x1d2   : > { %3141 = vmatpush1.bf16.msra.mxu0 %v6633_v50  ;;  %3099 = vmatprep.subr.bf16.mxu1 %v6880_v52  ;;  %v6770_v50 = vcombine.high %v1202_v45, %v1206_v46  ;;  %v1134_v52 = vld [vmem:[#allocation6 + $0x2e8] sm:$0xff] }
 0x1d3   : > { %3142 = vmatprep.subr.bf16.mxu0 %v6626_v53  ;;  %v1194_v53 = vld [vmem:[#allocation6 + $0x4c8] sm:$0xff]  ;;  %v6698_v58 = vcombine.high %v1130_v51, %v1134_v52  ;;  %v6697_v2 = vcombine.low %v1130_v51, %v1134_v52 }
 0x1d4   : > { %v6761_v3 = vcombine.low %v1194_v53, %v1198_v55  ;;  %v1354_v31 = vld [vmem:[#allocation6 + $0x9c8] sm:$0xff] }
 0x1d5   : > { %3100 = vmatpush1.bf16.msra.mxu1 %v6879_v59  ;;  %v6762_v59 = vcombine.high %v1194_v53, %v1198_v55  ;;  %v1350_v28 = vld [vmem:[#allocation6 + $0x9a8] sm:$0xff] }
 0x1d6   : > { %3143 = vmatpush1.bf16.msra.mxu0 %v6625_v61  ;;  %3101 = vmatprep.subr.bf16.mxu1 %v6872_v62  ;;  %v1122_v61 = vld [vmem:[#allocation6 + $0x288] sm:$0xff] }
 0x1d7   : > { %3144 = vmatprep.subr.bf16.mxu0 %v6618_v63  ;;  %v1126_v62 = vld [vmem:[#allocation6 + $0x2a8] sm:$0xff] }
 0x1d8   : > { %v1186_v63 = vld [vmem:[#allocation6 + $0x488] sm:$0xff]  ;;  %v6690_v4 = vcombine.high %v1122_v61, %v1126_v62  ;;  %v6689_v13 = vcombine.low %v1122_v61, %v1126_v62 }
 0x1d9   : > { %3102 = vmatpush1.bf16.msra.mxu1 %v6871_v7  ;;  %v6754_v7 = vcombine.high %v1186_v63, %v1190_v1  ;;  %v6753_v14 = vcombine.low %v1186_v63, %v1190_v1  ;;  %v1342_v51 = vld [vmem:[#allocation6 + $0x968] sm:$0xff] }
 0x1da   : > { %3145 = vmatpush1.bf16.msra.mxu0 %v6617_v10  ;;  %3103 = vmatprep.subr.bf16.mxu1 %v6864_v60  ;;  %v1114_v10 = vld [vmem:[#allocation6 + $0x248] sm:$0xff] }
 0x1db   : > { %3146 = vmatprep.subr.bf16.mxu0 %v6610_v11  ;;  %v1118_v60 = vld [vmem:[#allocation6 + $0x268] sm:$0xff] }
 0x1dc   : > { %v1178_v11 = vld [vmem:[#allocation6 + $0x448] sm:$0xff]  ;;  %v6682_v15 = vcombine.high %v1114_v10, %v1118_v60  ;;  %v6681_v23 = vcombine.low %v1114_v10, %v1118_v60 }
 0x1dd   : > { %3104 = vmatpush1.bf16.msra.mxu1 %v6863_v16  ;;  %v6746_v16 = vcombine.high %v1178_v11, %v1182_v12  ;;  %v6745_v24 = vcombine.low %v1178_v11, %v1182_v12  ;;  %v1334_v61 = vld [vmem:[#allocation6 + $0x928] sm:$0xff] }
 0x1de   : > { %3147 = vmatpush1.bf16.msra.mxu0 %v6609_v18  ;;  %3175 = vmatprep.subr.bf16.mxu1 %v6794_v21  ;;  %v1106_v18 = vld [vmem:[#allocation6 + $0x208] sm:$0xff] }
 0x1df   : > { %3148 = vmatprep.subr.bf16.mxu0 %v6730_v19  ;;  %v1110_v19 = vld [vmem:[#allocation6 + $0x228] sm:$0xff] }
 0x1e0   : > { %3122 = vmatmul.mubr.bf16.vlgmr.msra.gmra.mxu1 %v8881_v29  ;;  %v1170_v21 = vld [vmem:[#allocation6 + $0x408] sm:$0xff]  ;;  %v6674_v25 = vcombine.high %v1106_v18, %v1110_v19  ;;  %v6673_v33 = vcombine.low %v1106_v18, %v1110_v19 }
 0x1e1   : > { %3176 = vmatpush1.bf16.msra.mxu1 %v6793_v27  ;;  %3207 = vmatprep.mubr.bf16.mxu1 %v8846_v6  ;;  %v1290_v27 = vld [vmem:[#allocation6 + $0x7c8] sm:$0xff]  ;;  %v6737_v34 = vcombine.low %v1170_v21, %v1174_v22 }
 0x1e2   : > { %3149 = vmatpush2.bf16.msra.mxu0 %v6729_v26  ;;  %3177 = vmatprep.subr.bf16.mxu1 %v6786_v32  ;;  %v6738_v26 = vcombine.high %v1170_v21, %v1174_v22  ;;  %v1358_v32 = vld [vmem:[#allocation6 + $0x9e8] sm:$0xff] }
 0x1e3   : > { %3150 = vmatprep.subr.bf16.mxu0 %v6722_v30  ;;  %v1294_v30 = vld [vmem:[#allocation6 + $0x7e8] sm:$0xff]  ;;  %v6921_v45 = vcombine.low %v1354_v31, %v1358_v32 }
 0x1e4   : > { %v6858_v35 = vcombine.high %v1290_v27, %v1294_v30  ;;  %v6857_v43 = vcombine.low %v1290_v27, %v1294_v30  ;;  %v1326_v10 = vld [vmem:[#allocation6 + $0x8e8] sm:$0xff] }
 0x1e5   : > { %3178 = vmatpush1.bf16.msra.mxu1 %v6785_v39  ;;  %v1282_v39 = vld [vmem:[#allocation6 + $0x788] sm:$0xff] }
 0x1e6   : > { %3151 = vmatpush2.bf16.msra.mxu0 %v6721_v36  ;;  %3179 = vmatprep.subr.bf16.mxu1 %v6778_v17  ;;  %v6922_v36 = vcombine.high %v1354_v31, %v1358_v32  ;;  %v1346_v17 = vld [vmem:[#allocation6 + $0x988] sm:$0xff] }
 0x1e7   : > { %3152 = vmatprep.subr.bf16.mxu0 %v6714_v41  ;;  %v1286_v41 = vld [vmem:[#allocation6 + $0x7a8] sm:$0xff]  ;;  %v6913_v53 = vcombine.low %v1346_v17, %v1350_v28 }
 0x1e8   : > { %v6850_v46 = vcombine.high %v1282_v39, %v1286_v41  ;;  %v6849_v52 = vcombine.low %v1282_v39, %v1286_v41  ;;  %v1318_v18 = vld [vmem:[#allocation6 + $0x8a8] sm:$0xff] }
 0x1e9   : > { %3180 = vmatpush1.bf16.msra.mxu1 %v6777_v48  ;;  %v1274_v48 = vld [vmem:[#allocation6 + $0x748] sm:$0xff] }
 0x1ea   : > { %3153 = vmatpush2.bf16.msra.mxu0 %v6713_v47  ;;  %3181 = vmatprep.subr.bf16.mxu1 %v6770_v50  ;;  %v6914_v47 = vcombine.high %v1346_v17, %v1350_v28  ;;  %v1338_v50 = vld [vmem:[#allocation6 + $0x948] sm:$0xff] }
 0x1eb   : > { %3154 = vmatprep.subr.bf16.mxu0 %v6706_v49  ;;  %v1278_v49 = vld [vmem:[#allocation6 + $0x768] sm:$0xff]  ;;  %v6905_v63 = vcombine.low %v1338_v50, %v1342_v51 }
 0x1ec   : > { %v6842_v55 = vcombine.high %v1274_v48, %v1278_v49  ;;  %v6841_v62 = vcombine.low %v1274_v48, %v1278_v49  ;;  %v1310_v27 = vld [vmem:[#allocation6 + $0x868] sm:$0xff]  ;;  %v1231_v48 = vld [vmem:[#allocation6 + $0x5f0] sm:$0xff] }
 0x1ed   : > { %3182 = vmatpush1.bf16.msra.mxu1 %v6769_v56  ;;  %v1266_v56 = vld [vmem:[#allocation6 + $0x708] sm:$0xff] }
 0x1ee   : > { %3155 = vmatpush2.bf16.msra.mxu0 %v6705_v57  ;;  %3183 = vmatprep.subr.bf16.mxu1 %v6762_v59  ;;  %v6906_v57 = vcombine.high %v1338_v50, %v1342_v51  ;;  %v1330_v59 = vld [vmem:[#allocation6 + $0x908] sm:$0xff] }
 0x1ef   : > { %3156 = vmatprep.subr.bf16.mxu0 %v6698_v58  ;;  %v1270_v58 = vld [vmem:[#allocation6 + $0x728] sm:$0xff]  ;;  %v6897_v11 = vcombine.low %v1330_v59, %v1334_v61 }
 0x1f0   : > { %v6834_v1 = vcombine.high %v1266_v56, %v1270_v58  ;;  %v6833_v60 = vcombine.low %v1266_v56, %v1270_v58  ;;  %v1302_v39 = vld [vmem:[#allocation6 + $0x828] sm:$0xff]  ;;  %v1223_v56 = vld [vmem:[#allocation6 + $0x5b0] sm:$0xff] }
 0x1f1   : > { %3184 = vmatpush1.bf16.msra.mxu1 %v6761_v3  ;;  %v1258_v3 = vld [vmem:[#allocation6 + $0x6c8] sm:$0xff] }
 0x1f2   : > { %3157 = vmatpush2.bf16.msra.mxu0 %v6697_v2  ;;  %3185 = vmatprep.subr.bf16.mxu1 %v6754_v7  ;;  %v6898_v2 = vcombine.high %v1330_v59, %v1334_v61  ;;  %v1322_v7 = vld [vmem:[#allocation6 + $0x8c8] sm:$0xff] }
 0x1f3   : > { %3158 = vmatprep.subr.bf16.mxu0 %v6690_v4  ;;  %v1262_v4 = vld [vmem:[#allocation6 + $0x6e8] sm:$0xff]  ;;  %v6889_v21 = vcombine.low %v1322_v7, %v1326_v10 }
 0x1f4   : > { %v6826_v12 = vcombine.high %v1258_v3, %v1262_v4  ;;  %v6825_v19 = vcombine.low %v1258_v3, %v1262_v4  ;;  %v1215_v3 = vld [vmem:[#allocation6 + $0x570] sm:$0xff] }
 0x1f5   : > { %3186 = vmatpush1.bf16.msra.mxu1 %v6753_v14  ;;  %v1250_v14 = vld [vmem:[#allocation6 + $0x688] sm:$0xff] }
 0x1f6   : > { %3159 = vmatpush2.bf16.msra.mxu0 %v6689_v13  ;;  %3187 = vmatprep.subr.bf16.mxu1 %v6746_v16  ;;  %v6890_v13 = vcombine.high %v1322_v7, %v1326_v10  ;;  %v1314_v16 = vld [vmem:[#allocation6 + $0x888] sm:$0xff] }
 0x1f7   : > { %3160 = vmatprep.subr.bf16.mxu0 %v6682_v15  ;;  %v1254_v15 = vld [vmem:[#allocation6 + $0x6a8] sm:$0xff]  ;;  %v6881_v31 = vcombine.low %v1314_v16, %v1318_v18 }
 0x1f8   : > { %v6818_v22 = vcombine.high %v1250_v14, %v1254_v15  ;;  %v6817_v30 = vcombine.low %v1250_v14, %v1254_v15  ;;  %v1207_v14 = vld [vmem:[#allocation6 + $0x530] sm:$0xff] }
 0x1f9   : > { %3188 = vmatpush1.bf16.msra.mxu1 %v6745_v24  ;;  %v1242_v24 = vld [vmem:[#allocation6 + $0x648] sm:$0xff] }
 0x1fa   : > { %3161 = vmatpush2.bf16.msra.mxu0 %v6681_v23  ;;  %3189 = vmatprep.subr.bf16.mxu1 %v6738_v26  ;;  %v6882_v23 = vcombine.high %v1314_v16, %v1318_v18  ;;  %v1306_v26 = vld [vmem:[#allocation6 + $0x848] sm:$0xff] }
 0x1fb   : > { %3162 = vmatprep.subr.bf16.mxu0 %v6674_v25  ;;  %v1246_v25 = vld [vmem:[#allocation6 + $0x668] sm:$0xff]  ;;  %v6873_v17 = vcombine.low %v1306_v26, %v1310_v27 }
 0x1fc   : > { %v6810_v32 = vcombine.high %v1242_v24, %v1246_v25  ;;  %v6809_v41 = vcombine.low %v1242_v24, %v1246_v25  ;;  %v1199_v24 = vld [vmem:[#allocation6 + $0x4f0] sm:$0xff] }
 0x1fd   : > { %3190 = vmatpush1.bf16.msra.mxu1 %v6737_v34  ;;  %v1234_v34 = vld [vmem:[#allocation6 + $0x608] sm:$0xff] }
 0x1fe   : > { %3163 = vmatpush2.bf16.msra.mxu0 %v6673_v33  ;;  %3191 = vmatprep.subr.bf16.mxu1 %v6858_v35  ;;  %v6874_v33 = vcombine.high %v1306_v26, %v1310_v27  ;;  %v1238_v35 = vld [vmem:[#allocation6 + $0x628] sm:$0xff] }
 0x1ff   : > { %3218 = vmatprep.subr.bf16.mxu0 %v6922_v36  ;;  %v1298_v36 = vld [vmem:[#allocation6 + $0x808] sm:$0xff]  ;;  %v6802_v28 = vcombine.high %v1234_v34, %v1238_v35  ;;  %v6801_v49 = vcombine.low %v1234_v34, %v1238_v35  ;;  %v1191_v34 = vld [vmem:[#allocation6 + $0x4b0] sm:$0xff] }
 0x200   : > { %v6865_v50 = vcombine.low %v1298_v36, %v1302_v39 }
 0x201   : > { %3165 = vmatmul.mubr.bf16.vlgmr.msra.gmra.mxu0 %v8851_v8  ;;  %3192 = vmatpush2.bf16.msra.mxu1 %v6857_v43  ;;  %v6866_v43 = vcombine.high %v1298_v36, %v1302_v39 }
 0x202   : > { %3219 = vmatpush1.bf16.msra.mxu0 %v6921_v45  ;;  %3193 = vmatprep.subr.bf16.mxu1 %v6850_v46  ;;  %v1099_v45 = vld [vmem:[#allocation6 + $0x1d0] sm:$0xff] }
 0x203   : > { %3220 = vmatprep.subr.bf16.mxu0 %v6914_v47  ;;  %3250 = vmatprep.mubr.bf16.mxu0 %v8513_v0  ;;  %v1103_v46 = vld [vmem:[#allocation6 + $0x1f0] sm:$0xff] }
 0x204   : > { %v1227_v47 = vld [vmem:[#allocation6 + $0x5d0] sm:$0xff]  ;;  %v6668_v51 = vcombine.high %v1099_v45, %v1103_v46  ;;  %v6667_v58 = vcombine.low %v1099_v45, %v1103_v46 }
 0x205   : > { %3194 = vmatpush2.bf16.msra.mxu1 %v6849_v52  ;;  %v6796_v52 = vcombine.high %v1227_v47, %v1231_v48  ;;  %v6795_v59 = vcombine.low %v1227_v47, %v1231_v48  ;;  %v1183_v45 = vld [vmem:[#allocation6 + $0x470] sm:$0xff] }
 0x206   : > { %3221 = vmatpush1.bf16.msra.mxu0 %v6913_v53  ;;  %3195 = vmatprep.subr.bf16.mxu1 %v6842_v55  ;;  %v1091_v53 = vld [vmem:[#allocation6 + $0x190] sm:$0xff] }
 0x207   : > { %3222 = vmatprep.subr.bf16.mxu0 %v6906_v57  ;;  %v1095_v55 = vld [vmem:[#allocation6 + $0x1b0] sm:$0xff] }
 0x208   : > { %v1219_v57 = vld [vmem:[#allocation6 + $0x590] sm:$0xff]  ;;  %v6660_v61 = vcombine.high %v1091_v53, %v1095_v55  ;;  %v6659_v4 = vcombine.low %v1091_v53, %v1095_v55 }
 0x209   : > { %3196 = vmatpush2.bf16.msra.mxu1 %v6841_v62  ;;  %v6788_v62 = vcombine.high %v1219_v57, %v1223_v56  ;;  %v6787_v7 = vcombine.low %v1219_v57, %v1223_v56  ;;  %v1175_v53 = vld [vmem:[#allocation6 + $0x430] sm:$0xff] }
 0x20a   : > { %3223 = vmatpush1.bf16.msra.mxu0 %v6905_v63  ;;  %3197 = vmatprep.subr.bf16.mxu1 %v6834_v1  ;;  %v1083_v63 = vld [vmem:[#allocation6 + $0x150] sm:$0xff] }
 0x20b   : > { %3224 = vmatprep.subr.bf16.mxu0 %v6898_v2  ;;  %v1087_v1 = vld [vmem:[#allocation6 + $0x170] sm:$0xff] }
 0x20c   : > { %v1211_v2 = vld [vmem:[#allocation6 + $0x550] sm:$0xff]  ;;  %v6652_v10 = vcombine.high %v1083_v63, %v1087_v1  ;;  %v6651_v15 = vcombine.low %v1083_v63, %v1087_v1 }
 0x20d   : > { %3198 = vmatpush2.bf16.msra.mxu1 %v6833_v60  ;;  %v6780_v60 = vcombine.high %v1211_v2, %v1215_v3  ;;  %v6779_v16 = vcombine.low %v1211_v2, %v1215_v3  ;;  %v1295_v63 = vld [vmem:[#allocation6 + $0x7f0] sm:$0xff] }
 0x20e   : > { %3225 = vmatpush1.bf16.msra.mxu0 %v6897_v11  ;;  %3199 = vmatprep.subr.bf16.mxu1 %v6826_v12  ;;  %v1075_v11 = vld [vmem:[#allocation6 + $0x110] sm:$0xff] }
 0x20f   : > { %3226 = vmatprep.subr.bf16.mxu0 %v6890_v13  ;;  %v1079_v12 = vld [vmem:[#allocation6 + $0x130] sm:$0xff] }
 0x210   : > { %v1203_v13 = vld [vmem:[#allocation6 + $0x510] sm:$0xff]  ;;  %v6644_v18 = vcombine.high %v1075_v11, %v1079_v12  ;;  %v6643_v25 = vcombine.low %v1075_v11, %v1079_v12 }
 0x211   : > { %3200 = vmatpush2.bf16.msra.mxu1 %v6825_v19  ;;  %v6772_v19 = vcombine.high %v1203_v13, %v1207_v14  ;;  %v6771_v26 = vcombine.low %v1203_v13, %v1207_v14  ;;  %v1287_v11 = vld [vmem:[#allocation6 + $0x7b0] sm:$0xff] }
 0x212   : > { %3227 = vmatpush1.bf16.msra.mxu0 %v6889_v21  ;;  %3201 = vmatprep.subr.bf16.mxu1 %v6818_v22  ;;  %v1067_v21 = vld [vmem:[#allocation6 + $0xd0] sm:$0xff] }
 0x213   : > { %3228 = vmatprep.subr.bf16.mxu0 %v6882_v23  ;;  %v1071_v22 = vld [vmem:[#allocation6 + $0xf0] sm:$0xff] }
 0x214   : > { %v1195_v23 = vld [vmem:[#allocation6 + $0x4d0] sm:$0xff]  ;;  %v6636_v27 = vcombine.high %v1067_v21, %v1071_v22  ;;  %v6635_v35 = vcombine.low %v1067_v21, %v1071_v22 }
 0x215   : > { %3202 = vmatpush2.bf16.msra.mxu1 %v6817_v30  ;;  %v6764_v30 = vcombine.high %v1195_v23, %v1199_v24  ;;  %v6763_v36 = vcombine.low %v1195_v23, %v1199_v24  ;;  %v1279_v21 = vld [vmem:[#allocation6 + $0x770] sm:$0xff] }
 0x216   : > { %3229 = vmatpush1.bf16.msra.mxu0 %v6881_v31  ;;  %3203 = vmatprep.subr.bf16.mxu1 %v6810_v32  ;;  %v1059_v31 = vld [vmem:[#allocation6 + $0x90] sm:$0xff] }
 0x217   : > { %3230 = vmatprep.subr.bf16.mxu0 %v6874_v33  ;;  %v1063_v32 = vld [vmem:[#allocation6 + $0xb0] sm:$0xff] }
 0x218   : > { %v1187_v33 = vld [vmem:[#allocation6 + $0x490] sm:$0xff]  ;;  %v6628_v39 = vcombine.high %v1059_v31, %v1063_v32  ;;  %v6627_v46 = vcombine.low %v1059_v31, %v1063_v32 }
 0x219   : > { %3204 = vmatpush2.bf16.msra.mxu1 %v6809_v41  ;;  %v6756_v41 = vcombine.high %v1187_v33, %v1191_v34  ;;  %v6755_v47 = vcombine.low %v1187_v33, %v1191_v34  ;;  %v1271_v31 = vld [vmem:[#allocation6 + $0x730] sm:$0xff] }
 0x21a   : > { %3231 = vmatpush1.bf16.msra.mxu0 %v6873_v17  ;;  %3205 = vmatprep.subr.bf16.mxu1 %v6802_v28  ;;  %v1051_v17 = vld [vmem:[#allocation6 + $0x50] sm:$0xff] }
 0x21b   : > { %3232 = vmatprep.subr.bf16.mxu0 %v6866_v43  ;;  %v1055_v28 = vld [vmem:[#allocation6 + $0x70] sm:$0xff] }
 0x21c   : > { %v1179_v43 = vld [vmem:[#allocation6 + $0x450] sm:$0xff]  ;;  %v6620_v48 = vcombine.high %v1051_v17, %v1055_v28  ;;  %v6619_v55 = vcombine.low %v1051_v17, %v1055_v28 }
 0x21d   : > { %3206 = vmatpush2.bf16.msra.mxu1 %v6801_v49  ;;  %v6748_v49 = vcombine.high %v1179_v43, %v1183_v45  ;;  %v6747_v57 = vcombine.low %v1179_v43, %v1183_v45  ;;  %v1263_v17 = vld [vmem:[#allocation6 + $0x6f0] sm:$0xff] }
 0x21e   : > { %3233 = vmatpush1.bf16.msra.mxu0 %v6865_v50  ;;  %3261 = vmatprep.subr.bf16.mxu1 %v6668_v51  ;;  %v1043_v50 = vld [vmem:[#allocation6 + $0x10] sm:$0xff] }
 0x21f   : > { %3304 = vmatprep.subr.bf16.mxu0 %v6796_v52  ;;  %v1047_v51 = vld [vmem:[#allocation6 + $0x30] sm:$0xff] }
 0x220   : > { %3208 = vmatmul.mubr.bf16.vlgmr.msra.gmra.mxu1 %v8854_v9  ;;  %v1171_v52 = vld [vmem:[#allocation6 + $0x410] sm:$0xff]  ;;  %v6612_v56 = vcombine.high %v1043_v50, %v1047_v51  ;;  %v6611_v1 = vcombine.low %v1043_v50, %v1047_v51 }
 0x221   : > { %3251 = vmatmul.mubr.bf16.vlgmr.msra.gmra.mxu0 %v8881_v29  ;;  %3262 = vmatpush1.bf16.msra.mxu1 %v6667_v58  ;;  %v6740_v58 = vcombine.high %v1171_v52, %v1175_v53  ;;  %v6739_v2 = vcombine.low %v1171_v52, %v1175_v53  ;;  %v1255_v50 = vld [vmem:[#allocation6 + $0x6b0] sm:$0xff] }
 0x222   : > { %3293 = vmatprep.mubr.bf16.mxu1 %v8844_v5  ;;  %3305 = vmatpush1.bf16.msra.mxu0 %v6795_v59  ;;  %v1163_v59 = vld [vmem:[#allocation6 + $0x3d0] sm:$0xff] }
 0x223   : > { %3336 = vmatprep.mubr.bf16.mxu0 %v8846_v6  ;;  %3263 = vmatprep.subr.bf16.mxu1 %v6660_v61  ;;  %v1167_v61 = vld [vmem:[#allocation6 + $0x3f0] sm:$0xff] }
 0x224   : > { %3306 = vmatprep.subr.bf16.mxu0 %v6788_v62  ;;  %v1291_v62 = vld [vmem:[#allocation6 + $0x7d0] sm:$0xff]  ;;  %v6732_v3 = vcombine.high %v1163_v59, %v1167_v61  ;;  %v6731_v12 = vcombine.low %v1163_v59, %v1167_v61 }
 0x225   : > { %3264 = vmatpush1.bf16.msra.mxu1 %v6659_v4  ;;  %v6860_v4 = vcombine.high %v1291_v62, %v1295_v63  ;;  %v6859_v13 = vcombine.low %v1291_v62, %v1295_v63  ;;  %v1247_v59 = vld [vmem:[#allocation6 + $0x670] sm:$0xff] }
 0x226   : > { %3307 = vmatpush1.bf16.msra.mxu0 %v6787_v7  ;;  %3265 = vmatprep.subr.bf16.mxu1 %v6652_v10  ;;  %v1155_v7 = vld [vmem:[#allocation6 + $0x390] sm:$0xff] }
 0x227   : > { %3308 = vmatprep.subr.bf16.mxu0 %v6780_v60  ;;  %v1159_v10 = vld [vmem:[#allocation6 + $0x3b0] sm:$0xff] }
 0x228   : > { %v1283_v60 = vld [vmem:[#allocation6 + $0x790] sm:$0xff]  ;;  %v6724_v14 = vcombine.high %v1155_v7, %v1159_v10  ;;  %v6723_v22 = vcombine.low %v1155_v7, %v1159_v10 }
 0x229   : > { %3266 = vmatpush1.bf16.msra.mxu1 %v6651_v15  ;;  %v6852_v15 = vcombine.high %v1283_v60, %v1287_v11  ;;  %v6851_v23 = vcombine.low %v1283_v60, %v1287_v11  ;;  %v1239_v7 = vld [vmem:[#allocation6 + $0x630] sm:$0xff] }
 0x22a   : > { %3309 = vmatpush1.bf16.msra.mxu0 %v6779_v16  ;;  %3267 = vmatprep.subr.bf16.mxu1 %v6644_v18  ;;  %v1147_v16 = vld [vmem:[#allocation6 + $0x350] sm:$0xff] }
 0x22b   : > { %3310 = vmatprep.subr.bf16.mxu0 %v6772_v19  ;;  %v1151_v18 = vld [vmem:[#allocation6 + $0x370] sm:$0xff] }
 0x22c   : > { %v1275_v19 = vld [vmem:[#allocation6 + $0x750] sm:$0xff]  ;;  %v6716_v24 = vcombine.high %v1147_v16, %v1151_v18  ;;  %v6715_v32 = vcombine.low %v1147_v16, %v1151_v18  ;;  %v1104_v16 = vld [vmem:[#allocation6 + $0x1f8] sm:$0xff] }
 0x22d   : > { %3268 = vmatpush1.bf16.msra.mxu1 %v6643_v25  ;;  %v6844_v25 = vcombine.high %v1275_v19, %v1279_v21  ;;  %v6843_v33 = vcombine.low %v1275_v19, %v1279_v21 }
 0x22e   : > { %3311 = vmatpush1.bf16.msra.mxu0 %v6771_v26  ;;  %3269 = vmatprep.subr.bf16.mxu1 %v6636_v27  ;;  %v1139_v26 = vld [vmem:[#allocation6 + $0x310] sm:$0xff] }
 0x22f   : > { %3312 = vmatprep.subr.bf16.mxu0 %v6764_v30  ;;  %v1143_v27 = vld [vmem:[#allocation6 + $0x330] sm:$0xff] }
 0x230   : > { %v1267_v30 = vld [vmem:[#allocation6 + $0x710] sm:$0xff]  ;;  %v6708_v34 = vcombine.high %v1139_v26, %v1143_v27  ;;  %v6707_v28 = vcombine.low %v1139_v26, %v1143_v27  ;;  %v1096_v26 = vld [vmem:[#allocation6 + $0x1b8] sm:$0xff] }
 0x231   : > { %3270 = vmatpush1.bf16.msra.mxu1 %v6635_v35  ;;  %v6836_v35 = vcombine.high %v1267_v30, %v1271_v31  ;;  %v6835_v43 = vcombine.low %v1267_v30, %v1271_v31 }
 0x232   : > { %3313 = vmatpush1.bf16.msra.mxu0 %v6763_v36  ;;  %3271 = vmatprep.subr.bf16.mxu1 %v6628_v39  ;;  %v1131_v36 = vld [vmem:[#allocation6 + $0x2d0] sm:$0xff] }
 0x233   : > { %3314 = vmatprep.subr.bf16.mxu0 %v6756_v41  ;;  %v1135_v39 = vld [vmem:[#allocation6 + $0x2f0] sm:$0xff] }
 0x234   : > { %v1259_v41 = vld [vmem:[#allocation6 + $0x6d0] sm:$0xff]  ;;  %v6700_v45 = vcombine.high %v1131_v36, %v1135_v39  ;;  %v6699_v51 = vcombine.low %v1131_v36, %v1135_v39  ;;  %v1088_v36 = vld [vmem:[#allocation6 + $0x178] sm:$0xff] }
 0x235   : > { %3272 = vmatpush1.bf16.msra.mxu1 %v6627_v46  ;;  %v6828_v46 = vcombine.high %v1259_v41, %v1263_v17  ;;  %v6827_v52 = vcombine.low %v1259_v41, %v1263_v17 }
 0x236   : > { %3315 = vmatpush1.bf16.msra.mxu0 %v6755_v47  ;;  %3273 = vmatprep.subr.bf16.mxu1 %v6620_v48  ;;  %v1123_v47 = vld [vmem:[#allocation6 + $0x290] sm:$0xff] }
 0x237   : > { %3316 = vmatprep.subr.bf16.mxu0 %v6748_v49  ;;  %v1127_v48 = vld [vmem:[#allocation6 + $0x2b0] sm:$0xff] }
 0x238   : > { %v1251_v49 = vld [vmem:[#allocation6 + $0x690] sm:$0xff]  ;;  %v6692_v53 = vcombine.high %v1123_v47, %v1127_v48  ;;  %v6691_v61 = vcombine.low %v1123_v47, %v1127_v48  ;;  %v1080_v47 = vld [vmem:[#allocation6 + $0x138] sm:$0xff] }
 0x239   : > { %3274 = vmatpush1.bf16.msra.mxu1 %v6619_v55  ;;  %v6820_v55 = vcombine.high %v1251_v49, %v1255_v50  ;;  %v6819_v62 = vcombine.low %v1251_v49, %v1255_v50 }
 0x23a   : > { %3317 = vmatpush1.bf16.msra.mxu0 %v6747_v57  ;;  %3275 = vmatprep.subr.bf16.mxu1 %v6612_v56  ;;  %v1115_v57 = vld [vmem:[#allocation6 + $0x250] sm:$0xff] }
 0x23b   : > { %3318 = vmatprep.subr.bf16.mxu0 %v6740_v58  ;;  %v1119_v56 = vld [vmem:[#allocation6 + $0x270] sm:$0xff] }
 0x23c   : > { %v1243_v58 = vld [vmem:[#allocation6 + $0x650] sm:$0xff]  ;;  %v6684_v63 = vcombine.high %v1115_v57, %v1119_v56  ;;  %v6683_v10 = vcombine.low %v1115_v57, %v1119_v56 }
 0x23d   : > { %3276 = vmatpush1.bf16.msra.mxu1 %v6611_v1  ;;  %v6812_v1 = vcombine.high %v1243_v58, %v1247_v59  ;;  %v6811_v60 = vcombine.low %v1243_v58, %v1247_v59 }
 0x23e   : > { %3319 = vmatpush1.bf16.msra.mxu0 %v6739_v2  ;;  %3277 = vmatprep.subr.bf16.mxu1 %v6732_v3  ;;  %v1107_v2 = vld [vmem:[#allocation6 + $0x210] sm:$0xff] }
 0x23f   : > { %3320 = vmatprep.subr.bf16.mxu0 %v6860_v4  ;;  %v1111_v3 = vld [vmem:[#allocation6 + $0x230] sm:$0xff] }
 0x240   : > { %v1235_v4 = vld [vmem:[#allocation6 + $0x610] sm:$0xff]  ;;  %v6676_v11 = vcombine.high %v1107_v2, %v1111_v3  ;;  %v6675_v18 = vcombine.low %v1107_v2, %v1111_v3 }
 0x241   : > { %3278 = vmatpush2.bf16.msra.mxu1 %v6731_v12  ;;  %v6804_v12 = vcombine.high %v1235_v4, %v1239_v7  ;;  %v6803_v19 = vcombine.low %v1235_v4, %v1239_v7 }
 0x242   : > { %3321 = vmatpush2.bf16.msra.mxu0 %v6859_v13  ;;  %3279 = vmatprep.subr.bf16.mxu1 %v6724_v14  ;;  %v1355_v13 = vld [vmem:[#allocation6 + $0x9d0] sm:$0xff] }
 0x243   : > { %3322 = vmatprep.subr.bf16.mxu0 %v6852_v15  ;;  %v1359_v14 = vld [vmem:[#allocation6 + $0x9f0] sm:$0xff]  ;;  %v1100_v15 = vld [vmem:[#allocation6 + $0x1d8] sm:$0xff] }
 0x244   : > { %v6924_v21 = vcombine.high %v1355_v13, %v1359_v14  ;;  %v6923_v27 = vcombine.low %v1355_v13, %v1359_v14  ;;  %v6669_v30 = vcombine.low %v1100_v15, %v1104_v16 }
 0x245   : > { %3280 = vmatpush2.bf16.msra.mxu1 %v6723_v22  ;;  %v6670_v22 = vcombine.high %v1100_v15, %v1104_v16 }
 0x246   : > { %3323 = vmatpush2.bf16.msra.mxu0 %v6851_v23  ;;  %3281 = vmatprep.subr.bf16.mxu1 %v6716_v24  ;;  %v1347_v23 = vld [vmem:[#allocation6 + $0x990] sm:$0xff] }
 0x247   : > { %3324 = vmatprep.subr.bf16.mxu0 %v6844_v25  ;;  %v1351_v24 = vld [vmem:[#allocation6 + $0x9b0] sm:$0xff]  ;;  %v1092_v25 = vld [vmem:[#allocation6 + $0x198] sm:$0xff] }
 0x248   : > { %v6916_v31 = vcombine.high %v1347_v23, %v1351_v24  ;;  %v6915_v39 = vcombine.low %v1347_v23, %v1351_v24  ;;  %v6661_v41 = vcombine.low %v1092_v25, %v1096_v26 }
 0x249   : > { %3282 = vmatpush2.bf16.msra.mxu1 %v6715_v32  ;;  %v6662_v32 = vcombine.high %v1092_v25, %v1096_v26 }
 0x24a   : > { %3325 = vmatpush2.bf16.msra.mxu0 %v6843_v33  ;;  %3283 = vmatprep.subr.bf16.mxu1 %v6708_v34  ;;  %v1339_v33 = vld [vmem:[#allocation6 + $0x950] sm:$0xff] }
 0x24b   : > { %3326 = vmatprep.subr.bf16.mxu0 %v6836_v35  ;;  %v1343_v34 = vld [vmem:[#allocation6 + $0x970] sm:$0xff]  ;;  %v1084_v35 = vld [vmem:[#allocation6 + $0x158] sm:$0xff] }
 0x24c   : > { %v6908_v17 = vcombine.high %v1339_v33, %v1343_v34  ;;  %v6907_v48 = vcombine.low %v1339_v33, %v1343_v34  ;;  %v6653_v49 = vcombine.low %v1084_v35, %v1088_v36 }
 0x24d   : > { %3284 = vmatpush2.bf16.msra.mxu1 %v6707_v28  ;;  %v6654_v28 = vcombine.high %v1084_v35, %v1088_v36 }
 0x24e   : > { %3327 = vmatpush2.bf16.msra.mxu0 %v6835_v43  ;;  %3285 = vmatprep.subr.bf16.mxu1 %v6700_v45  ;;  %v1331_v43 = vld [vmem:[#allocation6 + $0x910] sm:$0xff] }
 0x24f   : > { %3328 = vmatprep.subr.bf16.mxu0 %v6828_v46  ;;  %v1335_v45 = vld [vmem:[#allocation6 + $0x930] sm:$0xff]  ;;  %v1076_v46 = vld [vmem:[#allocation6 + $0x118] sm:$0xff] }
 0x250   : > { %v6900_v50 = vcombine.high %v1331_v43, %v1335_v45  ;;  %v6899_v57 = vcombine.low %v1331_v43, %v1335_v45  ;;  %v6645_v56 = vcombine.low %v1076_v46, %v1080_v47 }
 0x251   : > { %3286 = vmatpush2.bf16.msra.mxu1 %v6699_v51  ;;  %v6646_v51 = vcombine.high %v1076_v46, %v1080_v47 }
 0x252   : > { %3329 = vmatpush2.bf16.msra.mxu0 %v6827_v52  ;;  %3287 = vmatprep.subr.bf16.mxu1 %v6692_v53  ;;  %v1327_v52 = vld [vmem:[#allocation6 + $0x8f0] sm:$0xff]  ;;  %v1068_v53 = vld [vmem:[#allocation6 + $0xd8] sm:$0xff] }
 0x253   : > { %3330 = vmatprep.subr.bf16.mxu0 %v6820_v55  ;;  %v1072_v55 = vld [vmem:[#allocation6 + $0xf8] sm:$0xff] }
 0x254   : > { %v6638_v59 = vcombine.high %v1068_v53, %v1072_v55  ;;  %v6637_v3 = vcombine.low %v1068_v53, %v1072_v55 }
 0x255   : > { %3288 = vmatpush2.bf16.msra.mxu1 %v6691_v61  ;;  %v1315_v61 = vld [vmem:[#allocation6 + $0x890] sm:$0xff] }
 0x256   : > { %3331 = vmatpush2.bf16.msra.mxu0 %v6819_v62  ;;  %3289 = vmatprep.subr.bf16.mxu1 %v6684_v63  ;;  %v1319_v62 = vld [vmem:[#allocation6 + $0x8b0] sm:$0xff]  ;;  %v1060_v63 = vld [vmem:[#allocation6 + $0x98] sm:$0xff] }
 0x257   : > { %3332 = vmatprep.subr.bf16.mxu0 %v6812_v1  ;;  %v1064_v1 = vld [vmem:[#allocation6 + $0xb8] sm:$0xff]  ;;  %v6884_v4 = vcombine.high %v1315_v61, %v1319_v62  ;;  %v6883_v13 = vcombine.low %v1315_v61, %v1319_v62 }
 0x258   : > { %v6630_v7 = vcombine.high %v1060_v63, %v1064_v1  ;;  %v6629_v14 = vcombine.low %v1060_v63, %v1064_v1 }
 0x259   : > { %3290 = vmatpush2.bf16.msra.mxu1 %v6683_v10  ;;  %v1307_v10 = vld [vmem:[#allocation6 + $0x850] sm:$0xff] }
 0x25a   : > { %3333 = vmatpush2.bf16.msra.mxu0 %v6811_v60  ;;  %3291 = vmatprep.subr.bf16.mxu1 %v6676_v11  ;;  %v1311_v60 = vld [vmem:[#allocation6 + $0x870] sm:$0xff]  ;;  %v1052_v11 = vld [vmem:[#allocation6 + $0x58] sm:$0xff] }
 0x25b   : > { %3334 = vmatprep.subr.bf16.mxu0 %v6804_v12  ;;  %v1056_v12 = vld [vmem:[#allocation6 + $0x78] sm:$0xff]  ;;  %v6876_v15 = vcombine.high %v1307_v10, %v1311_v60  ;;  %v6875_v23 = vcombine.low %v1307_v10, %v1311_v60 }
 0x25c   : > { %v6622_v16 = vcombine.high %v1052_v11, %v1056_v12  ;;  %v6621_v24 = vcombine.low %v1052_v11, %v1056_v12  ;;  %v1188_v12 = vld [vmem:[#allocation6 + $0x498] sm:$0xff] }
 0x25d   : > { %3292 = vmatpush2.bf16.msra.mxu1 %v6675_v18  ;;  %v1299_v18 = vld [vmem:[#allocation6 + $0x810] sm:$0xff] }
 0x25e   : > { %3335 = vmatpush2.bf16.msra.mxu0 %v6803_v19  ;;  %3347 = vmatprep.subr.bf16.mxu1 %v6924_v21  ;;  %v1303_v19 = vld [vmem:[#allocation6 + $0x830] sm:$0xff]  ;;  %v1044_v21 = vld [vmem:[#allocation6 + $0x18] sm:$0xff] }
 0x25f   : > { %3390 = vmatprep.subr.bf16.mxu0 %v6670_v22  ;;  %v1048_v22 = vld [vmem:[#allocation6 + $0x38] sm:$0xff]  ;;  %v6868_v25 = vcombine.high %v1299_v18, %v1303_v19  ;;  %v6867_v33 = vcombine.low %v1299_v18, %v1303_v19 }
 0x260   : > { %3294 = vmatmul.mubr.bf16.vlgmr.msra.gmra.mxu1 %v8851_v8  ;;  %v6614_v26 = vcombine.high %v1044_v21, %v1048_v22  ;;  %v6613_v34 = vcombine.low %v1044_v21, %v1048_v22  ;;  %v1180_v22 = vld [vmem:[#allocation6 + $0x458] sm:$0xff] }
 0x261   : > { %3337 = vmatmul.mubr.bf16.vlgmr.msra.gmra.mxu0 %v8854_v9  ;;  %3348 = vmatpush1.bf16.msra.mxu1 %v6923_v27  ;;  %v1228_v27 = vld [vmem:[#allocation6 + $0x5d8] sm:$0xff] }
 0x262   : > { %3391 = vmatpush1.bf16.msra.mxu0 %v6669_v30  ;;  %3422 = vmatprep.mubr.bf16.mxu0 %v8844_v5  ;;  %v1323_v5 = vld [vmem:[#allocation6 + $0x8d0] sm:$0xff]  ;;  %v1232_v30 = vld [vmem:[#allocation6 + $0x5f8] sm:$0xff] }
 0x263   : > { %3349 = vmatprep.subr.bf16.mxu1 %v6916_v31  ;;  %3392 = vmatprep.subr.bf16.mxu0 %v6662_v32  ;;  %v6892_v58 = vcombine.high %v1323_v5, %v1327_v52  ;;  %v6891_v2 = vcombine.low %v1323_v5, %v1327_v52  ;;  %v1164_v31 = vld [vmem:[#allocation6 + $0x3d8] sm:$0xff]  ;;  %v6798_v35 = vcombine.high %v1228_v27, %v1232_v30 }
 0x264   : > { %3379 = vmatprep.mubr.bf16.mxu1 %v8513_v0  ;;  %v1168_v32 = vld [vmem:[#allocation6 + $0x3f8] sm:$0xff]  ;;  %v6797_v43 = vcombine.low %v1228_v27, %v1232_v30 }
 0x265   : > { %3350 = vmatpush1.bf16.msra.mxu1 %v6915_v39  ;;  %v6734_v36 = vcombine.high %v1164_v31, %v1168_v32  ;;  %v1220_v39 = vld [vmem:[#allocation6 + $0x598] sm:$0xff]  ;;  %v6733_v45 = vcombine.low %v1164_v31, %v1168_v32 }
 0x266   : > { %3393 = vmatpush1.bf16.msra.mxu0 %v6661_v41  ;;  %3351 = vmatprep.subr.bf16.mxu1 %v6908_v17  ;;  %v1224_v41 = vld [vmem:[#allocation6 + $0x5b8] sm:$0xff] }
 0x267   : > { %3394 = vmatprep.subr.bf16.mxu0 %v6654_v28  ;;  %v1156_v17 = vld [vmem:[#allocation6 + $0x398] sm:$0xff]  ;;  %v6790_v46 = vcombine.high %v1220_v39, %v1224_v41  ;;  %v6789_v5 = vcombine.low %v1220_v39, %v1224_v41 }
 0x268   : > { %v1160_v28 = vld [vmem:[#allocation6 + $0x3b8] sm:$0xff] }
 0x269   : > { %3352 = vmatpush1.bf16.msra.mxu1 %v6907_v48  ;;  %v6726_v47 = vcombine.high %v1156_v17, %v1160_v28  ;;  %v1212_v48 = vld [vmem:[#allocation6 + $0x558] sm:$0xff]  ;;  %v6725_v52 = vcombine.low %v1156_v17, %v1160_v28 }
 0x26a   : > { %3395 = vmatpush1.bf16.msra.mxu0 %v6653_v49  ;;  %3353 = vmatprep.subr.bf16.mxu1 %v6900_v50  ;;  %v1216_v49 = vld [vmem:[#allocation6 + $0x578] sm:$0xff] }
 0x26b   : > { %3396 = vmatprep.subr.bf16.mxu0 %v6646_v51  ;;  %v1148_v50 = vld [vmem:[#allocation6 + $0x358] sm:$0xff]  ;;  %v6782_v53 = vcombine.high %v1212_v48, %v1216_v49  ;;  %v6781_v61 = vcombine.low %v1212_v48, %v1216_v49 }
 0x26c   : > { %v1152_v51 = vld [vmem:[#allocation6 + $0x378] sm:$0xff] }
 0x26d   : > { %3354 = vmatpush1.bf16.msra.mxu1 %v6899_v57  ;;  %v6718_v55 = vcombine.high %v1148_v50, %v1152_v51  ;;  %v1204_v57 = vld [vmem:[#allocation6 + $0x518] sm:$0xff]  ;;  %v6717_v62 = vcombine.low %v1148_v50, %v1152_v51 }
 0x26e   : > { %3397 = vmatpush1.bf16.msra.mxu0 %v6645_v56  ;;  %3355 = vmatprep.subr.bf16.mxu1 %v6892_v58  ;;  %v1208_v56 = vld [vmem:[#allocation6 + $0x538] sm:$0xff] }
 0x26f   : > { %3398 = vmatprep.subr.bf16.mxu0 %v6638_v59  ;;  %v1140_v58 = vld [vmem:[#allocation6 + $0x318] sm:$0xff]  ;;  %v6774_v63 = vcombine.high %v1204_v57, %v1208_v56 }
 0x270   : > { %v1144_v59 = vld [vmem:[#allocation6 + $0x338] sm:$0xff] }
 0x271   : > { %3356 = vmatpush1.bf16.msra.mxu1 %v6891_v2  ;;  %v6710_v1 = vcombine.high %v1140_v58, %v1144_v59  ;;  %v1200_v2 = vld [vmem:[#allocation6 + $0x4f8] sm:$0xff]  ;;  %v6709_v10 = vcombine.low %v1140_v58, %v1144_v59 }
 0x272   : > { %3399 = vmatpush1.bf16.msra.mxu0 %v6637_v3  ;;  %3357 = vmatprep.subr.bf16.mxu1 %v6884_v4  ;;  %v1132_v3 = vld [vmem:[#allocation6 + $0x2d8] sm:$0xff] }
 0x273   : > { %3400 = vmatprep.subr.bf16.mxu0 %v6630_v7  ;;  %v1136_v4 = vld [vmem:[#allocation6 + $0x2f8] sm:$0xff]  ;;  %v6773_v7 = vcombine.low %v1204_v57, %v1208_v56 }
 0x274   : > { %v6702_v11 = vcombine.high %v1132_v3, %v1136_v4  ;;  %v6701_v18 = vcombine.low %v1132_v3, %v1136_v4  ;;  %v1172_v32 = vld [vmem:[#allocation6 + $0x418] sm:$0xff] }
 0x275   : > { %3358 = vmatpush1.bf16.msra.mxu1 %v6883_v13  ;;  %v1192_v13 = vld [vmem:[#allocation6 + $0x4b8] sm:$0xff] }
 0x276   : > { %3401 = vmatpush1.bf16.msra.mxu0 %v6629_v14  ;;  %3359 = vmatprep.subr.bf16.mxu1 %v6876_v15  ;;  %v1124_v14 = vld [vmem:[#allocation6 + $0x298] sm:$0xff]  ;;  %v6758_v19 = vcombine.high %v1188_v12, %v1192_v13 }
 0x277   : > { %3402 = vmatprep.subr.bf16.mxu0 %v6622_v16  ;;  %v1128_v15 = vld [vmem:[#allocation6 + $0x2b8] sm:$0xff] }
 0x278   : > { %v6694_v21 = vcombine.high %v1124_v14, %v1128_v15  ;;  %v6693_v27 = vcombine.low %v1124_v14, %v1128_v15  ;;  %v1292_v28 = vld [vmem:[#allocation6 + $0x7d8] sm:$0xff] }
 0x279   : > { %3360 = vmatpush1.bf16.msra.mxu1 %v6875_v23  ;;  %v1184_v23 = vld [vmem:[#allocation6 + $0x478] sm:$0xff] }
 0x27a   : > { %3403 = vmatpush1.bf16.msra.mxu0 %v6621_v24  ;;  %3361 = vmatprep.subr.bf16.mxu1 %v6868_v25  ;;  %v1116_v24 = vld [vmem:[#allocation6 + $0x258] sm:$0xff]  ;;  %v6750_v30 = vcombine.high %v1180_v22, %v1184_v23 }
 0x27b   : > { %3404 = vmatprep.subr.bf16.mxu0 %v6614_v26  ;;  %v1120_v25 = vld [vmem:[#allocation6 + $0x278] sm:$0xff]  ;;  %v6757_v26 = vcombine.low %v1188_v12, %v1192_v13 }
 0x27c   : > { %v6686_v31 = vcombine.high %v1116_v24, %v1120_v25  ;;  %v6685_v39 = vcombine.low %v1116_v24, %v1120_v25  ;;  %v1284_v51 = vld [vmem:[#allocation6 + $0x798] sm:$0xff] }
 0x27d   : > { %3362 = vmatpush1.bf16.msra.mxu1 %v6867_v33  ;;  %v1176_v33 = vld [vmem:[#allocation6 + $0x438] sm:$0xff] }
 0x27e   : > { %3405 = vmatpush1.bf16.msra.mxu0 %v6613_v34  ;;  %3433 = vmatprep.subr.bf16.mxu1 %v6798_v35  ;;  %v1108_v34 = vld [vmem:[#allocation6 + $0x218] sm:$0xff]  ;;  %v6742_v41 = vcombine.high %v1172_v32, %v1176_v33 }
 0x27f   : > { %3406 = vmatprep.subr.bf16.mxu0 %v6734_v36  ;;  %v1112_v35 = vld [vmem:[#allocation6 + $0x238] sm:$0xff]  ;;  %v6749_v36 = vcombine.low %v1180_v22, %v1184_v23 }
 0x280   : > { %3380 = vmatmul.mubr.bf16.vlgmr.msra.gmra.mxu1 %v8881_v29  ;;  %v6678_v17 = vcombine.high %v1108_v34, %v1112_v35  ;;  %v6677_v48 = vcombine.low %v1108_v34, %v1112_v35  ;;  %v1276_v59 = vld [vmem:[#allocation6 + $0x758] sm:$0xff] }
 0x281   : > { %3434 = vmatpush1.bf16.msra.mxu1 %v6797_v43  ;;  %3465 = vmatprep.mubr.bf16.mxu1 %v8846_v6  ;;  %v1196_v6 = vld [vmem:[#allocation6 + $0x4d8] sm:$0xff] }
 0x282   : > { %3407 = vmatpush2.bf16.msra.mxu0 %v6733_v45  ;;  %3435 = vmatprep.subr.bf16.mxu1 %v6790_v46  ;;  %v6766_v60 = vcombine.high %v1196_v6, %v1200_v2  ;;  %v6765_v16 = vcombine.low %v1196_v6, %v1200_v2  ;;  %v1296_v43 = vld [vmem:[#allocation6 + $0x7f8] sm:$0xff] }
 0x283   : > { %3408 = vmatprep.subr.bf16.mxu0 %v6726_v47  ;;  %v1356_v45 = vld [vmem:[#allocation6 + $0x9d8] sm:$0xff]  ;;  %v6741_v47 = vcombine.low %v1172_v32, %v1176_v33  ;;  %v6862_v49 = vcombine.high %v1292_v28, %v1296_v43 }
 0x284   : > { %v1360_v46 = vld [vmem:[#allocation6 + $0x9f8] sm:$0xff] }
 0x285   : > { %3436 = vmatpush1.bf16.msra.mxu1 %v6789_v5  ;;  %v6926_v50 = vcombine.high %v1356_v45, %v1360_v46  ;;  %v1288_v5 = vld [vmem:[#allocation6 + $0x7b8] sm:$0xff]  ;;  %v6925_v57 = vcombine.low %v1356_v45, %v1360_v46 }
 0x286   : > { %3409 = vmatpush2.bf16.msra.mxu0 %v6725_v52  ;;  %3437 = vmatprep.subr.bf16.mxu1 %v6782_v53  ;;  %v1348_v52 = vld [vmem:[#allocation6 + $0x998] sm:$0xff]  ;;  %v6854_v56 = vcombine.high %v1284_v51, %v1288_v5 }
 0x287   : > { %3410 = vmatprep.subr.bf16.mxu0 %v6718_v55  ;;  %v1352_v53 = vld [vmem:[#allocation6 + $0x9b8] sm:$0xff]  ;;  %v6861_v55 = vcombine.low %v1292_v28, %v1296_v43 }
 0x288   : > { %v6918_v58 = vcombine.high %v1348_v52, %v1352_v53  ;;  %v6917_v6 = vcombine.low %v1348_v52, %v1352_v53  ;;  %v1268_v4 = vld [vmem:[#allocation6 + $0x718] sm:$0xff] }
 0x289   : > { %3438 = vmatpush1.bf16.msra.mxu1 %v6781_v61  ;;  %v1280_v61 = vld [vmem:[#allocation6 + $0x778] sm:$0xff] }
 0x28a   : > { %3411 = vmatpush2.bf16.msra.mxu0 %v6717_v62  ;;  %3439 = vmatprep.subr.bf16.mxu1 %v6774_v63  ;;  %v1340_v62 = vld [vmem:[#allocation6 + $0x958] sm:$0xff]  ;;  %v6846_v2 = vcombine.high %v1276_v59, %v1280_v61 }
 0x28b   : > { %3412 = vmatprep.subr.bf16.mxu0 %v6710_v1  ;;  %v1344_v63 = vld [vmem:[#allocation6 + $0x978] sm:$0xff]  ;;  %v6853_v1 = vcombine.low %v1284_v51, %v1288_v5 }
 0x28c   : > { %v6910_v3 = vcombine.high %v1340_v62, %v1344_v63  ;;  %v6909_v12 = vcombine.low %v1340_v62, %v1344_v63  ;;  %v1260_v14 = vld [vmem:[#allocation6 + $0x6d8] sm:$0xff] }
 0x28d   : > { %3440 = vmatpush1.bf16.msra.mxu1 %v6773_v7  ;;  %v1272_v7 = vld [vmem:[#allocation6 + $0x738] sm:$0xff] }
 0x28e   : > { %3413 = vmatpush2.bf16.msra.mxu0 %v6709_v10  ;;  %3441 = vmatprep.subr.bf16.mxu1 %v6766_v60  ;;  %v1332_v10 = vld [vmem:[#allocation6 + $0x918] sm:$0xff] }
 0x28f   : > { %3414 = vmatprep.subr.bf16.mxu0 %v6702_v11  ;;  %v1336_v60 = vld [vmem:[#allocation6 + $0x938] sm:$0xff]  ;;  %v6845_v11 = vcombine.low %v1276_v59, %v1280_v61  ;;  %v8903_v61 = vpop.f32.mrf.mxu1 }
 0x290   : > { %v6902_v13 = vcombine.high %v1332_v10, %v1336_v60  ;;  %v1264_v15 = vld [vmem:[#allocation6 + $0x6f8] sm:$0xff] }
 0x291   : > { %3442 = vmatpush1.bf16.msra.mxu1 %v6765_v16  ;;  %v1324_v16 = vld [vmem:[#allocation6 + $0x8d8] sm:$0xff] }
 0x292   : > { %3415 = vmatpush2.bf16.msra.mxu0 %v6701_v18  ;;  %3443 = vmatprep.subr.bf16.mxu1 %v6758_v19  ;;  %v1328_v18 = vld [vmem:[#allocation6 + $0x8f8] sm:$0xff]  ;;  %v6837_v19 = vcombine.low %v1268_v4, %v1272_v7 }
 0x293   : > { %3416 = vmatprep.subr.bf16.mxu0 %v6694_v21  ;;  %v6901_v21 = vcombine.low %v1332_v10, %v1336_v60  ;;  %v6894_v22 = vcombine.high %v1324_v16, %v1328_v18  ;;  %v1252_v23 = vld [vmem:[#allocation6 + $0x698] sm:$0xff] }
 0x294   : > { %v1256_v24 = vld [vmem:[#allocation6 + $0x6b8] sm:$0xff] }
 0x295   : > { %3444 = vmatpush1.bf16.msra.mxu1 %v6757_v26  ;;  %v1316_v25 = vld [vmem:[#allocation6 + $0x898] sm:$0xff] }
 0x296   : > { %3417 = vmatpush2.bf16.msra.mxu0 %v6693_v27  ;;  %3445 = vmatprep.subr.bf16.mxu1 %v6750_v30  ;;  %v1320_v26 = vld [vmem:[#allocation6 + $0x8b8] sm:$0xff]  ;;  %v6829_v27 = vcombine.low %v1260_v14, %v1264_v15  ;;  %v6893_v30 = vcombine.low %v1324_v16, %v1328_v18 }
 0x297   : > { %3418 = vmatprep.subr.bf16.mxu0 %v6686_v31  ;;  %v6822_v31 = vcombine.high %v1252_v23, %v1256_v24  ;;  %v6886_v32 = vcombine.high %v1316_v25, %v1320_v26  ;;  %v1244_v33 = vld [vmem:[#allocation6 + $0x658] sm:$0xff] }
 0x298   : > { %v1248_v34 = vld [vmem:[#allocation6 + $0x678] sm:$0xff] }
 0x299   : > { %3446 = vmatpush1.bf16.msra.mxu1 %v6749_v36  ;;  %v1308_v35 = vld [vmem:[#allocation6 + $0x858] sm:$0xff] }
 0x29a   : > { %3419 = vmatpush2.bf16.msra.mxu0 %v6685_v39  ;;  %3447 = vmatprep.subr.bf16.mxu1 %v6742_v41  ;;  %v1312_v36 = vld [vmem:[#allocation6 + $0x878] sm:$0xff]  ;;  %v6821_v39 = vcombine.low %v1252_v23, %v1256_v24  ;;  %v6885_v41 = vcombine.low %v1316_v25, %v1320_v26 }
 0x29b   : > { %3420 = vmatprep.subr.bf16.mxu0 %v6678_v17  ;;  %v6814_v17 = vcombine.high %v1244_v33, %v1248_v34  ;;  %v6878_v28 = vcombine.high %v1308_v35, %v1312_v36  ;;  %v1236_v43 = vld [vmem:[#allocation6 + $0x618] sm:$0xff] }
 0x29c   : > { %v1240_v45 = vld [vmem:[#allocation6 + $0x638] sm:$0xff] }
 0x29d   : > { %3448 = vmatpush1.bf16.msra.mxu1 %v6741_v47  ;;  %v1300_v46 = vld [vmem:[#allocation6 + $0x818] sm:$0xff]  ;;  %v6805_v5 = vcombine.low %v1236_v43, %v1240_v45 }
 0x29e   : > { %3421 = vmatpush2.bf16.msra.mxu0 %v6677_v48  ;;  %3449 = vmatprep.subr.bf16.mxu1 %v6862_v49  ;;  %v1304_v47 = vld [vmem:[#allocation6 + $0x838] sm:$0xff]  ;;  %v6813_v48 = vcombine.low %v1244_v33, %v1248_v34  ;;  %v6877_v49 = vcombine.low %v1308_v35, %v1312_v36 }
 0x29f   : > { %3476 = vmatprep.subr.bf16.mxu0 %v6926_v50  ;;  %v6806_v50 = vcombine.high %v1236_v43, %v1240_v45  ;;  %v6870_v51 = vcombine.high %v1300_v46, %v1304_v47  ;;  %v6869_v52 = vcombine.low %v1300_v46, %v1304_v47  ;;  %v7519_v53 = vld [vmem:[#allocation9 + $0xe4] ss:$16 sps:$4 sm:$0xff]   ;;  %v7523_v63 = vld [vmem:[#allocation9 + $0xa0] ss:$16 sps:$4 sm:$0xff]  }
 0x2a0   : > { %v7525_v59 = vld [vmem:[#allocation9 + $0xa4] ss:$16 sps:$4 sm:$0xff]  }
 0x2a1   : > { %3423 = vmatmul.mubr.bf16.vlgmr.msra.gmra.mxu0 %v8851_v8  ;;  %3450 = vmatpush2.bf16.msra.mxu1 %v6861_v55  ;;  %v6838_v8 = vcombine.high %v1268_v4, %v1272_v7  ;;  %v7517_v55 = vld [vmem:[#allocation9 + $0xe0] ss:$16 sps:$4 sm:$0xff]   ;;  %v7534_v10 = vld [vmem:[#allocation9 + $0x44] ss:$16 sps:$4 sm:$0xff]  }
 0x2a2   : > { %3477 = vmatpush1.bf16.msra.mxu0 %v6925_v57  ;;  %3451 = vmatprep.subr.bf16.mxu1 %v6854_v56  ;;  %v7522_v57 = vld [vmem:[#allocation9 + $0xc4] ss:$16 sps:$4 sm:$0xff]   ;;  %v7520_v56 = vld [vmem:[#allocation9 + $0xc0] ss:$16 sps:$4 sm:$0xff]  }
 0x2a3   : > { %3478 = vmatprep.subr.bf16.mxu0 %v6918_v58  ;;  %3508 = vmatprep.mubr.bf16.mxu0 %v8513_v0  ;;  %v6830_v0 = vcombine.high %v1260_v14, %v1264_v15  ;;  %v8901_v58 = vpop.f32.mrf.mxu0  ;;  %v7529_v7 = vld [vmem:[#allocation9 + $0x60] ss:$16 sps:$4 sm:$0xff]   ;;  %v7537_v14 = vld [vmem:[#allocation9 + $0x24] ss:$16 sps:$4 sm:$0xff]  }
 0x2a4   : > { %v7535_v15 = vld [vmem:[#allocation9 + $0x20] ss:$16 sps:$4 sm:$0xff]   ;;  %v7543_v24 = vld [vmem:[#allocation9 + $0x1e4] ss:$16 sps:$4 sm:$0xff]  }
 0x2a5   : > { %3452 = vmatpush2.bf16.msra.mxu1 %v6853_v1  ;;  %v8905_v62 = vpop.f32.mrf.mxu0  ;;  %v7528_v1 = vld [vmem:[#allocation9 + $0x84] ss:$16 sps:$4 sm:$0xff]  }
 0x2a6   : > { %3479 = vmatpush1.bf16.msra.mxu0 %v6917_v6  ;;  %3453 = vmatprep.subr.bf16.mxu1 %v6846_v2  ;;  %v8907_v6 = vpop.f32.mrf.mxu1  ;;  %v7549_v43 = vld [vmem:[#allocation9 + $0x1a4] ss:$16 sps:$4 sm:$0xff]  }
 0x2a7   : > { %3480 = vmatprep.subr.bf16.mxu0 %v6910_v3  ;;  %v8909_v2 = vpop.f32.mrf.mxu0 }
 0x2a8   : > { %v8911_v3 = vpop.f32.mrf.mxu1 }
 0x2a9   : > { %3454 = vmatpush2.bf16.msra.mxu1 %v6845_v11  ;;  %v8913_v4 = vpop.f32.mrf.mxu0 }
 0x2aa   : > { %3481 = vmatpush1.bf16.msra.mxu0 %v6909_v12  ;;  %3455 = vmatprep.subr.bf16.mxu1 %v6838_v8  ;;  %v8915_v60 = vpop.f32.mrf.mxu1  ;;  %v7532_v12 = vld [vmem:[#allocation9 + $0x40] ss:$16 sps:$4 sm:$0xff]  }
 0x2ab   : > { %3482 = vmatprep.subr.bf16.mxu0 %v6902_v13  ;;  %v8917_v11 = vpop.f32.mrf.mxu0 }
 0x2ac   : > { %v8919_v8 = vpop.f32.mrf.mxu1 }
 0x2ad   : > { %3456 = vmatpush2.bf16.msra.mxu1 %v6837_v19  ;;  %v7540_v19 = vld [vmem:[#allocation9 + $0x4] ss:$16 sps:$4 sm:$0xff]  }
 0x2ae   : > { %3483 = vmatpush1.bf16.msra.mxu0 %v6901_v21  ;;  %3457 = vmatprep.subr.bf16.mxu1 %v6830_v0  ;;  %v8921_v16 = vpop.f32.mrf.mxu1  ;;  %v7538_v21 = vld [vmem:[#allocation9] ss:$16 sps:$4 sm:$0xff]   ;;  %v8923_v0 = vld [vmem:[#allocation7] sm:$0xff] }
 0x2af   : > { %3484 = vmatprep.subr.bf16.mxu0 %v6894_v22  ;;  %v1374_v25 = vrot.slane %v8923_v0, %v8829_v44  ;;  %v1378_v26 = vrot.slane %v8923_v0, %v8819_v38 }
 0x2b0   : > { %v8925_v22 = vpop.f32.mrf.mxu1 }
 0x2b1   : > { %3458 = vmatpush2.bf16.msra.mxu1 %v6829_v27  ;;  %v7541_v27 = vld [vmem:[#allocation9 + $0x1e0] ss:$16 sps:$4 sm:$0xff]  }
 0x2b2   : > { %3485 = vmatpush1.bf16.msra.mxu0 %v6893_v30  ;;  %3459 = vmatprep.subr.bf16.mxu1 %v6822_v31  ;;  %v8931_v30 = vpop.f32.mrf.mxu1 }
 0x2b3   : > { %3486 = vmatprep.subr.bf16.mxu0 %v6886_v32  ;;  %v7546_v32 = vld [vmem:[#allocation9 + $0x1c4] ss:$16 sps:$4 sm:$0xff]  }
 0x2b5   : > { %3460 = vmatpush2.bf16.msra.mxu1 %v6821_v39 }
 0x2b6   : > { %3487 = vmatpush1.bf16.msra.mxu0 %v6885_v41  ;;  %3461 = vmatprep.subr.bf16.mxu1 %v6814_v17  ;;  %v7544_v41 = vld [vmem:[#allocation9 + $0x1c0] ss:$16 sps:$4 sm:$0xff]  }
 0x2b7   : > { %3488 = vmatprep.subr.bf16.mxu0 %v6878_v28 }
 0x2b9   : > { %3462 = vmatpush2.bf16.msra.mxu1 %v6813_v48 }
 0x2ba   : > { %3489 = vmatpush1.bf16.msra.mxu0 %v6877_v49  ;;  %3463 = vmatprep.subr.bf16.mxu1 %v6806_v50 }
 0x2bb   : > { %3490 = vmatprep.subr.bf16.mxu0 %v6870_v51 }
 0x2bd   : > { %3464 = vmatpush2.bf16.msra.mxu1 %v6805_v5 }
 0x2be   : > { %3491 = vmatpush1.bf16.msra.mxu0 %v6869_v52  ;;  %4285 = vmatprep.subr.bf16.mxu1 %v7519_v53  ;;  %v7547_v52 = vld [vmem:[#allocation9 + $0x1a0] ss:$16 sps:$4 sm:$0xff]  }
 0x2c0   : > { %3466 = vmatmul.mubr.bf16.vlgmr.msra.gmra.mxu1 %v8854_v9  ;;  %v7526_v9 = vld [vmem:[#allocation9 + $0x80] ss:$16 sps:$4 sm:$0xff]  }
 0x2c1   : > { %3509 = vmatmul.mubr.bf16.vlgmr.msra.gmra.mxu0 %v8881_v29  ;;  %4286 = vmatpush1.bf16.msra.mxu1 %v7517_v55  ;;  %v7531_v29 = vld [vmem:[#allocation9 + $0x64] ss:$16 sps:$4 sm:$0xff]   ;;  %v3166_v13 = vpop.f32.mrf.mxu0 }
 0x2c2   : > { %4287 = vmatprep.subr.bf16.mxu1 %v7522_v57  ;;  %v3167_v33 = vadd.f32 %v3166_v13, %v1374_v25  ;;  %v7552_v55 = vld [vmem:[#allocation9 + $0x184] ss:$16 sps:$4 sm:$0xff]   ;;  %v7556_v13 = vld [vmem:[#allocation9 + $0x140] ss:$16 sps:$4 sm:$0xff]  }
 0x2c3   : > { %v3168_v18 = vpop.f32.mrf.mxu0 }
 0x2c4   : > { %v3169_v36 = vadd.f32 %v3168_v18, %v1378_v26  ;;  %v7564_v18 = vld [vmem:[#allocation9 + $0x104] ss:$16 sps:$4 sm:$0xff]  }
 0x2c5   : > { %4288 = vmatpush1.bf16.msra.mxu1 %v7520_v56  ;;  %v3170_v23 = vpop.f32.mrf.mxu0 }
 0x2c6   : > { %4289 = vmatprep.subr.bf16.mxu1 %v7525_v59  ;;  %v3171_v45 = vadd.f32 %v3170_v23, %v1374_v25  ;;  %v7573_v23 = vld [vmem:[#allocation9 + $0x2c4] ss:$16 sps:$4 sm:$0xff]  }
 0x2c7   : > { %v3172_v31 = vpop.f32.mrf.mxu0  ;;  %v7579_v25 = vld [vmem:[#allocation9 + $0x2a4] ss:$16 sps:$4 sm:$0xff]  }
 0x2c8   : > { %v3173_v50 = vadd.f32 %v3172_v31, %v1378_v26  ;;  %v7577_v26 = vld [vmem:[#allocation9 + $0x2a0] ss:$16 sps:$4 sm:$0xff]  }
 0x2c9   : > { %4290 = vmatpush1.bf16.msra.mxu1 %v7523_v63  ;;  %v7583_v31 = vld [vmem:[#allocation9 + $0x280] ss:$16 sps:$4 sm:$0xff]  }
 0x2ca   : > { %4291 = vmatprep.subr.bf16.mxu1 %v7528_v1  ;;  %v7550_v1 = vld [vmem:[#allocation9 + $0x180] ss:$16 sps:$4 sm:$0xff]  }
 0x2cd   : > { %4292 = vmatpush1.bf16.msra.mxu1 %v7526_v9  ;;  %v7555_v9 = vld [vmem:[#allocation9 + $0x164] ss:$16 sps:$4 sm:$0xff]  }
 0x2ce   : > { %4293 = vmatprep.subr.bf16.mxu1 %v7531_v29  ;;  %v7553_v29 = vld [vmem:[#allocation9 + $0x160] ss:$16 sps:$4 sm:$0xff]  }
 0x2d1   : > { %4294 = vmatpush1.bf16.msra.mxu1 %v7529_v7  ;;  %v7558_v7 = vld [vmem:[#allocation9 + $0x144] ss:$16 sps:$4 sm:$0xff]  }
 0x2d2   : > { %4295 = vmatprep.subr.bf16.mxu1 %v7534_v10  ;;  %v7565_v10 = vld [vmem:[#allocation9 + $0x2e0] ss:$16 sps:$4 sm:$0xff]  }
 0x2d5   : > { %4296 = vmatpush1.bf16.msra.mxu1 %v7532_v12  ;;  %v7567_v12 = vld [vmem:[#allocation9 + $0x2e4] ss:$16 sps:$4 sm:$0xff]  }
 0x2d6   : > { %4297 = vmatprep.subr.bf16.mxu1 %v7537_v14  ;;  %4328 = vmatprep.subr.bf16.mxu0 %v7567_v12  ;;  %v7561_v14 = vld [vmem:[#allocation9 + $0x124] ss:$16 sps:$4 sm:$0xff]  }
 0x2d7   : > { %4329 = vmatpush1.bf16.msra.mxu0 %v7565_v10 }
 0x2d8   : > { %4330 = vmatprep.subr.bf16.mxu0 %v7573_v23 }
 0x2d9   : > { %4298 = vmatpush1.bf16.msra.mxu1 %v7535_v15  ;;  %v7559_v15 = vld [vmem:[#allocation9 + $0x120] ss:$16 sps:$4 sm:$0xff]  }
 0x2da   : > { %4299 = vmatprep.subr.bf16.mxu1 %v7540_v19  ;;  %v7562_v19 = vld [vmem:[#allocation9 + $0x100] ss:$16 sps:$4 sm:$0xff]  }
 0x2dd   : > { %4300 = vmatpush1.bf16.msra.mxu1 %v7538_v21  ;;  %v7570_v21 = vld [vmem:[#allocation9 + $0x2ec] ss:$16 sps:$4 sm:$0xff]  }
 0x2de   : > { %4301 = vmatprep.subr.bf16.mxu1 %v7543_v24  ;;  %v7571_v24 = vld [vmem:[#allocation9 + $0x2c0] ss:$16 sps:$4 sm:$0xff]  }
 0x2df   : > { %4331 = vmatpush1.bf16.msra.mxu0 %v7571_v24 }
 0x2e0   : > { %v3209_v34 = vpop.f32.mrf.mxu1  ;;  %4332 = vmatprep.subr.bf16.mxu0 %v7579_v25 }
 0x2e1   : > { %v3252_v35 = vpop.f32.mrf.mxu0  ;;  %v3210_v39 = vadd.f32 %v3209_v34, %v3167_v33  ;;  %4302 = vmatpush2.bf16.msra.mxu1 %v7541_v27  ;;  %v7585_v27 = vld [vmem:[#allocation9 + $0x284] ss:$16 sps:$4 sm:$0xff]   ;;  %v7589_v33 = vld [vmem:[#allocation9 + $0x260] ss:$16 sps:$4 sm:$0xff]  }
 0x2e2   : > { %v3211_v17 = vpop.f32.mrf.mxu1  ;;  %4303 = vmatprep.subr.bf16.mxu1 %v7546_v32  ;;  %v7591_v32 = vld [vmem:[#allocation9 + $0x264] ss:$16 sps:$4 sm:$0xff]  }
 0x2e3   : > { %v3254_v28 = vpop.f32.mrf.mxu0  ;;  %v8933_v46 = vadd.f32 %v3252_v35, %v3210_v39  ;;  %v3212_v47 = vadd.f32 %v3211_v17, %v3169_v36  ;;  %4333 = vmatpush1.bf16.msra.mxu0 %v7577_v26  ;;  %v7597_v34 = vld [vmem:[#allocation9 + $0x244] ss:$16 sps:$4 sm:$0xff]   ;;  %v7595_v35 = vld [vmem:[#allocation9 + $0x240] ss:$16 sps:$4 sm:$0xff]  }
 0x2e4   : > { %v3213_v48 = vpop.f32.mrf.mxu1  ;;  %4334 = vmatprep.subr.bf16.mxu0 %v7585_v27  ;;  %v7603_v36 = vld [vmem:[#allocation9 + $0x224] ss:$16 sps:$4 sm:$0xff]   ;;  %v7601_v39 = vld [vmem:[#allocation9 + $0x220] ss:$16 sps:$4 sm:$0xff]  }
 0x2e5   : > { %v3256_v49 = vpop.f32.mrf.mxu0  ;;  %v8935_v51 = vadd.f32 %v3254_v28, %v3212_v47  ;;  %v3214_v5 = vadd.f32 %v3213_v48, %v3171_v45  ;;  %4304 = vmatpush2.bf16.msra.mxu1 %v7544_v41  ;;  %v7609_v41 = vld [vmem:[#allocation9 + $0x204] ss:$16 sps:$4 sm:$0xff]   ;;  %v7607_v17 = vld [vmem:[#allocation9 + $0x200] ss:$16 sps:$4 sm:$0xff]  }
 0x2e6   : > { %v3215_v53 = vpop.f32.mrf.mxu1  ;;  %4305 = vmatprep.subr.bf16.mxu1 %v7549_v43  ;;  %v7613_v28 = vld [vmem:[#allocation9 + $0x360] ss:$16 sps:$4 sm:$0xff]   ;;  %v7615_v43 = vld [vmem:[#allocation9 + $0x364] ss:$16 sps:$4 sm:$0xff]  }
 0x2e7   : > { %v8937_v57 = vadd.f32 %v3256_v49, %v3214_v5  ;;  %v3216_v56 = vadd.f32 %v3215_v53, %v3173_v50  ;;  %v3258_v59 = vpop.f32.mrf.mxu0  ;;  %4335 = vmatpush1.bf16.msra.mxu0 %v7583_v31  ;;  %v7621_v45 = vld [vmem:[#allocation9 + $0x344] ss:$16 sps:$4 sm:$0xff]   ;;  %v7619_v47 = vld [vmem:[#allocation9 + $0x340] ss:$16 sps:$4 sm:$0xff]  }
 0x2e8   : > { %4336 = vmatprep.subr.bf16.mxu0 %v7591_v32  ;;  %v7627_v48 = vld [vmem:[#allocation9 + $0x324] ss:$16 sps:$4 sm:$0xff]   ;;  %v7625_v49 = vld [vmem:[#allocation9 + $0x320] ss:$16 sps:$4 sm:$0xff]  }
 0x2e9   : > { %v8939_v63 = vadd.f32 %v3258_v59, %v3216_v56  ;;  %4306 = vmatpush2.bf16.msra.mxu1 %v7547_v52  ;;  %v7633_v50 = vld [vmem:[#allocation9 + $0x304] ss:$16 sps:$4 sm:$0xff]   ;;  %v7631_v5 = vld [vmem:[#allocation9 + $0x300] ss:$16 sps:$4 sm:$0xff]   ;;  %v7639_v52 = vld [vmem:[#allocation9 + $0xec] ss:$16 sps:$4 sm:$0xff]   ;;  %v1382_v59 = vrot.slane %v8923_v0, %v792_v54 }
 0x2ea   : > { %4307 = vmatprep.subr.bf16.mxu1 %v7552_v55  ;;  %v796_v56 = vsub.s32 5, %v8816_v37 }
 0x2eb   : > { %4337 = vmatpush1.bf16.msra.mxu0 %v7589_v33 }
 0x2ec   : > { %4338 = vmatprep.subr.bf16.mxu0 %v7597_v34 }
 0x2ed   : > { %4308 = vmatpush2.bf16.msra.mxu1 %v7550_v1 }
 0x2ee   : > { %4309 = vmatprep.subr.bf16.mxu1 %v7555_v9  ;;  %v1386_v9 = vrot.slane %v8923_v0, %v796_v56 }
 0x2ef   : > { %4339 = vmatpush1.bf16.msra.mxu0 %v7595_v35 }
 0x2f0   : > { %4340 = vmatprep.subr.bf16.mxu0 %v7603_v36 }
 0x2f1   : > { %4310 = vmatpush2.bf16.msra.mxu1 %v7553_v29 }
 0x2f2   : > { %4311 = vmatprep.subr.bf16.mxu1 %v7558_v7 }
 0x2f3   : > { %4341 = vmatpush1.bf16.msra.mxu0 %v7601_v39  ;;  %v1370_v39 = vrot.slane %v8923_v0, %v8822_v40 }
 0x2f4   : > { %4342 = vmatprep.subr.bf16.mxu0 %v7609_v41 }
 0x2f5   : > { %4312 = vmatpush2.bf16.msra.mxu1 %v7556_v13 }
 0x2f6   : > { %4313 = vmatprep.subr.bf16.mxu1 %v7561_v14 }
 0x2f7   : > { %4343 = vmatpush1.bf16.msra.mxu0 %v7607_v17 }
 0x2f8   : > { %4352 = vmatprep.subr.bf16.mxu0 %v7615_v43  ;;  %v1366_v43 = vrot.slane %v8923_v0, %v8826_v42 }
 0x2f9   : > { %4314 = vmatpush2.bf16.msra.mxu1 %v7559_v15 }
 0x2fa   : > { %4315 = vmatprep.subr.bf16.mxu1 %v7564_v18 }
 0x2fb   : > { %4353 = vmatpush2.bf16.msra.mxu0 %v7613_v28 }
 0x2fc   : > { %4354 = vmatprep.subr.bf16.mxu0 %v7621_v45  ;;  %v3040_v45 = vadd.f32 %v8907_v6, %v1370_v39 }
 0x2fd   : > { %4316 = vmatpush2.bf16.msra.mxu1 %v7562_v19 }
 0x2fe   : > { %4414 = vmatprep.subr.bf16.mxu1 %v7570_v21 }
 0x2ff   : > { %4355 = vmatpush2.bf16.msra.mxu0 %v7619_v47  ;;  %v3042_v47 = vadd.f32 %v8911_v3, %v1366_v43 }
 0x300   : > { %4356 = vmatprep.subr.bf16.mxu0 %v7627_v48  ;;  %v3044_v48 = vadd.f32 %v8915_v60, %v1370_v39 }
 0x303   : > { %4357 = vmatpush2.bf16.msra.mxu0 %v7625_v49  ;;  %v3083_v49 = vadd.f32 %v8909_v2, %v3040_v45 }
 0x304   : > { %4358 = vmatprep.subr.bf16.mxu0 %v7633_v50  ;;  %v3085_v50 = vadd.f32 %v8913_v4, %v3042_v47 }
 0x307   : > { %4359 = vmatpush2.bf16.msra.mxu0 %v7631_v5  ;;  %v3087_v5 = vadd.f32 %v8917_v11, %v3044_v48  ;;  %v7598_v48 = vld [vmem:[#allocation9 + $0x248] ss:$16 sps:$4 sm:$0xff]  }
 0x308   : > { %4371 = vmatprep.subr.bf16.mxu0 %v7639_v52  ;;  %v3126_v52 = vadd.f32 %v8921_v16, %v3083_v49 }
 0x309   : > { %v3130_v6 = vadd.f32 %v8931_v30, %v3087_v5 }
 0x320   : > { %v3295_v53 = vpop.f32.mrf.mxu1 }
 0x321   : > { %v3338_v1 = vpop.f32.mrf.mxu0  ;;  %v3296_v7 = vadd.f32 %v3295_v53, %v1382_v59  ;;  %v3038_v53 = vadd.f32 %v8903_v61, %v1366_v43 }
 0x322   : > { %v3297_v55 = vpop.f32.mrf.mxu1 }
 0x323   : > { %v3340_v10 = vpop.f32.mrf.mxu0  ;;  %v3298_v12 = vadd.f32 %v3297_v55, %v1386_v9  ;;  %v3339_v14 = vadd.f32 %v3338_v1, %v3296_v7  ;;  %v3128_v55 = vadd.f32 %v8925_v22, %v3085_v50  ;;  %v3081_v60 = vadd.f32 %v8905_v62, %v3038_v53  ;;  %v7606_v50 = vld [vmem:[#allocation9 + $0x22c] ss:$16 sps:$4 sm:$0xff]  }
 0x324   : > { %v3299_v29 = vpop.f32.mrf.mxu1 }
 0x325   : > { %v3300_v15 = vadd.f32 %v3299_v29, %v1382_v59  ;;  %v3342_v18 = vpop.f32.mrf.mxu0  ;;  %v3341_v21 = vadd.f32 %v3340_v10, %v3298_v12  ;;  %v3124_v16 = vadd.f32 %v8919_v8, %v3081_v60  ;;  %v7568_v8 = vld [vmem:[#allocation9 + $0x2e8] ss:$16 sps:$4 sm:$0xff]  }
 0x326   : > { %v3301_v13 = vpop.f32.mrf.mxu1 }
 0x327   : > { %v3302_v23 = vadd.f32 %v3301_v13, %v1386_v9  ;;  %v3343_v26 = vadd.f32 %v3342_v18, %v3300_v15  ;;  %v3344_v31 = vpop.f32.mrf.mxu0 }
 0x329   : > { %v3345_v33 = vadd.f32 %v3344_v31, %v3302_v23  ;;  %v7588_v31 = vld [vmem:[#allocation9 + $0x28c] ss:$16 sps:$4 sm:$0xff]  }
 0x340   : > { %v3381_v19 = vpop.f32.mrf.mxu1 }
 0x341   : > { %v3382_v24 = vadd.f32 %v3381_v19, %v3339_v14 }
 0x342   : > { %v3383_v25 = vpop.f32.mrf.mxu1 }
 0x343   : > { %v6927_v54 = vmul.f32 -1.442695, %v3382_v24  ;;  %v3384_v27 = vadd.f32 %v3383_v25, %v3341_v21  ;;  %v7576_v24 = vld [vmem:[#allocation9 + $0x2cc] ss:$16 sps:$4 sm:$0xff]   ;;  %v7574_v25 = vld [vmem:[#allocation9 + $0x2c8] ss:$16 sps:$4 sm:$0xff]  }
 0x344   : > { %v3385_v32 = vpop.f32.mrf.mxu1 }
 0x345   : > { %v6928_v34 = vmul.f32 -1.442695, %v3384_v27  ;;  %v3386_v35 = vadd.f32 %v3385_v32, %v3343_v26  ;;  %7973 = vpow2.f32 %v6927_v54  ;;  %v7582_v26 = vld [vmem:[#allocation9 + $0x2ac] ss:$16 sps:$4 sm:$0xff]   ;;  %v7580_v27 = vld [vmem:[#allocation9 + $0x2a8] ss:$16 sps:$4 sm:$0xff]  }
 0x346   : > { %v3387_v36 = vpop.f32.mrf.mxu1  ;;  %v1389_v32 = vsub.s32 6, %v8816_v37 }
 0x347   : > { %7975 = vpow2.f32 %v6928_v34  ;;  %v6931_v41 = vmul.f32 -1.442695, %v3386_v35  ;;  %v3388_v17 = vadd.f32 %v3387_v36, %v3345_v33  ;;  %v7586_v34 = vld [vmem:[#allocation9 + $0x288] ss:$16 sps:$4 sm:$0xff]   ;;  %v7594_v35 = vld [vmem:[#allocation9 + $0x26c] ss:$16 sps:$4 sm:$0xff]  }
 0x348   : > { %v1393_v36 = vsub.s32 7, %v8816_v37  ;;  %v1390_v39 = vrot.slane %v8923_v0, %v1389_v32  ;;  %v5907_v37 = vld [vmem:[#allocation18] sm:$0x3] }
 0x349   : > { %7977 = vpow2.f32 %v6931_v41  ;;  %v6932_v28 = vmul.f32 -1.442695, %v3388_v17  ;;  %v7592_v17 = vld [vmem:[#allocation9 + $0x268] ss:$16 sps:$4 sm:$0xff]  }
 0x34a   : > { %v1394_v43 = vrot.slane %v8923_v0, %v1393_v36  ;;  %v7612_v0 = vld [vmem:[#allocation9 + $0x20c] ss:$16 sps:$4 sm:$0xff]  }
 0x34b   : > { %7979 = vpow2.f32 %v6932_v28  ;;  %v7600_v28 = vld [vmem:[#allocation9 + $0x24c] ss:$16 sps:$4 sm:$0xff]  }
 0x34c   : > { %7981 = vtanh.f32 %v3126_v52 }
 0x34d   : > { %7983 = vtanh.f32 %v3128_v55 }
 0x34e   : > { %7985 = vtanh.f32 %v3130_v6 }
 0x352   : > { %v7974_v59 = vpop.eup %7973 }
 0x353   : > { %v3551_v2 = vadd.f32 1.0, %v7974_v59 }
 0x354   : > { %v7976_v1 = vpop.eup %7975 }
 0x355   : > { %v3552_v3 = vadd.f32 1.0, %v7976_v1 }
 0x356   : > { %v7978_v9 = vpop.eup %7977 }
 0x357   : > { %v3555_v4 = vadd.f32 1.0, %v7978_v9  ;;  %7987 = vrcp.f32 %v3552_v3  ;;  %v7604_v9 = vld [vmem:[#allocation9 + $0x228] ss:$16 sps:$4 sm:$0xff]  }
 0x358   : > { %v7980_v11 = vpop.eup %7979 }
 0x359   : > { %7989 = vrcp.f32 %v3555_v4  ;;  %v3556_v61 = vadd.f32 1.0, %v7980_v11  ;;  %v7982_v22 = vpop.eup %7981 }
 0x35a   : > { %7991 = vrcp.f32 %v3551_v2  ;;  %v7984_v30 = vpop.eup %7983 }
 0x35b   : > { %7993 = vrcp.f32 %v3556_v61  ;;  %v7986_v29 = vpop.eup %7985 }
 0x35c   : > { %7995 = vtanh.f32 %v3124_v16 }
 0x361   : > { %v3424_v54 = vpop.f32.mrf.mxu0 }
 0x362   : > { %v3425_v45 = vadd.f32 %v3424_v54, %v1390_v39  ;;  %v7636_v54 = vld [vmem:[#allocation9 + $0x30c] ss:$16 sps:$4 sm:$0xff]  }
 0x363   : > { %v3426_v33 = vpop.f32.mrf.mxu0 }
 0x364   : > { %v7988_v7 = vpop.eup %7987  ;;  %v3427_v5 = vadd.f32 %v3426_v33, %v1394_v43  ;;  %v7634_v33 = vld [vmem:[#allocation9 + $0x308] ss:$16 sps:$4 sm:$0xff]  }
 0x365   : > { %v3576_v15 = vmul.f32 %v7988_v7, %v7982_v22  ;;  %v3428_v41 = vpop.f32.mrf.mxu0 }
 0x366   : > { %v7990_v10 = vpop.eup %7989  ;;  %v3429_v59 = vadd.f32 %v3428_v41, %v1390_v39 }
 0x367   : > { %v7992_v12 = vpop.eup %7991  ;;  %v3579_v13 = vmul.f32 %v7990_v10, %v7984_v30  ;;  %v3430_v47 = vpop.f32.mrf.mxu0  ;;  %v7610_v10 = vld [vmem:[#allocation9 + $0x208] ss:$16 sps:$4 sm:$0xff]  }
 0x368   : > { %v7994_v62 = vpop.eup %7993  ;;  %v3431_v2 = vadd.f32 %v3430_v47, %v1394_v43 }
 0x369   : > { %v7996_v14 = vpop.eup %7995  ;;  %v3580_v18 = vmul.f32 %v7994_v62, %v7986_v29  ;;  %v7618_v62 = vld [vmem:[#allocation9 + $0x36c] ss:$16 sps:$4 sm:$0xff]  }
 0x36a   : > { %v3575_v19 = vmul.f32 %v7996_v14, %v7992_v12 }
 0x36b   : > { %v8964_v21 = vpack.c.bf16 %v3580_v18, %v3576_v15  ;;  %v7616_v18 = vld [vmem:[#allocation9 + $0x368] ss:$16 sps:$4 sm:$0xff]  }
 0x36c   : > { %v8966_v23 = vpack.c.bf16 %v3579_v13, %v3575_v19  ;;  %v7624_v19 = vld [vmem:[#allocation9 + $0x34c] ss:$16 sps:$4 sm:$0xff]  }
 0x36d   : > { %4317 = vmatprep.mubr.bf16.mxu1 %v8964_v21 }
 0x36e   : > { %4318 = vmatmul.mubr.bf16.vlgmr.msra.gmra.mxu1 %v8966_v23 }
 0x36f   : > { %4415 = vmatpush1.bf16.msra.mxu1 %v7568_v8  ;;  %v7622_v8 = vld [vmem:[#allocation9 + $0x348] ss:$16 sps:$4 sm:$0xff]  }
 0x370   : > { %4416 = vmatprep.subr.bf16.mxu1 %v7576_v24  ;;  %v7630_v24 = vld [vmem:[#allocation9 + $0x32c] ss:$16 sps:$4 sm:$0xff]  }
 0x373   : > { %4417 = vmatpush1.bf16.msra.mxu1 %v7574_v25  ;;  %v7628_v25 = vld [vmem:[#allocation9 + $0x328] ss:$16 sps:$4 sm:$0xff]  }
 0x374   : > { %4418 = vmatprep.subr.bf16.mxu1 %v7582_v26 }
 0x377   : > { %4419 = vmatpush1.bf16.msra.mxu1 %v7580_v27 }
 0x378   : > { %4420 = vmatprep.subr.bf16.mxu1 %v7588_v31 }
 0x37b   : > { %4421 = vmatpush1.bf16.msra.mxu1 %v7586_v34 }
 0x37c   : > { %4422 = vmatprep.subr.bf16.mxu1 %v7594_v35 }
 0x37f   : > { %4423 = vmatpush1.bf16.msra.mxu1 %v7592_v17 }
 0x380   : > { %v3467_v49 = vpop.f32.mrf.mxu1  ;;  %4424 = vmatprep.subr.bf16.mxu1 %v7600_v28 }
 0x381   : > { %v3468_v52 = vadd.f32 %v3467_v49, %v3425_v45  ;;  %v3510_v53 = vpop.f32.mrf.mxu0 }
 0x382   : > { %v3469_v55 = vpop.f32.mrf.mxu1 }
 0x383   : > { %v3511_v6 = vadd.f32 %v3510_v53, %v3468_v52  ;;  %v3470_v1 = vadd.f32 %v3469_v55, %v3427_v5  ;;  %v3512_v3 = vpop.f32.mrf.mxu0  ;;  %4425 = vmatpush1.bf16.msra.mxu1 %v7598_v48  ;;  %v7637_v53 = vld [vmem:[#allocation9 + $0xe8] ss:$16 sps:$4 sm:$0xff]   ;;  %v7642_v55 = vld [vmem:[#allocation9 + $0xcc] ss:$16 sps:$4 sm:$0xff]  }
 0x384   : > { %v3471_v60 = vpop.f32.mrf.mxu1  ;;  %4426 = vmatprep.subr.bf16.mxu1 %v7606_v50 }
 0x385   : > { %v6929_v4 = vmul.f32 -1.442695, %v3511_v6  ;;  %v3513_v11 = vadd.f32 %v3512_v3, %v3470_v1  ;;  %v3472_v16 = vadd.f32 %v3471_v60, %v3429_v59  ;;  %v3514_v61 = vpop.f32.mrf.mxu0  ;;  %v7645_v59 = vld [vmem:[#allocation9 + $0xac] ss:$16 sps:$4 sm:$0xff]   ;;  %v7643_v6 = vld [vmem:[#allocation9 + $0xa8] ss:$16 sps:$4 sm:$0xff]  }
 0x386   : > { %v3473_v22 = vpop.f32.mrf.mxu1  ;;  %v7685_v1 = vld [vmem:[#allocation12 + $0xe0] ss:$16 sps:$4 sm:$0xff]   ;;  %v7687_v3 = vld [vmem:[#allocation12 + $0xe4] ss:$16 sps:$4 sm:$0xff]  }
 0x387   : > { %7997 = vpow2.f32 %v6929_v4  ;;  %v6930_v30 = vmul.f32 -1.442695, %v3513_v11  ;;  %v3515_v29 = vadd.f32 %v3514_v61, %v3472_v16  ;;  %v3474_v7 = vadd.f32 %v3473_v22, %v3431_v2  ;;  %4427 = vmatpush1.bf16.msra.mxu1 %v7604_v9  ;;  %v3516_v12 = vpop.f32.mrf.mxu0  ;;  %v7648_v9 = vld [vmem:[#allocation9 + $0x8c] ss:$16 sps:$4 sm:$0xff]   ;;  %v7690_v60 = vld [vmem:[#allocation12 + $0xc4] ss:$16 sps:$4 sm:$0xff]  }
 0x388   : > { %4428 = vmatprep.subr.bf16.mxu1 %v7612_v0  ;;  %v7688_v0 = vld [vmem:[#allocation12 + $0xc0] ss:$16 sps:$4 sm:$0xff]   ;;  %v7646_v2 = vld [vmem:[#allocation9 + $0x88] ss:$16 sps:$4 sm:$0xff]   ;;  %v7651_v11 = vld [vmem:[#allocation9 + $0x6c] ss:$16 sps:$4 sm:$0xff]  }
 0x389   : > { %7999 = vpow2.f32 %v6930_v30  ;;  %v6933_v13 = vmul.f32 -1.442695, %v3515_v29  ;;  %v3517_v14 = vadd.f32 %v3516_v12, %v3474_v7  ;;  %v7693_v4 = vld [vmem:[#allocation12 + $0xa4] ss:$16 sps:$4 sm:$0xff]   ;;  %v7654_v22 = vld [vmem:[#allocation9 + $0x4c] ss:$16 sps:$4 sm:$0xff]  }
 0x38a   : > { %v7649_v16 = vld [vmem:[#allocation9 + $0x68] ss:$16 sps:$4 sm:$0xff]   ;;  %v7694_v30 = vld [vmem:[#allocation12 + $0x80] ss:$16 sps:$4 sm:$0xff]  }
 0x38b   : > { %8001 = vpow2.f32 %v6933_v13  ;;  %v6934_v15 = vmul.f32 -1.442695, %v3517_v14  ;;  %4429 = vmatpush1.bf16.msra.mxu1 %v7610_v10  ;;  %v7696_v61 = vld [vmem:[#allocation12 + $0x84] ss:$16 sps:$4 sm:$0xff]   ;;  %v7657_v10 = vld [vmem:[#allocation9 + $0x2c] ss:$16 sps:$4 sm:$0xff]  }
 0x38c   : > { %4438 = vmatprep.subr.bf16.mxu1 %v7618_v62  ;;  %v7652_v29 = vld [vmem:[#allocation9 + $0x48] ss:$16 sps:$4 sm:$0xff]   ;;  %v7697_v12 = vld [vmem:[#allocation12 + $0x60] ss:$16 sps:$4 sm:$0xff]   ;;  %v7660_v14 = vld [vmem:[#allocation9 + $0xc] ss:$16 sps:$4 sm:$0xff]  }
 0x38d   : > { %8003 = vpow2.f32 %v6934_v15  ;;  %v7699_v7 = vld [vmem:[#allocation12 + $0x64] ss:$16 sps:$4 sm:$0xff]   ;;  %v7700_v15 = vld [vmem:[#allocation12 + $0x40] ss:$16 sps:$4 sm:$0xff]  }
 0x38e   : > { %8005 = vtanh.f32 %v8933_v46  ;;  %v7655_v62 = vld [vmem:[#allocation9 + $0x28] ss:$16 sps:$4 sm:$0xff]  }
 0x38f   : > { %4439 = vmatpush2.bf16.msra.mxu1 %v7616_v18  ;;  %8007 = vtanh.f32 %v8935_v51  ;;  %v7702_v13 = vld [vmem:[#allocation12 + $0x44] ss:$16 sps:$4 sm:$0xff]  }
 0x390   : > { %4440 = vmatprep.subr.bf16.mxu1 %v7624_v19  ;;  %8009 = vtanh.f32 %v8937_v57  ;;  %v7658_v18 = vld [vmem:[#allocation9 + $0x8] ss:$16 sps:$4 sm:$0xff]  }
 0x391   : > { %v7705_v19 = vld [vmem:[#allocation12 + $0x24] ss:$16 sps:$4 sm:$0xff]  }
 0x393   : > { %4441 = vmatpush2.bf16.msra.mxu1 %v7622_v8  ;;  %v7663_v8 = vld [vmem:[#allocation9 + $0x1ec] ss:$16 sps:$4 sm:$0xff]  }
 0x394   : > { %v7998_v26 = vpop.eup %7997  ;;  %4442 = vmatprep.subr.bf16.mxu1 %v7630_v24  ;;  %v7703_v24 = vld [vmem:[#allocation12 + $0x20] ss:$16 sps:$4 sm:$0xff]  }
 0x395   : > { %v3553_v27 = vadd.f32 1.0, %v7998_v26  ;;  %v7708_v26 = vld [vmem:[#allocation12 + $0x4] ss:$16 sps:$4 sm:$0xff]  }
 0x396   : > { %v8000_v31 = vpop.eup %7999 }
 0x397   : > { %v3554_v32 = vadd.f32 1.0, %v8000_v31  ;;  %4443 = vmatpush2.bf16.msra.mxu1 %v7628_v25  ;;  %8011 = vrcp.f32 %v3553_v27  ;;  %v7661_v25 = vld [vmem:[#allocation9 + $0x1e8] ss:$16 sps:$4 sm:$0xff]   ;;  %v7706_v27 = vld [vmem:[#allocation12] ss:$16 sps:$4 sm:$0xff]  }
 0x398   : > { %v8002_v34 = vpop.eup %8001  ;;  %4444 = vmatprep.subr.bf16.mxu1 %v7636_v54  ;;  %v7666_v54 = vld [vmem:[#allocation9 + $0x1cc] ss:$16 sps:$4 sm:$0xff]   ;;  %v7664_v31 = vld [vmem:[#allocation9 + $0x1c8] ss:$16 sps:$4 sm:$0xff]  }
 0x399   : > { %v3557_v35 = vadd.f32 1.0, %v8002_v34  ;;  %8013 = vrcp.f32 %v3554_v32  ;;  %v7711_v32 = vld [vmem:[#allocation12 + $0x1e4] ss:$16 sps:$4 sm:$0xff]   ;;  %v7709_v34 = vld [vmem:[#allocation12 + $0x1e0] ss:$16 sps:$4 sm:$0xff]  }
 0x39a   : > { %v8004_v36 = vpop.eup %8003 }
 0x39b   : > { %8015 = vrcp.f32 %v3557_v35  ;;  %v3558_v39 = vadd.f32 1.0, %v8004_v36  ;;  %4445 = vmatpush2.bf16.msra.mxu1 %v7634_v33  ;;  %v8006_v46 = vpop.eup %8005  ;;  %v7669_v33 = vld [vmem:[#allocation9 + $0x1ac] ss:$16 sps:$4 sm:$0xff]   ;;  %v7667_v35 = vld [vmem:[#allocation9 + $0x1a8] ss:$16 sps:$4 sm:$0xff]  }
 0x39c   : > { %8017 = vtanh.f32 %v8939_v63  ;;  %v8008_v41 = vpop.eup %8007  ;;  %v7640_v63 = vld [vmem:[#allocation9 + $0xc8] ss:$16 sps:$4 sm:$0xff]   ;;  %5214 = vmatprep.subr.bf16.mxu1 %v7687_v3  ;;  %v7730_v3 = vld [vmem:[#allocation12 + $0x100] ss:$16 sps:$4 sm:$0xff]  }
 0x39d   : > { %8019 = vrcp.f32 %v3558_v39  ;;  %v8010_v51 = vpop.eup %8009  ;;  %v7714_v36 = vld [vmem:[#allocation12 + $0x1c4] ss:$16 sps:$4 sm:$0xff]   ;;  %v7672_v39 = vld [vmem:[#allocation9 + $0x18c] ss:$16 sps:$4 sm:$0xff]  }
 0x3a4   : > { %v8012_v17 = vpop.eup %8011 }
 0x3a5   : > { %v3577_v47 = vmul.f32 %v8012_v17, %v8006_v46  ;;  %v7712_v46 = vld [vmem:[#allocation12 + $0x1c0] ss:$16 sps:$4 sm:$0xff]   ;;  %v7675_v17 = vld [vmem:[#allocation9 + $0x16c] ss:$16 sps:$4 sm:$0xff]  }
 0x3a6   : > { %v8014_v28 = vpop.eup %8013 }
 0x3a7   : > { %v3578_v49 = vmul.f32 %v8014_v28, %v8008_v41  ;;  %v7670_v41 = vld [vmem:[#allocation9 + $0x188] ss:$16 sps:$4 sm:$0xff]   ;;  %v7715_v28 = vld [vmem:[#allocation12 + $0x1a0] ss:$16 sps:$4 sm:$0xff]  }
 0x3a8   : > { %v8016_v43 = vpop.eup %8015 }
 0x3a9   : > { %v8018_v45 = vpop.eup %8017  ;;  %v3581_v57 = vmul.f32 %v8016_v43, %v8010_v51  ;;  %v7717_v51 = vld [vmem:[#allocation12 + $0x1a4] ss:$16 sps:$4 sm:$0xff]  }
 0x3aa   : > { %v8020_v48 = vpop.eup %8019  ;;  %v7673_v43 = vld [vmem:[#allocation9 + $0x168] ss:$16 sps:$4 sm:$0xff]  }
 0x3ab   : > { %v3582_v50 = vmul.f32 %v8020_v48, %v8018_v45  ;;  %v3585_v5 = vpack.c.bf16 %v3581_v57, %v3577_v47  ;;  %v7720_v45 = vld [vmem:[#allocation12 + $0x184] ss:$16 sps:$4 sm:$0xff]   ;;  %v7678_v47 = vld [vmem:[#allocation9 + $0x14c] ss:$16 sps:$4 sm:$0xff]   ;;  %v7718_v57 = vld [vmem:[#allocation12 + $0x180] ss:$16 sps:$4 sm:$0xff]  }
 0x3ac   : > { %v7676_v48 = vld [vmem:[#allocation9 + $0x148] ss:$16 sps:$4 sm:$0xff]  }
 0x3ad   : > { %v3586_v52 = vpack.c.bf16 %v3582_v50, %v3578_v49  ;;  %v7723_v49 = vld [vmem:[#allocation12 + $0x164] ss:$16 sps:$4 sm:$0xff]   ;;  %v7681_v50 = vld [vmem:[#allocation9 + $0x12c] ss:$16 sps:$4 sm:$0xff]  }
 0x3af   : > { %7047 = vmatprep.mubr.msk.bf16.mxu0 %vm4281_vm2, %v3586_v52  ;;  %7048 = vmatprep.mubr.msk.bf16.mxu1 %vm4281_vm2, %v3586_v52  ;;  %v7679_v52 = vld [vmem:[#allocation9 + $0x128] ss:$16 sps:$4 sm:$0xff]  }
 0x3b0   : > { %4361 = vmatmul.mubr.bf16.vlgmr.msra.gmra.mxu0 %v3585_v5  ;;  %4447 = vmatmul.mubr.bf16.vlgmr.msra.gmra.mxu1 %v3585_v5  ;;  %v7721_v5 = vld [vmem:[#allocation12 + $0x160] ss:$16 sps:$4 sm:$0xff]  }
 0x3b1   : > { %4372 = vmatpush1.bf16.msra.mxu0 %v7637_v53  ;;  %4403 = vmatprep.mubr.bf16.mxu0 %v8964_v21  ;;  %v7691_v21 = vld [vmem:[#allocation12 + $0xa0] ss:$16 sps:$4 sm:$0xff]   ;;  %v7684_v53 = vld [vmem:[#allocation9 + $0x10c] ss:$16 sps:$4 sm:$0xff]  }
 0x3b2   : > { %4373 = vmatprep.subr.bf16.mxu0 %v7642_v55  ;;  %5215 = vmatpush1.bf16.msra.mxu1 %v7685_v1  ;;  %v7682_v55 = vld [vmem:[#allocation9 + $0x108] ss:$16 sps:$4 sm:$0xff]   ;;  %v7727_v1 = vld [vmem:[#allocation12 + $0x120] ss:$16 sps:$4 sm:$0xff]  }
 0x3b3   : > { %5216 = vmatprep.subr.bf16.mxu1 %v7690_v60  ;;  %v7733_v60 = vld [vmem:[#allocation12 + $0x2e0] ss:$16 sps:$4 sm:$0xff]  }
 0x3b5   : > { %4374 = vmatpush1.bf16.msra.mxu0 %v7640_v63  ;;  %v7726_v63 = vld [vmem:[#allocation12 + $0x144] ss:$16 sps:$4 sm:$0xff]  }
 0x3b6   : > { %4375 = vmatprep.subr.bf16.mxu0 %v7645_v59  ;;  %5217 = vmatpush1.bf16.msra.mxu1 %v7688_v0  ;;  %v7724_v59 = vld [vmem:[#allocation12 + $0x140] ss:$16 sps:$4 sm:$0xff]   ;;  %v7735_v0 = vld [vmem:[#allocation12 + $0x2e4] ss:$16 sps:$4 sm:$0xff]  }
 0x3b7   : > { %5218 = vmatprep.subr.bf16.mxu1 %v7693_v4  ;;  %v7741_v4 = vld [vmem:[#allocation12 + $0x2c4] ss:$16 sps:$4 sm:$0xff]  }
 0x3b9   : > { %4376 = vmatpush1.bf16.msra.mxu0 %v7643_v6  ;;  %v7729_v6 = vld [vmem:[#allocation12 + $0x124] ss:$16 sps:$4 sm:$0xff]  }
 0x3ba   : > { %4377 = vmatprep.subr.bf16.mxu0 %v7648_v9  ;;  %5219 = vmatpush1.bf16.msra.mxu1 %v7691_v21  ;;  %v7732_v9 = vld [vmem:[#allocation12 + $0x104] ss:$16 sps:$4 sm:$0xff]   ;;  %v7745_v21 = vld [vmem:[#allocation12 + $0x2a0] ss:$16 sps:$4 sm:$0xff]  }
 0x3bb   : > { %5220 = vmatprep.subr.bf16.mxu1 %v7696_v61  ;;  %v7751_v61 = vld [vmem:[#allocation12 + $0x280] ss:$16 sps:$4 sm:$0xff]  }
 0x3bd   : > { %4378 = vmatpush1.bf16.msra.mxu0 %v7646_v2  ;;  %v7738_v2 = vld [vmem:[#allocation12 + $0x2ec] ss:$16 sps:$4 sm:$0xff]  }
 0x3be   : > { %4379 = vmatprep.subr.bf16.mxu0 %v7651_v11  ;;  %5221 = vmatpush1.bf16.msra.mxu1 %v7694_v30  ;;  %v7747_v11 = vld [vmem:[#allocation12 + $0x2a4] ss:$16 sps:$4 sm:$0xff]   ;;  %v7757_v30 = vld [vmem:[#allocation12 + $0x260] ss:$16 sps:$4 sm:$0xff]  }
 0x3bf   : > { %5222 = vmatprep.subr.bf16.mxu1 %v7699_v7  ;;  %v7763_v7 = vld [vmem:[#allocation12 + $0x240] ss:$16 sps:$4 sm:$0xff]  }
 0x3c1   : > { %4380 = vmatpush1.bf16.msra.mxu0 %v7649_v16  ;;  %v7753_v16 = vld [vmem:[#allocation12 + $0x284] ss:$16 sps:$4 sm:$0xff]  }
 0x3c2   : > { %4381 = vmatprep.subr.bf16.mxu0 %v7654_v22  ;;  %5223 = vmatpush1.bf16.msra.mxu1 %v7697_v12  ;;  %v7759_v22 = vld [vmem:[#allocation12 + $0x264] ss:$16 sps:$4 sm:$0xff]   ;;  %v7769_v12 = vld [vmem:[#allocation12 + $0x220] ss:$16 sps:$4 sm:$0xff]  }
 0x3c3   : > { %5224 = vmatprep.subr.bf16.mxu1 %v7702_v13  ;;  %v7775_v13 = vld [vmem:[#allocation12 + $0x200] ss:$16 sps:$4 sm:$0xff]  }
 0x3c5   : > { %4382 = vmatpush1.bf16.msra.mxu0 %v7652_v29  ;;  %v7765_v29 = vld [vmem:[#allocation12 + $0x244] ss:$16 sps:$4 sm:$0xff]  }
 0x3c6   : > { %4383 = vmatprep.subr.bf16.mxu0 %v7657_v10  ;;  %5225 = vmatpush1.bf16.msra.mxu1 %v7700_v15  ;;  %v7771_v10 = vld [vmem:[#allocation12 + $0x224] ss:$16 sps:$4 sm:$0xff]   ;;  %v7781_v15 = vld [vmem:[#allocation12 + $0x360] ss:$16 sps:$4 sm:$0xff]  }
 0x3c7   : > { %5226 = vmatprep.subr.bf16.mxu1 %v7705_v19  ;;  %v7787_v19 = vld [vmem:[#allocation12 + $0x340] ss:$16 sps:$4 sm:$0xff]  }
 0x3c9   : > { %4384 = vmatpush1.bf16.msra.mxu0 %v7655_v62  ;;  %v7777_v62 = vld [vmem:[#allocation12 + $0x204] ss:$16 sps:$4 sm:$0xff]  }
 0x3ca   : > { %4385 = vmatprep.subr.bf16.mxu0 %v7660_v14  ;;  %5227 = vmatpush1.bf16.msra.mxu1 %v7703_v24  ;;  %v7783_v14 = vld [vmem:[#allocation12 + $0x364] ss:$16 sps:$4 sm:$0xff]   ;;  %v7793_v24 = vld [vmem:[#allocation12 + $0x320] ss:$16 sps:$4 sm:$0xff]  }
 0x3cb   : > { %5228 = vmatprep.subr.bf16.mxu1 %v7708_v26  ;;  %v7801_v26 = vld [vmem:[#allocation12 + $0x304] ss:$16 sps:$4 sm:$0xff]  }
 0x3cd   : > { %4386 = vmatpush1.bf16.msra.mxu0 %v7658_v18  ;;  %v7789_v18 = vld [vmem:[#allocation12 + $0x344] ss:$16 sps:$4 sm:$0xff]  }
 0x3ce   : > { %4387 = vmatprep.subr.bf16.mxu0 %v7663_v8  ;;  %5229 = vmatpush1.bf16.msra.mxu1 %v7706_v27  ;;  %v7795_v8 = vld [vmem:[#allocation12 + $0x324] ss:$16 sps:$4 sm:$0xff]   ;;  %v8982_v27 = vpop.permute.xlu1 %4487 }
 0x3cf   : > { %5230 = vmatprep.subr.bf16.mxu1 %v7711_v32 }
 0x3d1   : > { %4388 = vmatpush2.bf16.msra.mxu0 %v7661_v25  ;;  %v7799_v25 = vld [vmem:[#allocation12 + $0x300] ss:$16 sps:$4 sm:$0xff]  }
 0x3d2   : > { %4389 = vmatprep.subr.bf16.mxu0 %v7666_v54  ;;  %5231 = vmatpush2.bf16.msra.mxu1 %v7709_v34  ;;  %v7807_v54 = vld [vmem:[#allocation12 + $0xec] ss:$16 sps:$4 sm:$0xff]  }
 0x3d3   : > { %5232 = vmatprep.subr.bf16.mxu1 %v7714_v36  ;;  %v8990_v36 = vld [vmem:[#allocation10] sm:$0xf] }
 0x3d5   : > { %4390 = vmatpush2.bf16.msra.mxu0 %v7664_v31  ;;  %v8984_v31 = vpop.permute.xlu0 %4479 }
 0x3d6   : > { %4391 = vmatprep.subr.bf16.mxu0 %v7669_v33  ;;  %5233 = vmatpush2.bf16.msra.mxu1 %v7712_v46  ;;  %v8986_v33 = vpop.permute.xlu1 %4489 }
 0x3d7   : > { %5234 = vmatprep.subr.bf16.mxu1 %v7717_v51 }
 0x3d9   : > { %4392 = vmatpush2.bf16.msra.mxu0 %v7667_v35  ;;  %v8988_v34 = vpop.permute.xlu0 %4481 }
 0x3da   : > { %4393 = vmatprep.subr.bf16.mxu0 %v7672_v39  ;;  %5235 = vmatpush2.bf16.msra.mxu1 %v7715_v28  ;;  %v4486_v39 = vpop.permute.xlu1 %4485 }
 0x3db   : > { %5236 = vmatprep.subr.bf16.mxu1 %v7720_v45 }
 0x3dd   : > { %4394 = vmatpush2.bf16.msra.mxu0 %v7670_v41  ;;  %v3708_v41 = vrot.slane %v8990_v36, %v8822_v40  ;;  %v4478_v51 = vpop.permute.xlu0 %4477 }
 0x3de   : > { %4395 = vmatprep.subr.bf16.mxu0 %v7675_v17  ;;  %5237 = vmatpush2.bf16.msra.mxu1 %v7718_v57  ;;  %v3704_v17 = vrot.slane %v8990_v36, %v8826_v42 }
 0x3df   : > { %5238 = vmatprep.subr.bf16.mxu1 %v7723_v49 }
 0x3e1   : > { %4396 = vmatpush2.bf16.msra.mxu0 %v7673_v43 }
 0x3e2   : > { %4397 = vmatprep.subr.bf16.mxu0 %v7678_v47  ;;  %5239 = vmatpush2.bf16.msra.mxu1 %v7721_v5 }
 0x3e3   : > { %5240 = vmatprep.subr.bf16.mxu1 %v7726_v63 }
 0x3e5   : > { %4398 = vmatpush2.bf16.msra.mxu0 %v7676_v48  ;;  %v4484_v48 = vpop.permute.xlu1 %4483 }
 0x3e6   : > { %4399 = vmatprep.subr.bf16.mxu0 %v7681_v50  ;;  %5241 = vmatpush2.bf16.msra.mxu1 %v7724_v59 }
 0x3e7   : > { %5242 = vmatprep.subr.bf16.mxu1 %v7729_v6  ;;  %v4494_v6 = vsel %vm4281_vm2, %v4484_v48, %v4486_v39 }
 0x3e9   : > { %4400 = vmatpush2.bf16.msra.mxu0 %v7679_v52 }
 0x3ea   : > { %4401 = vmatprep.subr.bf16.mxu0 %v7684_v53  ;;  %5243 = vmatpush2.bf16.msra.mxu1 %v7727_v1 }
 0x3eb   : > { %5244 = vmatprep.subr.bf16.mxu1 %v7732_v9  ;;  %v4495_v9 = vsel %vm4281_vm2, %v4486_v39, %v8982_v27  ;;  %v7804_v39 = vld [vmem:[#allocation12 + $0x30c] ss:$16 sps:$4 sm:$0xff]  }
 0x3ed   : > { %4402 = vmatpush2.bf16.msra.mxu0 %v7682_v55  ;;  %v4476_v55 = vpop.permute.xlu0 %4475 }
 0x3ee   : > { %5245 = vmatpush2.bf16.msra.mxu1 %v7730_v3  ;;  %5257 = vmatprep.subr.bf16.mxu0 %v7735_v0  ;;  %v4492_v3 = vsel %vm4281_vm2, %v4478_v51, %v8984_v31  ;;  %v4491_v0 = vsel %vm4281_vm2, %v4476_v55, %v4478_v51  ;;  %v3712_v51 = vrot.slane %v8990_v36, %v8829_v44 }
 0x3ef   : > { %5343 = vmatprep.subr.bf16.mxu1 %v7738_v2 }
 0x3f0   : > { %4404 = vmatmul.mubr.bf16.vlgmr.msra.gmra.mxu0 %v8966_v23  ;;  %v7739_v23 = vld [vmem:[#allocation12 + $0x2c0] ss:$16 sps:$4 sm:$0xff]  }
 0x3f1   : > { %5258 = vmatpush1.bf16.msra.mxu0 %v7733_v60 }
 0x3f2   : > { %5259 = vmatprep.subr.bf16.mxu0 %v7741_v4 }
 0x3f5   : > { %5260 = vmatpush1.bf16.msra.mxu0 %v7739_v23 }
 0x3f6   : > { %5261 = vmatprep.subr.bf16.mxu0 %v7747_v11 }
 0x3f9   : > { %5262 = vmatpush1.bf16.msra.mxu0 %v7745_v21  ;;  %v7736_v21 = vld [vmem:[#allocation12 + $0x2e8] ss:$16 sps:$4 sm:$0xff]  }
 0x3fa   : > { %5263 = vmatprep.subr.bf16.mxu0 %v7753_v16 }
 0x3fd   : > { %5264 = vmatpush1.bf16.msra.mxu0 %v7751_v61  ;;  %v7744_v61 = vld [vmem:[#allocation12 + $0x2cc] ss:$16 sps:$4 sm:$0xff]  }
 0x3fe   : > { %5265 = vmatprep.subr.bf16.mxu0 %v7759_v22  ;;  %v7742_v22 = vld [vmem:[#allocation12 + $0x2c8] ss:$16 sps:$4 sm:$0xff]  }
 0x401   : > { %5266 = vmatpush1.bf16.msra.mxu0 %v7757_v30  ;;  %v7750_v30 = vld [vmem:[#allocation12 + $0x2ac] ss:$16 sps:$4 sm:$0xff]  }
 0x402   : > { %5267 = vmatprep.subr.bf16.mxu0 %v7765_v29  ;;  %v7748_v29 = vld [vmem:[#allocation12 + $0x2a8] ss:$16 sps:$4 sm:$0xff]  }
 0x405   : > { %5268 = vmatpush1.bf16.msra.mxu0 %v7763_v7  ;;  %v7756_v7 = vld [vmem:[#allocation12 + $0x28c] ss:$16 sps:$4 sm:$0xff]  }
 0x406   : > { %5269 = vmatprep.subr.bf16.mxu0 %v7771_v10  ;;  %v7754_v10 = vld [vmem:[#allocation12 + $0x288] ss:$16 sps:$4 sm:$0xff]  }
 0x409   : > { %5270 = vmatpush1.bf16.msra.mxu0 %v7769_v12  ;;  %v7762_v12 = vld [vmem:[#allocation12 + $0x26c] ss:$16 sps:$4 sm:$0xff]  }
 0x40a   : > { %5271 = vmatprep.subr.bf16.mxu0 %v7777_v62  ;;  %v7760_v62 = vld [vmem:[#allocation12 + $0x268] ss:$16 sps:$4 sm:$0xff]  }
 0x40d   : > { %5272 = vmatpush1.bf16.msra.mxu0 %v7775_v13  ;;  %v7768_v13 = vld [vmem:[#allocation12 + $0x24c] ss:$16 sps:$4 sm:$0xff]  }
 0x40e   : > { %5281 = vmatprep.subr.bf16.mxu0 %v7783_v14  ;;  %v7766_v14 = vld [vmem:[#allocation12 + $0x248] ss:$16 sps:$4 sm:$0xff]  }
 0x411   : > { %5282 = vmatpush2.bf16.msra.mxu0 %v7781_v15  ;;  %v7774_v15 = vld [vmem:[#allocation12 + $0x22c] ss:$16 sps:$4 sm:$0xff]  }
 0x412   : > { %5283 = vmatprep.subr.bf16.mxu0 %v7789_v18  ;;  %v7772_v18 = vld [vmem:[#allocation12 + $0x228] ss:$16 sps:$4 sm:$0xff]  }
 0x415   : > { %5284 = vmatpush2.bf16.msra.mxu0 %v7787_v19  ;;  %v7780_v19 = vld [vmem:[#allocation12 + $0x20c] ss:$16 sps:$4 sm:$0xff]  }
 0x416   : > { %5285 = vmatprep.subr.bf16.mxu0 %v7795_v8  ;;  %v7778_v8 = vld [vmem:[#allocation12 + $0x208] ss:$16 sps:$4 sm:$0xff]  }
 0x419   : > { %5286 = vmatpush2.bf16.msra.mxu0 %v7793_v24  ;;  %v7786_v24 = vld [vmem:[#allocation12 + $0x36c] ss:$16 sps:$4 sm:$0xff]  }
 0x41a   : > { %5287 = vmatprep.subr.bf16.mxu0 %v7801_v26  ;;  %v7792_v26 = vld [vmem:[#allocation12 + $0x34c] ss:$16 sps:$4 sm:$0xff]  }
 0x41d   : > { %5288 = vmatpush2.bf16.msra.mxu0 %v7799_v25  ;;  %v7784_v25 = vld [vmem:[#allocation12 + $0x368] ss:$16 sps:$4 sm:$0xff]  }
 0x41e   : > { %5300 = vmatprep.subr.bf16.mxu0 %v7807_v54  ;;  %v7790_v54 = vld [vmem:[#allocation12 + $0x348] ss:$16 sps:$4 sm:$0xff]  }
 0x42e   : > { %v4319_v32 = vpop.f32.mrf.mxu1 }
 0x42f   : > { %v4320_v49 = vadd.f32 %v4319_v32, %v3704_v17  ;;  %v7798_v32 = vld [vmem:[#allocation12 + $0x32c] ss:$16 sps:$4 sm:$0xff]  }
 0x430   : > { %v4321_v35 = vpop.f32.mrf.mxu1 }
 0x431   : > { %v4322_v47 = vadd.f32 %v4321_v35, %v3708_v41  ;;  %v7796_v35 = vld [vmem:[#allocation12 + $0x328] ss:$16 sps:$4 sm:$0xff]  }
 0x432   : > { %v4323_v46 = vpop.f32.mrf.mxu1 }
 0x433   : > { %v4324_v57 = vadd.f32 %v4323_v46, %v3704_v17  ;;  %v7802_v46 = vld [vmem:[#allocation12 + $0x308] ss:$16 sps:$4 sm:$0xff]   ;;  %v3716_v17 = vrot.slane %v8990_v36, %v8819_v38 }
 0x434   : > { %v4325_v43 = vpop.f32.mrf.mxu1 }
 0x435   : > { %v4326_v5 = vadd.f32 %v4325_v43, %v3708_v41 }
 0x470   : > { %v4362_v28 = vpop.f32.mrf.mxu0  ;;  %v4448_v41 = vpop.f32.mrf.mxu1 }
 0x471   : > { %v4363_v63 = vadd.f32 %v4362_v28, %v4320_v49  ;;  %v4493_v49 = vsel %vm4281_vm2, %v8984_v31, %v8988_v34 }
 0x472   : > { %v4364_v45 = vpop.f32.mrf.mxu0  ;;  %v4450_v28 = vpop.f32.mrf.mxu1 }
 0x473   : > { %v4365_v52 = vadd.f32 %v4364_v45, %v4322_v47  ;;  %v4505_v23 = vadd.f32 %v4491_v0, %v4363_v63 }
 0x474   : > { %v4366_v50 = vpop.f32.mrf.mxu0 }
 0x475   : > { %v4367_v53 = vadd.f32 %v4366_v50, %v4324_v57  ;;  %v9002_v2 = vadd.f32 %v4492_v3, %v4365_v52  ;;  %v4452_v50 = vpop.f32.mrf.mxu1 }
 0x476   : > { %v4368_v59 = vpop.f32.mrf.mxu0 }
 0x477   : > { %v4369_v1 = vadd.f32 %v4368_v59, %v4326_v5  ;;  %v4509_v60 = vadd.f32 %v4494_v6, %v4367_v53  ;;  %v4454_v3 = vpop.f32.mrf.mxu1 }
 0x479   : > { %v9004_v4 = vadd.f32 %v4495_v9, %v4369_v1  ;;  %v9010_v16 = vpack.c.bf16 %v4509_v60, %v4505_v23  ;;  %v4496_v1 = vsel %vm4281_vm2, %v8982_v27, %v8986_v33  ;;  %v7810_v27 = vld [vmem:[#allocation12 + $0xcc] ss:$16 sps:$4 sm:$0xff]  }
 0x47b   : > { %v9008_v11 = vpack.c.bf16 %v9004_v4, %v9002_v2 }
 0x47d   : > { %5246 = vmatprep.mubr.bf16.mxu1 %v9008_v11 }
 0x47e   : > { %5247 = vmatmul.mubr.bf16.vlgmr.msra.gmra.mxu1 %v9010_v16 }
 0x47f   : > { %5344 = vmatpush1.bf16.msra.mxu1 %v7736_v21  ;;  %v7808_v21 = vld [vmem:[#allocation12 + $0xc8] ss:$16 sps:$4 sm:$0xff]  }
 0x480   : > { %5345 = vmatprep.subr.bf16.mxu1 %v7744_v61  ;;  %v7811_v61 = vld [vmem:[#allocation12 + $0xa8] ss:$16 sps:$4 sm:$0xff]  }
 0x483   : > { %5346 = vmatpush1.bf16.msra.mxu1 %v7742_v22  ;;  %v7816_v22 = vld [vmem:[#allocation12 + $0x8c] ss:$16 sps:$4 sm:$0xff]  }
 0x484   : > { %5347 = vmatprep.subr.bf16.mxu1 %v7750_v30  ;;  %v7819_v30 = vld [vmem:[#allocation12 + $0x6c] ss:$16 sps:$4 sm:$0xff]  }
 0x487   : > { %5348 = vmatpush1.bf16.msra.mxu1 %v7748_v29  ;;  %v7817_v29 = vld [vmem:[#allocation12 + $0x68] ss:$16 sps:$4 sm:$0xff]  }
 0x488   : > { %5349 = vmatprep.subr.bf16.mxu1 %v7756_v7  ;;  %v7822_v7 = vld [vmem:[#allocation12 + $0x4c] ss:$16 sps:$4 sm:$0xff]  }
 0x48b   : > { %5350 = vmatpush1.bf16.msra.mxu1 %v7754_v10  ;;  %v7820_v10 = vld [vmem:[#allocation12 + $0x48] ss:$16 sps:$4 sm:$0xff]  }
 0x48c   : > { %5351 = vmatprep.subr.bf16.mxu1 %v7762_v12  ;;  %v7828_v12 = vld [vmem:[#allocation12 + $0xc] ss:$16 sps:$4 sm:$0xff]  }
 0x48f   : > { %5352 = vmatpush1.bf16.msra.mxu1 %v7760_v62  ;;  %v7826_v62 = vld [vmem:[#allocation12 + $0x8] ss:$16 sps:$4 sm:$0xff]  }
 0x490   : > { %5353 = vmatprep.subr.bf16.mxu1 %v7768_v13  ;;  %v7831_v13 = vld [vmem:[#allocation12 + $0x1ec] ss:$16 sps:$4 sm:$0xff]  }
 0x493   : > { %5354 = vmatpush1.bf16.msra.mxu1 %v7766_v14  ;;  %v7829_v14 = vld [vmem:[#allocation12 + $0x1e8] ss:$16 sps:$4 sm:$0xff]  }
 0x494   : > { %5355 = vmatprep.subr.bf16.mxu1 %v7774_v15  ;;  %v7834_v15 = vld [vmem:[#allocation12 + $0x1cc] ss:$16 sps:$4 sm:$0xff]  }
 0x497   : > { %5356 = vmatpush1.bf16.msra.mxu1 %v7772_v18  ;;  %v7832_v18 = vld [vmem:[#allocation12 + $0x1c8] ss:$16 sps:$4 sm:$0xff]  }
 0x498   : > { %5357 = vmatprep.subr.bf16.mxu1 %v7780_v19  ;;  %v7837_v19 = vld [vmem:[#allocation12 + $0x1ac] ss:$16 sps:$4 sm:$0xff]  }
 0x49b   : > { %5358 = vmatpush1.bf16.msra.mxu1 %v7778_v8  ;;  %v7835_v8 = vld [vmem:[#allocation12 + $0x1a8] ss:$16 sps:$4 sm:$0xff]  }
 0x49c   : > { %5367 = vmatprep.subr.bf16.mxu1 %v7786_v24  ;;  %v7840_v24 = vld [vmem:[#allocation12 + $0x18c] ss:$16 sps:$4 sm:$0xff]  }
 0x49f   : > { %5368 = vmatpush2.bf16.msra.mxu1 %v7784_v25  ;;  %v7838_v25 = vld [vmem:[#allocation12 + $0x188] ss:$16 sps:$4 sm:$0xff]  }
 0x4a0   : > { %5369 = vmatprep.subr.bf16.mxu1 %v7792_v26  ;;  %v7843_v26 = vld [vmem:[#allocation12 + $0x16c] ss:$16 sps:$4 sm:$0xff]  }
 0x4a3   : > { %5370 = vmatpush2.bf16.msra.mxu1 %v7790_v54  ;;  %v7841_v54 = vld [vmem:[#allocation12 + $0x168] ss:$16 sps:$4 sm:$0xff]  }
 0x4a4   : > { %5371 = vmatprep.subr.bf16.mxu1 %v7798_v32  ;;  %v7846_v32 = vld [vmem:[#allocation12 + $0x14c] ss:$16 sps:$4 sm:$0xff]  }
 0x4a7   : > { %5372 = vmatpush2.bf16.msra.mxu1 %v7796_v35  ;;  %v7844_v35 = vld [vmem:[#allocation12 + $0x148] ss:$16 sps:$4 sm:$0xff]  }
 0x4a8   : > { %5373 = vmatprep.subr.bf16.mxu1 %v7804_v39  ;;  %v7849_v39 = vld [vmem:[#allocation12 + $0x12c] ss:$16 sps:$4 sm:$0xff]  }
 0x4ab   : > { %5374 = vmatpush2.bf16.msra.mxu1 %v7802_v46  ;;  %v7847_v46 = vld [vmem:[#allocation12 + $0x128] ss:$16 sps:$4 sm:$0xff]  }
 0x4b0   : > { %v4405_v43 = vpop.f32.mrf.mxu0 }
 0x4b1   : > { %v4406_v45 = vadd.f32 %v4405_v43, %v3712_v51  ;;  %v7858_v43 = vld [vmem:[%s9258_s9 + $0x94] ss:$12 sps:$4 sm:$0xff]  }
 0x4b2   : > { %v4407_v47 = vpop.f32.mrf.mxu0 }
 0x4b3   : > { %v4449_v57 = vadd.f32 %v4448_v41, %v4406_v45  ;;  %v4408_v48 = vadd.f32 %v4407_v47, %v3716_v17  ;;  %v7852_v41 = vld [vmem:[#allocation12 + $0x10c] ss:$16 sps:$4 sm:$0xff]   ;;  %v7856_v45 = vld [vmem:[%s9258_s9 + $0x90] ss:$12 sps:$4 sm:$0xff]  }
 0x4b4   : > { %v4409_v5 = vpop.f32.mrf.mxu0  ;;  %v7859_v47 = vld [vmem:[%s9258_s9 + $0x78] ss:$12 sps:$4 sm:$0xff]  }
 0x4b5   : > { %v9021_v52 = vadd.f32 %v4450_v28, %v4408_v48  ;;  %v4410_v53 = vadd.f32 %v4409_v5, %v3712_v51  ;;  %v4507_v55 = vadd.f32 %v4493_v49, %v4449_v57  ;;  %v7850_v51 = vld [vmem:[#allocation12 + $0x108] ss:$16 sps:$4 sm:$0xff]   ;;  %v7855_v28 = vld [vmem:[%s9258_s9 + $0xac] ss:$12 sps:$4 sm:$0xff]  }
 0x4b6   : > { %v4411_v63 = vpop.f32.mrf.mxu0  ;;  %5757 = vmatprep.subr.bf16.mxu1 %v7855_v28  ;;  %v7864_v57 = vld [vmem:[%s9258_s9 + $0x64] ss:$12 sps:$4 sm:$0xff]   ;;  %v7862_v48 = vld [vmem:[%s9258_s9 + $0x60] ss:$12 sps:$4 sm:$0xff]  }
 0x4b7   : > { %v4453_v59 = vadd.f32 %v4452_v50, %v4410_v53  ;;  %v4412_v6 = vadd.f32 %v4411_v63, %v3716_v17  ;;  %5851 = vrot.lane.b32.xlu0 %v4507_v55, %s8514_s30  ;;  %v4508_v36 = vadd.f32 %v8988_v34, %v9021_v52  ;;  %v7805_v34 = vld [vmem:[#allocation12 + $0xe8] ss:$16 sps:$4 sm:$0xff]   ;;  %v7867_v49 = vld [vmem:[%s9258_s9 + $0x4c] ss:$12 sps:$4 sm:$0xff]  }
 0x4b8   : > { %v7853_v17 = vld [vmem:[%s9258_s9 + $0xa8] ss:$12 sps:$4 sm:$0xff]   ;;  %v7868_v53 = vld [vmem:[%s9258_s9 + $0x30] ss:$12 sps:$4 sm:$0xff]   ;;  %v7871_v63 = vld [vmem:[%s9258_s9 + $0x18] ss:$12 sps:$4 sm:$0xff]  }
 0x4b9   : > { %v9029_v31 = vadd.f32 %v4454_v3, %v4412_v6  ;;  %5853 = vrot.lane.b32.xlu1 %v4508_v36, %s8514_s30  ;;  %v4511_v9 = vadd.f32 %v4496_v1, %v4453_v59  ;;  %v7865_v50 = vld [vmem:[%s9258_s9 + $0x48] ss:$12 sps:$4 sm:$0xff]   ;;  %v7876_v59 = vld [vmem:[%s9258_s9 + $0x4] ss:$12 sps:$4 sm:$0xff]   ;;  %v7874_v6 = vld [vmem:[%s9258_s9] ss:$12 sps:$4 sm:$0xff]  }
 0x4ba   : > { %v7870_v5 = vld [vmem:[%s9258_s9 + $0x34] ss:$12 sps:$4 sm:$0xff]   ;;  %v7880_v1 = vld [vmem:[%s9258_s9 + $0x170] ss:$12 sps:$4 sm:$0xff]  }
 0x4bb   : > { %5857 = vrot.lane.b32.xlu0 %v4511_v9, %s8514_s30  ;;  %v4515_v60 = vpack.c.bf16 %v4511_v9, %v4507_v55  ;;  %v4512_v0 = vadd.f32 %v8986_v33, %v9029_v31  ;;  %v7813_v33 = vld [vmem:[#allocation12 + $0xac] ss:$16 sps:$4 sm:$0xff]   ;;  %v7881_v9 = vld [vmem:[%s9258_s9 + $0xb0] ss:$12 sps:$4 sm:$0xff]  }
 0x4bc   : > { %v7873_v55 = vld [vmem:[%s9258_s9 + $0x1c] ss:$12 sps:$4 sm:$0xff]  }
 0x4bd   : > { %5859 = vrot.lane.b32.xlu1 %v4512_v0, %s8514_s30  ;;  %v4516_v23 = vpack.c.bf16 %v4512_v0, %v4508_v36  ;;  %v7879_v36 = vld [vmem:[%s9258_s9 + $0x16c] ss:$12 sps:$4 sm:$0xff]   ;;  %v7877_v3 = vld [vmem:[%s9258_s9 + $0x168] ss:$12 sps:$4 sm:$0xff]  }
 0x4be   : > { %v7885_v0 = vld [vmem:[%s9258_s9 + $0x158] ss:$12 sps:$4 sm:$0xff]  }
 0x4bf   : > { %7161 = vmatprep.mubr.msk.bf16.mxu0 %vm4281_vm2, %v4516_v23  ;;  %5849 = vrot.lane.b32.xlu0 %v9002_v2, %s8514_s30  ;;  %v7814_v2 = vld [vmem:[#allocation12 + $0x88] ss:$16 sps:$4 sm:$0xff]  }
 0x4c0   : > { %7162 = vmatprep.mubr.msk.bf16.mxu1 %vm4281_vm2, %v4516_v23  ;;  %5290 = vmatmul.mubr.bf16.vlgmr.msra.gmra.mxu0 %v4515_v60  ;;  %v7882_v23 = vld [vmem:[%s9258_s9 + $0x150] ss:$12 sps:$4 sm:$0xff]  }
 0x4c1   : > { %5301 = vmatpush1.bf16.msra.mxu0 %v7805_v34  ;;  %5376 = vmatmul.mubr.bf16.vlgmr.msra.gmra.mxu1 %v4515_v60  ;;  %v7884_v60 = vld [vmem:[%s9258_s9 + $0x154] ss:$12 sps:$4 sm:$0xff]   ;;  %v7886_v34 = vld [vmem:[%s9258_s9 + $0x98] ss:$12 sps:$4 sm:$0xff]  }
 0x4c2   : > { %5855 = vrot.lane.b32.xlu1 %v9004_v4, %s8514_s30  ;;  %5332 = vmatprep.mubr.bf16.mxu0 %v9008_v11  ;;  %v7825_v4 = vld [vmem:[#allocation12 + $0x2c] ss:$16 sps:$4 sm:$0xff]   ;;  %v7823_v11 = vld [vmem:[#allocation12 + $0x28] ss:$16 sps:$4 sm:$0xff]  }
 0x4c3   : > { %5302 = vmatprep.subr.bf16.mxu0 %v7810_v27  ;;  %5758 = vmatpush1.bf16.msra.mxu1 %v7853_v17  ;;  %v7889_v27 = vld [vmem:[%s9258_s9 + $0x13c] ss:$12 sps:$4 sm:$0xff]  }
 0x4c4   : > { %5759 = vmatprep.subr.bf16.mxu1 %v7858_v43  ;;  %v4629_v43 = vld [vmem:[#allocation13] sm:$0xf] }
 0x4c5   : > { %5303 = vmatpush1.bf16.msra.mxu0 %v7808_v21  ;;  %v7890_v21 = vld [vmem:[%s9258_s9 + $0x140] ss:$12 sps:$4 sm:$0xff]  }
 0x4c6   : > { %5304 = vmatprep.subr.bf16.mxu0 %v7813_v33  ;;  %v7887_v33 = vld [vmem:[%s9258_s9 + $0x138] ss:$12 sps:$4 sm:$0xff]  }
 0x4c7   : > { %5760 = vmatpush1.bf16.msra.mxu1 %v7856_v45 }
 0x4c9   : > { %5305 = vmatpush1.bf16.msra.mxu0 %v7811_v61  ;;  %v7891_v61 = vld [vmem:[%s9258_s9 + $0x80] ss:$12 sps:$4 sm:$0xff]  }
 0x4ca   : > { %5306 = vmatprep.subr.bf16.mxu0 %v7816_v22  ;;  %v7894_v22 = vld [vmem:[%s9258_s9 + $0x124] ss:$12 sps:$4 sm:$0xff]  }
 0x4cd   : > { %5307 = vmatpush1.bf16.msra.mxu0 %v7814_v2  ;;  %v7895_v2 = vld [vmem:[%s9258_s9 + $0x128] ss:$12 sps:$4 sm:$0xff]  }
 0x4ce   : > { %5308 = vmatprep.subr.bf16.mxu0 %v7819_v30  ;;  %v7892_v30 = vld [vmem:[%s9258_s9 + $0x120] ss:$12 sps:$4 sm:$0xff]  }
 0x4d1   : > { %5309 = vmatpush1.bf16.msra.mxu0 %v7817_v29  ;;  %v7896_v29 = vld [vmem:[%s9258_s9 + $0x68] ss:$12 sps:$4 sm:$0xff]  }
 0x4d2   : > { %5310 = vmatprep.subr.bf16.mxu0 %v7822_v7  ;;  %v7897_v7 = vld [vmem:[%s9258_s9 + $0x108] ss:$12 sps:$4 sm:$0xff]  }
 0x4d5   : > { %5311 = vmatpush1.bf16.msra.mxu0 %v7820_v10  ;;  %v7899_v10 = vld [vmem:[%s9258_s9 + $0x10c] ss:$12 sps:$4 sm:$0xff]  }
 0x4d6   : > { %5312 = vmatprep.subr.bf16.mxu0 %v7825_v4  ;;  %v7900_v4 = vld [vmem:[%s9258_s9 + $0x110] ss:$12 sps:$4 sm:$0xff]  }
 0x4d9   : > { %5313 = vmatpush1.bf16.msra.mxu0 %v7823_v11  ;;  %v7901_v11 = vld [vmem:[%s9258_s9 + $0x50] ss:$12 sps:$4 sm:$0xff]  }
 0x4da   : > { %5314 = vmatprep.subr.bf16.mxu0 %v7828_v12  ;;  %v7904_v12 = vld [vmem:[%s9258_s9 + $0xf4] ss:$12 sps:$4 sm:$0xff]  }
 0x4dd   : > { %5315 = vmatpush1.bf16.msra.mxu0 %v7826_v62  ;;  %v7905_v62 = vld [vmem:[%s9258_s9 + $0xf8] ss:$12 sps:$4 sm:$0xff]  }
 0x4de   : > { %5316 = vmatprep.subr.bf16.mxu0 %v7831_v13  ;;  %v7902_v13 = vld [vmem:[%s9258_s9 + $0xf0] ss:$12 sps:$4 sm:$0xff]  }
 0x4e1   : > { %5317 = vmatpush2.bf16.msra.mxu0 %v7829_v14  ;;  %v7906_v14 = vld [vmem:[%s9258_s9 + $0x38] ss:$12 sps:$4 sm:$0xff]  }
 0x4e2   : > { %5318 = vmatprep.subr.bf16.mxu0 %v7834_v15  ;;  %v7909_v15 = vld [vmem:[%s9258_s9 + $0xdc] ss:$12 sps:$4 sm:$0xff]  }
 0x4e5   : > { %5319 = vmatpush2.bf16.msra.mxu0 %v7832_v18  ;;  %v7910_v18 = vld [vmem:[%s9258_s9 + $0xe0] ss:$12 sps:$4 sm:$0xff]  }
 0x4e6   : > { %5320 = vmatprep.subr.bf16.mxu0 %v7837_v19  ;;  %v7907_v19 = vld [vmem:[%s9258_s9 + $0xd8] ss:$12 sps:$4 sm:$0xff]  }
 0x4e9   : > { %5321 = vmatpush2.bf16.msra.mxu0 %v7835_v8  ;;  %v7911_v8 = vld [vmem:[%s9258_s9 + $0x20] ss:$12 sps:$4 sm:$0xff]  }
 0x4ea   : > { %5322 = vmatprep.subr.bf16.mxu0 %v7840_v24  ;;  %v7914_v24 = vld [vmem:[%s9258_s9 + $0xc4] ss:$12 sps:$4 sm:$0xff]  }
 0x4ed   : > { %5323 = vmatpush2.bf16.msra.mxu0 %v7838_v25  ;;  %v7915_v25 = vld [vmem:[%s9258_s9 + $0xc8] ss:$12 sps:$4 sm:$0xff]  }
 0x4ee   : > { %5324 = vmatprep.subr.bf16.mxu0 %v7843_v26  ;;  %v7912_v26 = vld [vmem:[%s9258_s9 + $0xc0] ss:$12 sps:$4 sm:$0xff]  }
 0x4f1   : > { %5325 = vmatpush2.bf16.msra.mxu0 %v7841_v54  ;;  %v7916_v54 = vld [vmem:[%s9258_s9 + $0x8] ss:$12 sps:$4 sm:$0xff]  }
 0x4f2   : > { %5326 = vmatprep.subr.bf16.mxu0 %v7846_v32  ;;  %v7919_v32 = vld [vmem:[#allocation16 + $0x74] ss:$8 sps:$4 sm:$0xff]  }
 0x4f5   : > { %5327 = vmatpush2.bf16.msra.mxu0 %v7844_v35 }
 0x4f6   : > { %5328 = vmatprep.subr.bf16.mxu0 %v7849_v39 }
 0x4f9   : > { %5329 = vmatpush2.bf16.msra.mxu0 %v7847_v46 }
 0x4fa   : > { %5330 = vmatprep.subr.bf16.mxu0 %v7852_v41 }
 0x4fd   : > { %5331 = vmatpush2.bf16.msra.mxu0 %v7850_v51 }
 0x4fe   : > { %7263 = vmatprep.subr.bf16.mxu0 %v7880_v1 }
 0x500   : > { %5333 = vmatmul.mubr.bf16.vlgmr.msra.gmra.mxu0 %v9010_v16  ;;  %v7861_v16 = vld [vmem:[%s9258_s9 + $0x7c] ss:$12 sps:$4 sm:$0xff]  }
 0x501   : > { %5761 = vmatprep.subr.bf16.mxu1 %v7861_v16  ;;  %7264 = vmatpush3.bf16.msra.mxu0 %v7881_v9  ;;  %v4642_v16 = vrot.slane %v4629_v43, %v8829_v44 }
 0x502   : > { %5762 = vmatpush1.bf16.msra.mxu1 %v7859_v47  ;;  %7265 = vmatprep.subr.bf16.mxu0 %v7885_v0 }
 0x503   : > { %5763 = vmatprep.subr.bf16.mxu1 %v7864_v57  ;;  %v4646_v57 = vrot.slane %v4629_v43, %v8819_v38 }
 0x505   : > { %7266 = vmatpush3.bf16.msra.mxu0 %v7886_v34 }
 0x506   : > { %5764 = vmatpush1.bf16.msra.mxu1 %v7862_v48  ;;  %7267 = vmatprep.subr.bf16.mxu0 %v7890_v21  ;;  %v4638_v21 = vrot.slane %v4629_v43, %v8822_v40 }
 0x507   : > { %5765 = vmatprep.subr.bf16.mxu1 %v7867_v49 }
 0x509   : > { %7268 = vmatpush3.bf16.msra.mxu0 %v7891_v61 }
 0x50a   : > { %5766 = vmatpush1.bf16.msra.mxu1 %v7865_v50  ;;  %7269 = vmatprep.subr.bf16.mxu0 %v7895_v2 }
 0x50b   : > { %5767 = vmatprep.subr.bf16.mxu1 %v7870_v5 }
 0x50d   : > { %7270 = vmatpush3.bf16.msra.mxu0 %v7896_v29 }
 0x50e   : > { %5768 = vmatpush1.bf16.msra.mxu1 %v7868_v53  ;;  %7271 = vmatprep.subr.bf16.mxu0 %v7900_v4 }
 0x50f   : > { %5769 = vmatprep.subr.bf16.mxu1 %v7873_v55 }
 0x511   : > { %7272 = vmatpush3.bf16.msra.mxu0 %v7901_v11 }
 0x512   : > { %5770 = vmatpush1.bf16.msra.mxu1 %v7871_v63  ;;  %7273 = vmatprep.subr.bf16.mxu0 %v7905_v62 }
 0x513   : > { %5771 = vmatprep.subr.bf16.mxu1 %v7876_v59 }
 0x515   : > { %7274 = vmatpush3.bf16.msra.mxu0 %v7906_v14 }
 0x516   : > { %5772 = vmatpush1.bf16.msra.mxu1 %v7874_v6  ;;  %7275 = vmatprep.subr.bf16.mxu0 %v7910_v18 }
 0x517   : > { %5773 = vmatprep.subr.bf16.mxu1 %v7879_v36 }
 0x519   : > { %7276 = vmatpush3.bf16.msra.mxu0 %v7911_v8 }
 0x51a   : > { %5774 = vmatpush2.bf16.msra.mxu1 %v7877_v3  ;;  %7277 = vmatprep.subr.bf16.mxu0 %v7915_v25 }
 0x51b   : > { %5775 = vmatprep.subr.bf16.mxu1 %v7884_v60 }
 0x51d   : > { %7278 = vmatpush3.bf16.msra.mxu0 %v7916_v54 }
 0x51e   : > { %5776 = vmatpush2.bf16.msra.mxu1 %v7882_v23  ;;  %6079 = vmatprep.subr.bf16.mxu0 %v7919_v32 }
 0x51f   : > { %5777 = vmatprep.subr.bf16.mxu1 %v7889_v27 }
 0x522   : > { %5778 = vmatpush2.bf16.msra.mxu1 %v7887_v33  ;;  %v4634_v33 = vrot.slane %v4629_v43, %v8826_v42 }
 0x523   : > { %5779 = vmatprep.subr.bf16.mxu1 %v7894_v22 }
 0x526   : > { %5780 = vmatpush2.bf16.msra.mxu1 %v7892_v30 }
 0x527   : > { %5781 = vmatprep.subr.bf16.mxu1 %v7899_v10 }
 0x52a   : > { %5782 = vmatpush2.bf16.msra.mxu1 %v7897_v7 }
 0x52b   : > { %5783 = vmatprep.subr.bf16.mxu1 %v7904_v12 }
 0x52e   : > { %5784 = vmatpush2.bf16.msra.mxu1 %v7902_v13 }
 0x52f   : > { %5785 = vmatprep.subr.bf16.mxu1 %v7909_v15 }
 0x532   : > { %5786 = vmatpush2.bf16.msra.mxu1 %v7907_v19 }
 0x533   : > { %5787 = vmatprep.subr.bf16.mxu1 %v7914_v24 }
 0x536   : > { %5788 = vmatpush2.bf16.msra.mxu1 %v7912_v26 }
 0x53e   : > { %v5248_v35 = vpop.f32.mrf.mxu1 }
 0x53f   : > { %v5249_v62 = vadd.f32 %v5248_v35, %v4634_v33 }
 0x540   : > { %v5250_v39 = vpop.f32.mrf.mxu1 }
 0x541   : > { %v5251_v61 = vadd.f32 %v5250_v39, %v4638_v21 }
 0x542   : > { %v5252_v41 = vpop.f32.mrf.mxu1 }
 0x543   : > { %v5253_v22 = vadd.f32 %v5252_v41, %v4634_v33  ;;  %v7953_v33 = vld [vmem:[#allocation16 + $0xb0] ss:$8 sps:$4 sm:$0xff]  }
 0x544   : > { %v5254_v17 = vpop.f32.mrf.mxu1 }
 0x545   : > { %v5255_v2 = vadd.f32 %v5254_v17, %v4638_v21  ;;  %v7955_v21 = vld [vmem:[#allocation16 + $0xb4] ss:$8 sps:$4 sm:$0xff]  }
 0x580   : > { %v5291_v46 = vpop.f32.mrf.mxu0 }
 0x581   : > { %v5377_v45 = vpop.f32.mrf.mxu1  ;;  %v5292_v18 = vadd.f32 %v5291_v46, %v5249_v62  ;;  %v7917_v46 = vld [vmem:[#allocation16 + $0x70] ss:$8 sps:$4 sm:$0xff]  }
 0x582   : > { %v5293_v51 = vpop.f32.mrf.mxu0 }
 0x583   : > { %v5379_v48 = vpop.f32.mrf.mxu1  ;;  %v5294_v30 = vadd.f32 %v5293_v51, %v5251_v61  ;;  %v7958_v61 = vld [vmem:[#allocation16 + $0xa4] ss:$8 sps:$4 sm:$0xff]  }
 0x584   : > { %v5295_v28 = vpop.f32.mrf.mxu0 }
 0x585   : > { %v5381_v63 = vpop.f32.mrf.mxu1  ;;  %v5296_v29 = vadd.f32 %v5295_v28, %v5253_v22  ;;  %v7956_v22 = vld [vmem:[#allocation16 + $0xa0] ss:$8 sps:$4 sm:$0xff]  }
 0x586   : > { %v5297_v47 = vpop.f32.mrf.mxu0 }
 0x587   : > { %v5383_v23 = vpop.f32.mrf.mxu1  ;;  %v5298_v10 = vadd.f32 %v5297_v47, %v5255_v2  ;;  %v7920_v47 = vld [vmem:[#allocation16 + $0x60] ss:$8 sps:$4 sm:$0xff]   ;;  %v7961_v2 = vld [vmem:[#allocation16 + $0x94] ss:$8 sps:$4 sm:$0xff]  }
 0x5c0   : > { %v5334_v49 = vpop.f32.mrf.mxu0 }
 0x5c1   : > { %v5335_v50 = vadd.f32 %v5334_v49, %v4642_v16  ;;  %v7928_v49 = vld [vmem:[#allocation16 + $0x44] ss:$8 sps:$4 sm:$0xff]  }
 0x5c2   : > { %v5336_v5 = vpop.f32.mrf.mxu0 }
 0x5c3   : > { %v5378_v53 = vadd.f32 %v5377_v45, %v5335_v50  ;;  %v5337_v55 = vadd.f32 %v5336_v5, %v4646_v57  ;;  %v7926_v50 = vld [vmem:[#allocation16 + $0x40] ss:$8 sps:$4 sm:$0xff]   ;;  %v7931_v5 = vld [vmem:[#allocation16 + $0x34] ss:$8 sps:$4 sm:$0xff]  }
 0x5c4   : > { %v5338_v59 = vpop.f32.mrf.mxu0 }
 0x5c5   : > { %v7163_v6 = vmul.f32 -1.442695, %v5378_v53  ;;  %v5380_v36 = vadd.f32 %v5379_v48, %v5337_v55  ;;  %v5339_v1 = vadd.f32 %v5338_v59, %v4642_v16  ;;  %v7922_v16 = vld [vmem:[#allocation16 + $0x64] ss:$8 sps:$4 sm:$0xff]   ;;  %v7923_v48 = vld [vmem:[#allocation16 + $0x50] ss:$8 sps:$4 sm:$0xff]  }
 0x5c6   : > { %v5340_v3 = vpop.f32.mrf.mxu0  ;;  %v7929_v53 = vld [vmem:[#allocation16 + $0x30] ss:$8 sps:$4 sm:$0xff]   ;;  %v7934_v55 = vld [vmem:[#allocation16 + $0x24] ss:$8 sps:$4 sm:$0xff]   ;;  %v7937_v59 = vld [vmem:[#allocation16 + $0x14] ss:$8 sps:$4 sm:$0xff]  }
 0x5c7   : > { %v7164_v9 = vmul.f32 -1.442695, %v5380_v36  ;;  %v5382_v60 = vadd.f32 %v5381_v63, %v5339_v1  ;;  %v5341_v0 = vadd.f32 %v5340_v3, %v4646_v57  ;;  %8021 = vpow2.f32 %v7163_v6  ;;  %v7925_v57 = vld [vmem:[#allocation16 + $0x54] ss:$8 sps:$4 sm:$0xff]   ;;  %v7932_v63 = vld [vmem:[#allocation16 + $0x20] ss:$8 sps:$4 sm:$0xff]  }
 0x5c8   : > { %v7935_v6 = vld [vmem:[#allocation16 + $0x10] ss:$8 sps:$4 sm:$0xff]   ;;  %v7940_v36 = vld [vmem:[#allocation16 + $0x4] ss:$8 sps:$4 sm:$0xff]   ;;  %v7938_v1 = vld [vmem:[#allocation16] ss:$8 sps:$4 sm:$0xff]  }
 0x5c9   : > { %8023 = vpow2.f32 %v7164_v9  ;;  %v7165_v34 = vmul.f32 -1.442695, %v5382_v60  ;;  %v5384_v38 = vadd.f32 %v5383_v23, %v5341_v0  ;;  %v7943_v3 = vld [vmem:[#allocation16 + $0xf4] ss:$8 sps:$4 sm:$0xff]   ;;  %v7941_v9 = vld [vmem:[#allocation16 + $0xf0] ss:$8 sps:$4 sm:$0xff]  }
 0x5ca   : > { %v7946_v60 = vld [vmem:[#allocation16 + $0xe4] ss:$8 sps:$4 sm:$0xff]   ;;  %v7944_v0 = vld [vmem:[#allocation16 + $0xe0] ss:$8 sps:$4 sm:$0xff]   ;;  %v7949_v23 = vld [vmem:[#allocation16 + $0xd4] ss:$8 sps:$4 sm:$0xff]  }
 0x5cb   : > { %8025 = vpow2.f32 %v7165_v34  ;;  %v7166_v27 = vmul.f32 -1.442695, %v5384_v38  ;;  %v7947_v34 = vld [vmem:[#allocation16 + $0xd0] ss:$8 sps:$4 sm:$0xff]   ;;  %v7952_v38 = vld [vmem:[#allocation16 + $0xc4] ss:$8 sps:$4 sm:$0xff]  }
 0x5cd   : > { %8027 = vpow2.f32 %v7166_v27  ;;  %v7950_v27 = vld [vmem:[#allocation16 + $0xc0] ss:$8 sps:$4 sm:$0xff]  }
 0x5ce   : > { %8029 = vtanh.f32 %v5294_v30  ;;  %v7959_v30 = vld [vmem:[#allocation16 + $0x90] ss:$8 sps:$4 sm:$0xff]  }
 0x5cf   : > { %8031 = vtanh.f32 %v5296_v29  ;;  %v7964_v29 = vld [vmem:[#allocation16 + $0x84] ss:$8 sps:$4 sm:$0xff]  }
 0x5d0   : > { %8033 = vtanh.f32 %v5298_v10  ;;  %v5854_v10 = vpop.permute.xlu1 %5853 }
 0x5d4   : > { %v8022_v7 = vpop.eup %8021 }
 0x5d5   : > { %v5402_v13 = vadd.f32 1.0, %v8022_v7  ;;  %v7962_v7 = vld [vmem:[#allocation16 + $0x80] ss:$8 sps:$4 sm:$0xff]  }
 0x5d6   : > { %v8024_v4 = vpop.eup %8023 }
 0x5d7   : > { %v5403_v11 = vadd.f32 1.0, %v8024_v4  ;;  %v5852_v4 = vpop.permute.xlu0 %5851 }
 0x5d8   : > { %v8026_v12 = vpop.eup %8025 }
 0x5d9   : > { %v5404_v14 = vadd.f32 1.0, %v8026_v12  ;;  %8035 = vrcp.f32 %v5403_v11  ;;  %v5860_v11 = vpop.permute.xlu1 %5859  ;;  %v5484_v12 = vld [vmem:[#allocation15] sm:$0x7] }
 0x5da   : > { %v8028_v15 = vpop.eup %8027 }
 0x5db   : > { %8037 = vrcp.f32 %v5404_v14  ;;  %v5405_v19 = vadd.f32 1.0, %v8028_v15  ;;  %v8030_v8 = vpop.eup %8029  ;;  %v5858_v62 = vpop.permute.xlu0 %5857 }
 0x5dc   : > { %8039 = vrcp.f32 %v5402_v13  ;;  %v8032_v24 = vpop.eup %8031  ;;  %v5493_v13 = vrot.slane %v5484_v12, %v8822_v40 }
 0x5dd   : > { %8041 = vrcp.f32 %v5405_v19  ;;  %v8034_v25 = vpop.eup %8033 }
 0x5de   : > { %8043 = vtanh.f32 %v5292_v18  ;;  %v5489_v18 = vrot.slane %v5484_v12, %v8826_v42 }
 0x5e6   : > { %v8036_v26 = vpop.eup %8035 }
 0x5e7   : > { %v5415_v51 = vmul.f32 %v8036_v26, %v8030_v8  ;;  %v5862_v26 = vsel %vm4281_vm2, %v5852_v4, %v5854_v10 }
 0x5e8   : > { %v8038_v54 = vpop.eup %8037 }
 0x5e9   : > { %v8040_v32 = vpop.eup %8039  ;;  %v5416_v35 = vmul.f32 %v8038_v54, %v8032_v24  ;;  %v5856_v54 = vpop.permute.xlu1 %5855 }
 0x5ea   : > { %v8042_v39 = vpop.eup %8041 }
 0x5eb   : > { %v8044_v41 = vpop.eup %8043  ;;  %v5417_v17 = vmul.f32 %v8042_v39, %v8034_v25 }
 0x5ec   : > { %v5414_v28 = vmul.f32 %v8044_v41, %v8040_v32  ;;  %v5850_v41 = vpop.permute.xlu0 %5849 }
 0x5ed   : > { %v5419_v43 = vpack.c.bf16 %v5417_v17, %v5415_v51 }
 0x5ee   : > { %v5418_v45 = vpack.c.bf16 %v5416_v35, %v5414_v28  ;;  %v5863_v28 = vsel %vm4281_vm2, %v5856_v54, %v5858_v62 }
 0x5ef   : > { %5789 = vmatprep.mubr.bf16.mxu1 %v5419_v43  ;;  %5832 = vmatprep.mubr.bf16.mxu0 %v5419_v43 }
 0x5f0   : > { %5790 = vmatmul.mubr.bf16.vlgmr.msra.gmra.mxu1 %v5418_v45  ;;  %5833 = vmatmul.mubr.bf16.vlgmr.msra.gmra.mxu0 %v5418_v45 }
 0x5f1   : > { %6080 = vmatpush1.bf16.msra.mxu0 %v7917_v46  ;;  %v5864_v46 = vsel %vm4281_vm2, %v5858_v62, %v5860_v11 }
 0x5f2   : > { %6081 = vmatprep.subr.bf16.mxu0 %v7922_v16  ;;  %v5861_v16 = vsel %vm4281_vm2, %v5850_v41, %v5852_v4 }
 0x5f5   : > { %6082 = vmatpush1.bf16.msra.mxu0 %v7920_v47 }
 0x5f6   : > { %6083 = vmatprep.subr.bf16.mxu0 %v7925_v57 }
 0x5f9   : > { %6084 = vmatpush1.bf16.msra.mxu0 %v7923_v48 }
 0x5fa   : > { %6085 = vmatprep.subr.bf16.mxu0 %v7928_v49 }
 0x5fd   : > { %6086 = vmatpush1.bf16.msra.mxu0 %v7926_v50  ;;  %v7965_v50 = vld [vmem:[#allocation19 + $0x18] sm:$0xff]  }
 0x5fe   : > { %6087 = vmatprep.subr.bf16.mxu0 %v7931_v5  ;;  %v8515_v5 = vmov 0.0  }
 0x5ff   : > { %7295 = vmatprep.subr.bf16.mxu1 %v8515_v5  ;;  %7303 = vmatprep.mubr.msk.bf16.mxu1 %vm8516_vm3, %v8515_v5 }
 0x600   : > { %7296 = vmatpush3.bf16.msra.mxu1 %v7965_v50 }
 0x601   : > { %6088 = vmatpush1.bf16.msra.mxu0 %v7929_v53  ;;  %v7966_v53 = vld [vmem:[#allocation19 + $0x10] sm:$0xff]   ;;  %7297 = vmatprep.subr.bf16.mxu1 %v8515_v5 }
 0x602   : > { %6089 = vmatprep.subr.bf16.mxu0 %v7934_v55  ;;  %v7968_v55 = vld [vmem:[#allocation19] sm:$0xff]  }
 0x604   : > { %7298 = vmatpush3.bf16.msra.mxu1 %v7966_v53 }
 0x605   : > { %6090 = vmatpush1.bf16.msra.mxu0 %v7932_v63  ;;  %7299 = vmatprep.subr.bf16.mxu1 %v8515_v5 }
 0x606   : > { %6091 = vmatprep.subr.bf16.mxu0 %v7937_v59 }
 0x609   : > { %6092 = vmatpush1.bf16.msra.mxu0 %v7935_v6  ;;  %v9216_v6 = vrot.slane %v5484_v12, %v8829_v44 }
 0x60a   : > { %6093 = vmatprep.subr.bf16.mxu0 %v7940_v36 }
 0x60d   : > { %6094 = vmatpush1.bf16.msra.mxu0 %v7938_v1 }
 0x60e   : > { %6095 = vmatprep.subr.bf16.mxu0 %v7943_v3 }
 0x611   : > { %6096 = vmatpush2.bf16.msra.mxu0 %v7941_v9 }
 0x612   : > { %6097 = vmatprep.subr.bf16.mxu0 %v7946_v60 }
 0x615   : > { %6098 = vmatpush2.bf16.msra.mxu0 %v7944_v0 }
 0x616   : > { %6099 = vmatprep.subr.bf16.mxu0 %v7949_v23 }
 0x619   : > { %6100 = vmatpush2.bf16.msra.mxu0 %v7947_v34 }
 0x61a   : > { %6101 = vmatprep.subr.bf16.mxu0 %v7952_v38 }
 0x61d   : > { %6102 = vmatpush2.bf16.msra.mxu0 %v7950_v27 }
 0x61e   : > { %6103 = vmatprep.subr.bf16.mxu0 %v7955_v21 }
 0x621   : > { %6104 = vmatpush2.bf16.msra.mxu0 %v7953_v33 }
 0x622   : > { %6105 = vmatprep.subr.bf16.mxu0 %v7958_v61 }
 0x625   : > { %6106 = vmatpush2.bf16.msra.mxu0 %v7956_v22  ;;  %v5912_v22 = vrot.slane %v5907_v37, %v8826_v42  ;;  %v7970_v42 = vld [vmem:[#allocation22 + $0x10] sm:$0xff]  }
 0x626   : > { %6107 = vmatprep.subr.bf16.mxu0 %v7961_v2 }
 0x629   : > { %6108 = vmatpush2.bf16.msra.mxu0 %v7959_v30 }
 0x62a   : > { %6109 = vmatprep.subr.bf16.mxu0 %v7964_v29 }
 0x62d   : > { %6110 = vmatpush2.bf16.msra.mxu0 %v7962_v7 }
 0x6b0   : > { %v5791_v14 = vpop.f32.mrf.mxu1  ;;  %v7279_v15 = vpop.f32.mrf.mxu0 }
 0x6b1   : > { %v5792_v51 = vadd.f32 %v5791_v14, %v5489_v18 }
 0x6b2   : > { %v5793_v19 = vpop.f32.mrf.mxu1  ;;  %v7280_v8 = vpop.f32.mrf.mxu0 }
 0x6b3   : > { %v5794_v24 = vadd.f32 %v5793_v19, %v5493_v13  ;;  %v7281_v25 = vadd.f32 %v7280_v8, %v7279_v15  ;;  %v5869_v57 = vadd.f32 %v5861_v16, %v5792_v51  ;;  %v7969_v15 = vld [vmem:[#allocation22 + $0x18] sm:$0xff]   ;;  %v7971_v19 = vld [vmem:[#allocation22 + $0x8] sm:$0xff]   ;;  %v7972_v8 = vld [vmem:[#allocation22] sm:$0xff]  }
 0x6b4   : > { %v5795_v32 = vpop.f32.mrf.mxu1  ;;  %v7282_v0 = vpop.f32.mrf.mxu0 }
 0x6b5   : > { %v5870_v39 = vadd.f32 %v5862_v26, %v5794_v24  ;;  %v5796_v35 = vadd.f32 %v5795_v32, %v5489_v18  ;;  %v5835_v3 = vadd.f32 %v7281_v25, %v9216_v6  ;;  %v7249_v24 = vld [vmem:[#allocation21] ss:$0 sm:$0xff] }
 0x6b6   : > { %v5797_v17 = vpop.f32.mrf.mxu1  ;;  %v7283_v23 = vpop.f32.mrf.mxu0 }
 0x6b7   : > { %v5798_v43 = vadd.f32 %v5797_v17, %v5493_v13  ;;  %6234 = vrot.lane.b32.xlu0 %v5870_v39, %s8514_s30  ;;  %v5871_v45 = vadd.f32 %v5863_v28, %v5796_v35 }
 0x6b9   : > { %v5872_v47 = vadd.f32 %v5864_v46, %v5798_v43  ;;  %v5873_v49 = vpack.c.bf16 %v5871_v45, %v5869_v57  ;;  %v7284_v45 = vadd.f32 %v7283_v23, %v7282_v0 }
 0x6bb   : > { %6236 = vrot.lane.b32.xlu1 %v5872_v47, %s8514_s30  ;;  %4459 = vrot.lane.b32.xlu0 %v9021_v52, %s8514_s30  ;;  %v5874_v48 = vpack.c.bf16 %v5872_v47, %v5870_v39  ;;  %v7967_v52 = vld [vmem:[#allocation19 + $0x8] sm:$0xff]   ;;  %v5838_v57 = vadd.f32 %v7284_v45, %v9216_v6 }
 0x6bc   : > { %7300 = vmatpush3.bf16.msra.mxu1 %v7967_v52 }
 0x6bd   : > { %6111 = vmatprep.mubr.bf16.mxu0 %v5874_v48  ;;  %7301 = vmatprep.subr.bf16.mxu1 %v8515_v5 }
 0x6be   : > { %6112 = vmatmul.mubr.bf16.vlgmr.msra.gmra.mxu0 %v5873_v49 }
 0x6bf   : > { %4461 = vrot.lane.b32.xlu1 %v9029_v31, %s8514_s30  ;;  %v8057_v31 = vld [vmem:[#allocation4] sm:$0x3f] }
 0x6c0   : > { %7302 = vmatpush3.bf16.msra.mxu1 %v7968_v55  ;;  %v9212_v63 = vrot.slane %v8057_v31, %v796_v56  ;;  %v5916_v56 = vrot.slane %v5907_v37, %v8822_v40 }
 0x6c1   : > { %7307 = vmatprep.subr.bf16.mxu1 %v8515_v5 }
 0x6c2   : > { %v1030_v36 = vadd.f32 %v8863_v20, %v9212_v63  ;;  %v1034_v46 = vadd.f32 %v8901_v58, %v9212_v63  ;;  %v7255_v58 = vld [vmem:[#allocation24] ss:$0 sm:$0xff] }
 0x729   : > { %v6235_v59 = vpop.permute.xlu0 %6234 }
 0x72d   : > { %v4460_v1 = vpop.permute.xlu0 %4459  ;;  %v6237_v35 = vpop.permute.xlu1 %6236 }
 0x72e   : > { %v4465_v9 = vadd.f32 %v4460_v1, %v1030_v36 }
 0x730   : > { %v9221_v60 = vadd.f32 %v5835_v3, %v4465_v9 }
 0x731   : > { %v4462_v43 = vpop.permute.xlu1 %4461 }
 0x732   : > { %v4466_v16 = vadd.f32 %v4462_v43, %v1034_v46 }
 0x734   : > { %v5842_v49 = vadd.f32 %v5838_v57, %v4466_v16 }
 0x77e   : > { %v6113_v34 = vpop.f32.mrf.mxu0 }
 0x77f   : > { %v6114_v30 = vadd.f32 %v6113_v34, %v5912_v22 }
 0x780   : > { %v6115_v38 = vpop.f32.mrf.mxu0 }
 0x781   : > { %v6116_v27 = vadd.f32 %v6115_v38, %v5916_v56 }
 0x782   : > { %v6117_v21 = vpop.f32.mrf.mxu0 }
 0x783   : > { %v7247_v44 = vmul.f32 -1.442695, %v6116_v27  ;;  %v6118_v7 = vadd.f32 %v6117_v21, %v5912_v22 }
 0x784   : > { %v6119_v33 = vpop.f32.mrf.mxu0 }
 0x785   : > { %8045 = vpow2.f32 %v7247_v44  ;;  %v6120_v61 = vadd.f32 %v6119_v33, %v5916_v56 }
 0x787   : > { %v7248_v20 = vmul.f32 -1.442695, %v6120_v61 }
 0x789   : > { %8047 = vpow2.f32 %v7248_v20 }
 0x78a   : > { %8049 = vtanh.f32 %v6114_v30 }
 0x792   : > { %v8046_v2 = vpop.eup %8045 }
 0x793   : > { %v6130_v29 = vadd.f32 1.0, %v8046_v2 }
 0x795   : > { %8051 = vrcp.f32 %v6130_v29 }
 0x796   : > { %v8048_v10 = vpop.eup %8047  ;;  %8053 = vtanh.f32 %v6118_v7 }
 0x797   : > { %v6131_v40 = vadd.f32 1.0, %v8048_v10  ;;  %v8050_v4 = vpop.eup %8049 }
 0x799   : > { %8055 = vrcp.f32 %v6131_v40 }
 0x7a2   : > { %v8052_v11 = vpop.eup %8051 }
 0x7a3   : > { %v8054_v12 = vpop.eup %8053  ;;  %v6136_v13 = vmul.f32 %v8052_v11, %v8050_v4 }
 0x7a6   : > { %v8056_v62 = vpop.eup %8055 }
 0x7a7   : > { %v6137_v14 = vmul.f32 %v8056_v62, %v8054_v12 }
 0x7a9   : > { %v6138_v18 = vpack.c.bf16 %v6137_v14, %v6136_v13 }
 0x7ab   : > { %7304 = vmatmul.mubr.msk.bf16.vlgmr.msra.gmra.mxu1 %vm4281_vm2, %v6138_v18 }
 0x7ac   : > { %7308 = vmatpush3.bf16.msra.mxu1 %v7969_v15  ;;  %7315 = vmatprep.mubr.msk.bf16.mxu1 %vm8516_vm3, %v8515_v5 }
 0x7ad   : > { %7309 = vmatprep.subr.bf16.mxu1 %v8515_v5 }
 0x7b0   : > { %7310 = vmatpush3.bf16.msra.mxu1 %v7970_v42 }
 0x7b1   : > { %7311 = vmatprep.subr.bf16.mxu1 %v8515_v5 }
 0x7b4   : > { %7312 = vmatpush3.bf16.msra.mxu1 %v7971_v19 }
 0x7b5   : > { %7313 = vmatprep.subr.bf16.mxu1 %v8515_v5 }
 0x7b8   : > { %7314 = vmatpush3.bf16.msra.mxu1 %v7972_v8 }
 0x86b   : > { %v6215_v25 = vpop.f32.mrf.mxu1 }
 0x86c   : > { %v6216_v26 = vadd.f32 %v7249_v24, %v6215_v25 }
 0x86d   : > { %v7305_v54 = vpop.f32.mrf.mxu1 }
 0x86e   : > { %6224 = vrot.lane.b32.xlu0 %v6216_v26, %s8514_s30  ;;  %v6240_v51 = vadd.f32 %v6235_v59, %v6216_v26 }
 0x86f   : > { %v6218_v32 = vpop.f32.mrf.mxu1 }
 0x870   : > { %v6219_v39 = vadd.f32 %v7249_v24, %v6218_v32 }
 0x871   : > { %v7306_v41 = vpop.f32.mrf.mxu1 }
 0x872   : > { %v6241_v17 = vadd.f32 %v6237_v35, %v6219_v39  ;;  %6226 = vrot.lane.b32.xlu1 %v6219_v39, %s8514_s30 }
 0x874   : > { %v6242_v28 = vpack.c.bf16 %v6241_v17, %v6240_v51 }
 0x876   : > { %7316 = vmatmul.mubr.msk.bf16.vlgmr.msra.gmra.mxu1 %vm4281_vm2, %v6242_v28 }
 0x8e0   : > { %v6225_v47 = vpop.permute.xlu0 %6224 }
 0x8e1   : > { %v6230_v48 = vadd.f32 %v6225_v47, %v9221_v60 }
 0x8e3   : > { %6328 = vrot.lane.b32.xlu0 %v6230_v48, %s8514_s30 }
 0x8e4   : > { %v6227_v50 = vpop.permute.xlu1 %6226 }
 0x8e5   : > { %v6231_v5 = vadd.f32 %v6227_v50, %v5842_v49 }
 0x8e7   : > { %6330 = vrot.lane.b32.xlu1 %v6231_v5, %s8514_s30 }
 0x936   : > { %v6319_v53 = vpop.f32.mrf.mxu1 }
 0x937   : > { %v6320_v63 = vadd.f32 %v7255_v58, %v6319_v53 }
 0x938   : > { %v7317_v52 = vpop.f32.mrf.mxu1 }
 0x93a   : > { %v6322_v55 = vpop.f32.mrf.mxu1 }
 0x93b   : > { %v6323_v1 = vadd.f32 %v7255_v58, %v6322_v55 }
 0x93c   : > { %v7318_v31 = vpop.f32.mrf.mxu1 }
 0x955   : > { %v6329_v59 = vpop.permute.xlu0 %6328 }
 0x956   : > { %v6334_v36 = vsel %vm4281_vm2, %v6230_v48, %v6329_v59 }
 0x957   : > { %v6336_v6 = vadd.f32 %v6334_v36, %v6320_v63 }
 0x959   : > { %v6338_v3 = vmax.f32 %v6336_v6, 0.0  ;;  %v6331_v9 = vpop.permute.xlu1 %6330 }
 0x95a   : > { %v6335_v60 = vsel %vm4281_vm2, %v6231_v5, %v6331_v9 }
 0x95b   : > { %6340 = vst [vmem:[%s752_s28] sm:$0xff] %v6338_v3  ;;  %v6337_v0 = vadd.f32 %v6335_v60, %v6323_v1 }
 0x95d   : > { %v6339_v23 = vmax.f32 %v6337_v0, 0.0 }
 0x95f   : > { %6341 = vst [vmem:[%s752_s28 + $0x8] sm:$0xff] %v6339_v23 }
 0x960 PF: > { %s35_s24 = sadd.s32 1, %s8486_s24  }
 0x961   : > { %p32_p6 = scmp.ge.s32.totalorder %s35_s24, 4  }
 0x963   :  { %34 = sbr.rel (!%p32_p6) target bundleno = 12 (0xc), region = 179 }
 0x968   :  { %6364 = vsyncpa [#allocation3], 1 }
 0x969   :  { %6366 = vsyncpa [#allocation3 + $0x1], 1 }
 0x96a   :  { %6367 = vsyncpa [#allocation5], 1 }
 0x96b   :  { %6368 = vsyncpa [#allocation8], 1 }
 0x96c   :  { %6369 = vsyncpa [#allocation11], 1 }
 0x96d   :  { %6370 = vsyncpa [#allocation14], 1 }
 0x96e   :  { %6371 = vsyncpa [#allocation17], 1 }
 0x96f   :  { %6372 = vsyncpa [#allocation20], 1 }
 0x970   :  { %6373 = vsyncpa [#allocation23], 1 }

</bundles_post_ra>
